<compile_context>
chip_gen: v7x
topology: tpu7x:2x2x1
jax: 0.10.0
libtpu: 0.0.40
codegen_flags: <defaults>
</compile_context>

<pallas_src>
import functools

import jax
import jax.numpy as jnp
from jax.experimental import pallas as pl
from jax.experimental.pallas import tpu as pltpu


# ----------------------------------------------------------------------------
# In-kernel helpers
# ----------------------------------------------------------------------------
def _mm(a, b):
    return jax.lax.dot_general(
        a, b, (((1,), (0,)), ((), ())),
        preferred_element_type=jnp.float32,
        precision=jax.lax.Precision.HIGHEST)


def _down_kernel(x_ref, a1_ref, a2_ref, a3_ref, b1_ref, b2_ref, b3_ref,
                 o_ref, xp_ref, y1p_ref, zp_ref, *, H, Ho):
    """One batch-block.  Each stage = 3 MXU matmuls over lane-dense planes.

    x_ref : (1, H, L1)   packed input block, lanes = (nb, c, w)
    a*_ref: (3, Lin, Lout) per-ky folded conv matrices (channel mix + kx taps
                            + W padding + column stride baked in on the host)
    b*_ref: (1, Lout)    lane-broadcast (folded) biases
    o_ref : (1, Ho, Lout) packed output block
    xp/y1p/zp : row-padded VMEM scratch planes (only border rows are zeroed)
    """
    f32 = jnp.float32
    L1 = xp_ref.shape[1]
    L2 = zp_ref.shape[1]
    z1 = jnp.zeros((1, L1), f32)
    z2 = jnp.zeros((1, L2), f32)

    # ---- stage 1: ReLU -> SeparableConv2d(C1,C1) -> ReLU -------------------
    xp_ref[0:1, :] = z1                       # zero only the two border rows
    xp_ref[H + 1:H + 2, :] = z1
    xp_ref[pl.ds(1, H), :] = jnp.maximum(x_ref[0], 0.0)

    y1 = _mm(xp_ref[pl.ds(0, H), :], a1_ref[0])
    y1 = y1 + _mm(xp_ref[pl.ds(1, H), :], a1_ref[1])
    y1 = y1 + _mm(xp_ref[pl.ds(2, H), :], a1_ref[2])
    y1 = jnp.maximum(y1 + b1_ref[...], 0.0)                   # (H, L1)

    # ---- stage 2: Conv2d(C1->C2, k3, s2, p1) -> ReLU ------------------------
    # stride-2 row subsample = sublane-strided reads of the row-padded plane;
    # the stride-2 column subsample is folded into a2.
    y1p_ref[0:1, :] = z1
    y1p_ref[pl.ds(1, H), :] = y1
    z = _mm(y1p_ref[pl.ds(0, Ho, 2), :], a2_ref[0])
    z = z + _mm(y1p_ref[pl.ds(1, Ho, 2), :], a2_ref[1])
    z = z + _mm(y1p_ref[pl.ds(2, Ho, 2), :], a2_ref[2])
    z = jnp.maximum(z + b2_ref[...], 0.0)                     # (Ho, L2)

    # ---- stage 3: SeparableConv2d(C2,C1), no ReLU ---------------------------
    zp_ref[0:1, :] = z2
    zp_ref[Ho + 1:Ho + 2, :] = z2
    zp_ref[pl.ds(1, Ho), :] = z
    out = _mm(zp_ref[pl.ds(0, Ho), :], a3_ref[0])
    out = out + _mm(zp_ref[pl.ds(1, Ho), :], a3_ref[1])
    out = out + _mm(zp_ref[pl.ds(2, Ho), :], a3_ref[2])
    o_ref[0] = out + b3_ref[...]                              # (Ho, Lout)


# ----------------------------------------------------------------------------
# Host-side weight folding (done once, tiny matrices)
# ----------------------------------------------------------------------------
def _pack_weights(p, *, NB, C1, C2, W, Wo):
    f32 = jnp.float32
    dw1 = p['dw1_w'].reshape(C1, 3, 3).astype(f32)
    dw2 = p['dw2_w'].reshape(C2, 3, 3).astype(f32)
    sc = p['sc_w'].reshape(C2, C1, 3, 3).astype(f32)
    pw1 = p['pw1_w'].astype(f32)
    pw2 = p['pw2_w'].astype(f32)

    # separable conv == dense 3x3 conv with rank-structured kernel; depthwise
    # bias folded into the pointwise bias.
    k1 = pw1[:, :, None, None] * dw1[None]          # (C1, C1, 3, 3)
    k3 = pw2[:, :, None, None] * dw2[None]          # (C1, C2, 3, 3)
    b1 = p['pw1_b'] + pw1 @ p['dw1_b']
    b2 = p['sc_b'].astype(f32)
    b3 = p['pw2_b'] + pw2 @ p['dw2_b']

    eye_nb = jnp.eye(NB, dtype=f32)

    def stage_mats(k, win, wout, stride):
        # k: (Cout, Cin, 3, 3).  A[ky][(nb,ci,w),(nb,co,wo)] = k[co,ci,ky,kx]
        # with kx = w - stride*wo + 1 (zero outside 0..2): folds kx taps,
        # column zero-padding, the column stride and the channel mix.
        wi = jnp.arange(win)[:, None]
        wo = jnp.arange(wout)[None, :]
        mats = []
        for ky in range(3):
            m = jnp.zeros((k.shape[1] * win, k.shape[0] * wout), f32)
            for kx in range(3):
                sel = (wi == stride * wo + kx - 1).astype(f32)
                m = m + jnp.kron(k[:, :, ky, kx].T, sel)
            mats.append(jnp.kron(eye_nb, m))
        return jnp.stack(mats, axis=0)

    A1 = stage_mats(k1, W, W, 1)      # (3, L1, L1)
    A2 = stage_mats(sc, W, Wo, 2)     # (3, L1, L2)
    A3 = stage_mats(k3, Wo, Wo, 1)    # (3, L2, Lout)

    b1v = jnp.broadcast_to(b1[None, :, None], (NB, C1, W)).reshape(1, NB * C1 * W)
    b2v = jnp.broadcast_to(b2[None, :, None], (NB, C2, Wo)).reshape(1, NB * C2 * Wo)
    b3v = jnp.broadcast_to(b3[None, :, None], (NB, C1, Wo)).reshape(1, NB * C1 * Wo)
    return A1, A2, A3, b1v, b2v, b3v


# ----------------------------------------------------------------------------
# Wrapper: single fused pallas_call, grid over batch blocks
# ----------------------------------------------------------------------------
def down_forward(x_nchw, p):
    """Down.forward — PyTorch NCHW in / NCHW out."""
    x = x_nchw.astype(jnp.float32)
    N, C1, H, W = x.shape
    C2 = p['dw2_b'].shape[0]
    Ho, Wo = (H + 1) // 2, (W + 1) // 2

    # batch-block size: fill the 128-lane vreg with (batch, channel, width)
    NB = max(1, min(N, 128 // (C1 * W)))
    G = -(-N // NB)
    Np = G * NB
    if Np != N:
        x = jnp.concatenate([x, jnp.zeros((Np - N, C1, H, W), x.dtype)], 0)

    L1, L2, Lout = NB * C1 * W, NB * C2 * Wo, NB * C1 * Wo

    # pack to lane-dense (G, H, NB*C1*W), lanes = (nb, c, w)
    x_pk = x.reshape(G, NB, C1, H, W).transpose(0, 3, 1, 2, 4).reshape(G, H, L1)
    A1, A2, A3, b1v, b2v, b3v = _pack_weights(p, NB=NB, C1=C1, C2=C2, W=W, Wo=Wo)

    kern = functools.partial(_down_kernel, H=H, Ho=Ho)
    const3 = lambda *_: (0, 0, 0)
    const2 = lambda *_: (0, 0)

    out = pl.pallas_call(
        kern,
        out_shape=jax.ShapeDtypeStruct((G, Ho, Lout), jnp.float32),
        grid=(G,),
        in_specs=[
            pl.BlockSpec((1, H, L1), lambda g: (g, 0, 0)),
            pl.BlockSpec((3, L1, L1), const3),
            pl.BlockSpec((3, L1, L2), const3),
            pl.BlockSpec((3, L2, Lout), const3),
            pl.BlockSpec((1, L1), const2),
            pl.BlockSpec((1, L2), const2),
            pl.BlockSpec((1, Lout), const2),
        ],
        out_specs=pl.BlockSpec((1, Ho, Lout), lambda g: (g, 0, 0)),
        scratch_shapes=[
            pltpu.VMEM((H + 2, L1), jnp.float32),   # row-padded relu(x)
            pltpu.VMEM((H + 1, L1), jnp.float32),   # row-padded stage-1 out
            pltpu.VMEM((Ho + 2, L2), jnp.float32),  # row-padded stage-2 out
        ],
        compiler_params=pltpu.CompilerParams(
            dimension_semantics=("parallel",)),
    )(x_pk, A1, A2, A3, b1v, b2v, b3v)

    # unpack the lane-dense slab back to NCHW (layout plumbing only)
    out = out.reshape(G, Ho, NB, C1, Wo).transpose(0, 2, 3, 1, 4)
    return out.reshape(Np, C1, Ho, Wo)[:N]


# ----------------------------------------------------------------------------
# Deterministic parameter init (PyTorch-style uniform(-1/sqrt(fan_in), ...))
#   dw*_w : (C, 9)        depthwise, index [c, ky*3+kx]
#   pw*_w : (Cout, Cin)   pointwise
#   sc_w  : (Cout, Cin*9) stride conv, index [co, ci*9+ky*3+kx]
# ----------------------------------------------------------------------------
def _uniform(key, shape, fan_in):
    bound = 1.0 / (fan_in ** 0.5)
    return jax.random.uniform(key, shape, jnp.float32, -bound, bound)


def init_down_params(key, nf_in, nf_out):
    ks = jax.random.split(key, 10)
    p = {}
    p['dw1_w'] = _uniform(ks[0], (nf_in, 9), 9)
    p['dw1_b'] = _uniform(ks[1], (nf_in,), 9)
    p['pw1_w'] = _uniform(ks[2], (nf_in, nf_in), nf_in)
    p['pw1_b'] = _uniform(ks[3], (nf_in,), nf_in)
    p['sc_w'] = _uniform(ks[4], (nf_out, nf_in * 9), nf_in * 9)
    p['sc_b'] = _uniform(ks[5], (nf_out,), nf_in * 9)
    p['dw2_w'] = _uniform(ks[6], (nf_out, 9), 9)
    p['dw2_b'] = _uniform(ks[7], (nf_out,), 9)
    p['pw2_w'] = _uniform(ks[8], (nf_in, nf_out), nf_out)
    p['pw2_b'] = _uniform(ks[9], (nf_in,), nf_out)
    return p


# ----------------------------------------------------------------------------
# Pure-JAX reference (for correctness check)
# ----------------------------------------------------------------------------
def ref_forward(x_nchw, p):
    x = jnp.transpose(x_nchw, (0, 2, 3, 1)).astype(jnp.float32)
    dn = ('NHWC', 'HWIO', 'NHWC')
    C1 = p['dw1_b'].shape[0]
    C2 = p['dw2_b'].shape[0]

    def conv(x, w, b, stride, groups):
        pad = [(w.shape[0] // 2,) * 2, (w.shape[1] // 2,) * 2]
        y = jax.lax.conv_general_dilated(
            x, w, (stride, stride), pad, dimension_numbers=dn,
            feature_group_count=groups, precision=jax.lax.Precision.HIGHEST)
        return y + b.reshape(1, 1, 1, -1)

    dw1 = p['dw1_w'].reshape(C1, 3, 3).transpose(1, 2, 0)[:, :, None, :]
    pw1 = p['pw1_w'].T[None, None]
    scw = p['sc_w'].reshape(C2, C1, 3, 3).transpose(2, 3, 1, 0)
    dw2 = p['dw2_w'].reshape(C2, 3, 3).transpose(1, 2, 0)[:, :, None, :]
    pw2 = p['pw2_w'].T[None, None]

    y = jax.nn.relu(x)
    y = conv(y, dw1, p['dw1_b'], 1, C1)
    y = conv(y, pw1, p['pw1_b'], 1, 1)
    y = jax.nn.relu(y)
    y = jax.nn.relu(conv(y, scw, p['sc_b'], 2, 1))
    y = conv(y, dw2, p['dw2_b'], 1, C2)
    y = conv(y, pw2, p['pw2_b'], 1, 1)
    return jnp.transpose(y, (0, 3, 1, 2))


# ----------------------------------------------------------------------------
if __name__ == "__main__":
    key = jax.random.PRNGKey(0)
    kx_, kp = jax.random.split(key)
    nf_in, nf_out = 4, 8
    x = jax.random.normal(kx_, (2, nf_in, 16, 16), jnp.float32)

    params = init_down_params(kp, nf_in, nf_out)

    out = jax.block_until_ready(down_forward(x, params))
    ref = jax.block_until_ready(ref_forward(x, params))

    assert out.shape == (2, nf_in, 8, 8), out.shape
    max_err = float(jnp.max(jnp.abs(out - ref)))
    assert jnp.allclose(out, ref, atol=2e-4, rtol=2e-4), max_err
    print("KERNEL_OK")
</pallas_src>

<mosaic_0001>
module attributes {stable_mosaic.version = 11 : i64} {
  func.func @_down_kernel(%arg0: i32, %arg1: memref<1x16x128xf32, #tpu.memory_space<vmem>>, %arg2: memref<3x128x128xf32, #tpu.memory_space<vmem>>, %arg3: memref<3x128x128xf32, #tpu.memory_space<vmem>>, %arg4: memref<3x128x64xf32, #tpu.memory_space<vmem>>, %arg5: memref<1x128xf32, #tpu.memory_space<vmem>>, %arg6: memref<1x128xf32, #tpu.memory_space<vmem>>, %arg7: memref<1x64xf32, #tpu.memory_space<vmem>>, %arg8: memref<1x8x64xf32, #tpu.memory_space<vmem>>, %arg9: memref<18x128xf32, #tpu.memory_space<vmem>>, %arg10: memref<17x128xf32, #tpu.memory_space<vmem>>, %arg11: memref<10x128xf32, #tpu.memory_space<vmem>>) attributes {dimension_semantics = [#tpu.dimension_semantics<parallel>], iteration_bounds = array<i64: 1>, scalar_prefetch = 0 : i64, scratch_operands = 3 : i64, tpu.core_type = #tpu.core_type<tc>, window_params = [{transform_indices = @transform_0, window_bounds = array<i64: 1, 16, 128>}, {pipeline_mode = #tpu.pipeline_mode<synchronous>, transform_indices = @transform_1, window_bounds = array<i64: 3, 128, 128>}, {pipeline_mode = #tpu.pipeline_mode<synchronous>, transform_indices = @transform_2, window_bounds = array<i64: 3, 128, 128>}, {pipeline_mode = #tpu.pipeline_mode<synchronous>, transform_indices = @transform_3, window_bounds = array<i64: 3, 128, 64>}, {pipeline_mode = #tpu.pipeline_mode<synchronous>, transform_indices = @transform_4, window_bounds = array<i64: 1, 128>}, {pipeline_mode = #tpu.pipeline_mode<synchronous>, transform_indices = @transform_5, window_bounds = array<i64: 1, 128>}, {pipeline_mode = #tpu.pipeline_mode<synchronous>, transform_indices = @transform_6, window_bounds = array<i64: 1, 64>}, {transform_indices = @transform_7, window_bounds = array<i64: 1, 8, 64>}]} {
    %cst = arith.constant 0.000000e+00 : f32
    %0 = vector.broadcast %cst : f32 to vector<1x128xf32>
    %cst_0 = arith.constant 0.000000e+00 : f32
    %1 = vector.broadcast %cst_0 : f32 to vector<1x128xf32>
    %c0 = arith.constant 0 : index
    %c0_1 = arith.constant 0 : index
    %2 = vector.load %arg9[%c0, %c0_1] : memref<18x128xf32, #tpu.memory_space<vmem>>, vector<1x128xf32>
    tpu.vector_store %arg9[%c0, %c0_1], %0 {strides = array<i32>} : memref<18x128xf32, #tpu.memory_space<vmem>>, vector<1x128xf32>,
    %c17 = arith.constant 17 : index
    %c0_2 = arith.constant 0 : index
    %3 = vector.load %arg9[%c17, %c0_2] : memref<18x128xf32, #tpu.memory_space<vmem>>, vector<1x128xf32>
    tpu.vector_store %arg9[%c17, %c0_2], %0 {strides = array<i32>} : memref<18x128xf32, #tpu.memory_space<vmem>>, vector<1x128xf32>,
    %c0_3 = arith.constant 0 : index
    %c0_4 = arith.constant 0 : index
    %c0_5 = arith.constant 0 : index
    %4 = vector.load %arg1[%c0_3, %c0_4, %c0_5] : memref<1x16x128xf32, #tpu.memory_space<vmem>>, vector<1x16x128xf32>
    %5 = vector.shape_cast %4 : vector<1x16x128xf32> to vector<16x128xf32>
    %cst_6 = arith.constant 0.000000e+00 : f32
    %6 = vector.broadcast %cst_6 : f32 to vector<16x128xf32>
    %7 = arith.maximumf %5, %6 : vector<16x128xf32>
    %c1 = arith.constant 1 : index
    %c0_7 = arith.constant 0 : index
    %8 = vector.load %arg9[%c1, %c0_7] : memref<18x128xf32, #tpu.memory_space<vmem>>, vector<16x128xf32>
    tpu.vector_store %arg9[%c1, %c0_7], %7 {strides = array<i32>} : memref<18x128xf32, #tpu.memory_space<vmem>>, vector<16x128xf32>,
    %c0_8 = arith.constant 0 : index
    %c0_9 = arith.constant 0 : index
    %9 = vector.load %arg9[%c0_8, %c0_9] : memref<18x128xf32, #tpu.memory_space<vmem>>, vector<16x128xf32>
    %c0_10 = arith.constant 0 : index
    %c0_11 = arith.constant 0 : index
    %c0_12 = arith.constant 0 : index
    %10 = vector.load %arg2[%c0_10, %c0_11, %c0_12] : memref<3x128x128xf32, #tpu.memory_space<vmem>>, vector<1x128x128xf32>
    %11 = vector.shape_cast %10 : vector<1x128x128xf32> to vector<128x128xf32>
    %cst_13 = arith.constant dense<0.000000e+00> : vector<16x128xf32>
    %12 = tpu.matmul %9, %11, %cst_13 {dimension_numbers = #tpu.dot_dimension_numbers<[1], [0], [0], [1], [0, 0, 1, 1], [], []>, precision = #tpu.contract_precision<fp32>} : vector<16x128xf32>, vector<128x128xf32>, vector<16x128xf32> -> vector<16x128xf32>
    %c1_14 = arith.constant 1 : index
    %c0_15 = arith.constant 0 : index
    %13 = vector.load %arg9[%c1_14, %c0_15] : memref<18x128xf32, #tpu.memory_space<vmem>>, vector<16x128xf32>
    %c1_16 = arith.constant 1 : index
    %c0_17 = arith.constant 0 : index
    %c0_18 = arith.constant 0 : index
    %14 = vector.load %arg2[%c1_16, %c0_17, %c0_18] : memref<3x128x128xf32, #tpu.memory_space<vmem>>, vector<1x128x128xf32>
    %15 = vector.shape_cast %14 : vector<1x128x128xf32> to vector<128x128xf32>
    %cst_19 = arith.constant dense<0.000000e+00> : vector<16x128xf32>
    %16 = tpu.matmul %13, %15, %cst_19 {dimension_numbers = #tpu.dot_dimension_numbers<[1], [0], [0], [1], [0, 0, 1, 1], [], []>, precision = #tpu.contract_precision<fp32>} : vector<16x128xf32>, vector<128x128xf32>, vector<16x128xf32> -> vector<16x128xf32>
    %17 = arith.addf %12, %16 : vector<16x128xf32>
    %c2 = arith.constant 2 : index
    %c0_20 = arith.constant 0 : index
    %18 = vector.load %arg9[%c2, %c0_20] : memref<18x128xf32, #tpu.memory_space<vmem>>, vector<16x128xf32>
    %c2_21 = arith.constant 2 : index
    %c0_22 = arith.constant 0 : index
    %c0_23 = arith.constant 0 : index
    %19 = vector.load %arg2[%c2_21, %c0_22, %c0_23] : memref<3x128x128xf32, #tpu.memory_space<vmem>>, vector<1x128x128xf32>
    %20 = vector.shape_cast %19 : vector<1x128x128xf32> to vector<128x128xf32>
    %cst_24 = arith.constant dense<0.000000e+00> : vector<16x128xf32>
    %21 = tpu.matmul %18, %20, %cst_24 {dimension_numbers = #tpu.dot_dimension_numbers<[1], [0], [0], [1], [0, 0, 1, 1], [], []>, precision = #tpu.contract_precision<fp32>} : vector<16x128xf32>, vector<128x128xf32>, vector<16x128xf32> -> vector<16x128xf32>
    %22 = arith.addf %17, %21 : vector<16x128xf32>
    %c0_25 = arith.constant 0 : index
    %c0_26 = arith.constant 0 : index
    %23 = vector.load %arg5[%c0_25, %c0_26] : memref<1x128xf32, #tpu.memory_space<vmem>>, vector<1x128xf32>
    %24 = vector.broadcast %23 : vector<1x128xf32> to vector<16x128xf32>
    %25 = arith.addf %22, %24 : vector<16x128xf32>
    %cst_27 = arith.constant 0.000000e+00 : f32
    %26 = vector.broadcast %cst_27 : f32 to vector<16x128xf32>
    %27 = arith.maximumf %25, %26 : vector<16x128xf32>
    %c0_28 = arith.constant 0 : index
    %c0_29 = arith.constant 0 : index
    %28 = vector.load %arg10[%c0_28, %c0_29] : memref<17x128xf32, #tpu.memory_space<vmem>>, vector<1x128xf32>
    tpu.vector_store %arg10[%c0_28, %c0_29], %0 {strides = array<i32>} : memref<17x128xf32, #tpu.memory_space<vmem>>, vector<1x128xf32>,
    %c1_30 = arith.constant 1 : index
    %c0_31 = arith.constant 0 : index
    %29 = vector.load %arg10[%c1_30, %c0_31] : memref<17x128xf32, #tpu.memory_space<vmem>>, vector<16x128xf32>
    tpu.vector_store %arg10[%c1_30, %c0_31], %27 {strides = array<i32>} : memref<17x128xf32, #tpu.memory_space<vmem>>, vector<16x128xf32>,
    %c0_32 = arith.constant 0 : index
    %c0_33 = arith.constant 0 : index
    %30 = tpu.strided_load %arg10[%c0_32, %c0_33] {strides = array<i32: 2, 1>} : memref<17x128xf32, #tpu.memory_space<vmem>>, vector<8x128xf32>
    %c0_34 = arith.constant 0 : index
    %c0_35 = arith.constant 0 : index
    %c0_36 = arith.constant 0 : index
    %31 = vector.load %arg3[%c0_34, %c0_35, %c0_36] : memref<3x128x128xf32, #tpu.memory_space<vmem>>, vector<1x128x128xf32>
    %32 = vector.shape_cast %31 : vector<1x128x128xf32> to vector<128x128xf32>
    %cst_37 = arith.constant dense<0.000000e+00> : vector<8x128xf32>
    %33 = tpu.matmul %30, %32, %cst_37 {dimension_numbers = #tpu.dot_dimension_numbers<[1], [0], [0], [1], [0, 0, 1, 1], [], []>, precision = #tpu.contract_precision<fp32>} : vector<8x128xf32>, vector<128x128xf32>, vector<8x128xf32> -> vector<8x128xf32>
    %c1_38 = arith.constant 1 : index
    %c0_39 = arith.constant 0 : index
    %34 = tpu.strided_load %arg10[%c1_38, %c0_39] {strides = array<i32: 2, 1>} : memref<17x128xf32, #tpu.memory_space<vmem>>, vector<8x128xf32>
    %c1_40 = arith.constant 1 : index
    %c0_41 = arith.constant 0 : index
    %c0_42 = arith.constant 0 : index
    %35 = vector.load %arg3[%c1_40, %c0_41, %c0_42] : memref<3x128x128xf32, #tpu.memory_space<vmem>>, vector<1x128x128xf32>
    %36 = vector.shape_cast %35 : vector<1x128x128xf32> to vector<128x128xf32>
    %cst_43 = arith.constant dense<0.000000e+00> : vector<8x128xf32>
    %37 = tpu.matmul %34, %36, %cst_43 {dimension_numbers = #tpu.dot_dimension_numbers<[1], [0], [0], [1], [0, 0, 1, 1], [], []>, precision = #tpu.contract_precision<fp32>} : vector<8x128xf32>, vector<128x128xf32>, vector<8x128xf32> -> vector<8x128xf32>
    %38 = arith.addf %33, %37 : vector<8x128xf32>
    %c2_44 = arith.constant 2 : index
    %c0_45 = arith.constant 0 : index
    %39 = tpu.strided_load %arg10[%c2_44, %c0_45] {strides = array<i32: 2, 1>} : memref<17x128xf32, #tpu.memory_space<vmem>>, vector<8x128xf32>
    %c2_46 = arith.constant 2 : index
    %c0_47 = arith.constant 0 : index
    %c0_48 = arith.constant 0 : index
    %40 = vector.load %arg3[%c2_46, %c0_47, %c0_48] : memref<3x128x128xf32, #tpu.memory_space<vmem>>, vector<1x128x128xf32>
    %41 = vector.shape_cast %40 : vector<1x128x128xf32> to vector<128x128xf32>
    %cst_49 = arith.constant dense<0.000000e+00> : vector<8x128xf32>
    %42 = tpu.matmul %39, %41, %cst_49 {dimension_numbers = #tpu.dot_dimension_numbers<[1], [0], [0], [1], [0, 0, 1, 1], [], []>, precision = #tpu.contract_precision<fp32>} : vector<8x128xf32>, vector<128x128xf32>, vector<8x128xf32> -> vector<8x128xf32>
    %43 = arith.addf %38, %42 : vector<8x128xf32>
    %c0_50 = arith.constant 0 : index
    %c0_51 = arith.constant 0 : index
    %44 = vector.load %arg6[%c0_50, %c0_51] : memref<1x128xf32, #tpu.memory_space<vmem>>, vector<1x128xf32>
    %45 = vector.broadcast %44 : vector<1x128xf32> to vector<8x128xf32>
    %46 = arith.addf %43, %45 : vector<8x128xf32>
    %cst_52 = arith.constant 0.000000e+00 : f32
    %47 = vector.broadcast %cst_52 : f32 to vector<8x128xf32>
    %48 = arith.maximumf %46, %47 : vector<8x128xf32>
    %c0_53 = arith.constant 0 : index
    %c0_54 = arith.constant 0 : index
    %49 = vector.load %arg11[%c0_53, %c0_54] : memref<10x128xf32, #tpu.memory_space<vmem>>, vector<1x128xf32>
    tpu.vector_store %arg11[%c0_53, %c0_54], %1 {strides = array<i32>} : memref<10x128xf32, #tpu.memory_space<vmem>>, vector<1x128xf32>,
    %c9 = arith.constant 9 : index
    %c0_55 = arith.constant 0 : index
    %50 = vector.load %arg11[%c9, %c0_55] : memref<10x128xf32, #tpu.memory_space<vmem>>, vector<1x128xf32>
    tpu.vector_store %arg11[%c9, %c0_55], %1 {strides = array<i32>} : memref<10x128xf32, #tpu.memory_space<vmem>>, vector<1x128xf32>,
    %c1_56 = arith.constant 1 : index
    %c0_57 = arith.constant 0 : index
    %51 = vector.load %arg11[%c1_56, %c0_57] : memref<10x128xf32, #tpu.memory_space<vmem>>, vector<8x128xf32>
    tpu.vector_store %arg11[%c1_56, %c0_57], %48 {strides = array<i32>} : memref<10x128xf32, #tpu.memory_space<vmem>>, vector<8x128xf32>,
    %c0_58 = arith.constant 0 : index
    %c0_59 = arith.constant 0 : index
    %52 = vector.load %arg11[%c0_58, %c0_59] : memref<10x128xf32, #tpu.memory_space<vmem>>, vector<8x128xf32>
    %c0_60 = arith.constant 0 : index
    %c0_61 = arith.constant 0 : index
    %c0_62 = arith.constant 0 : index
    %53 = vector.load %arg4[%c0_60, %c0_61, %c0_62] : memref<3x128x64xf32, #tpu.memory_space<vmem>>, vector<1x128x64xf32>
    %54 = vector.shape_cast %53 : vector<1x128x64xf32> to vector<128x64xf32>
    %cst_63 = arith.constant dense<0.000000e+00> : vector<8x64xf32>
    %55 = tpu.matmul %52, %54, %cst_63 {dimension_numbers = #tpu.dot_dimension_numbers<[1], [0], [0], [1], [0, 0, 1, 1], [], []>, precision = #tpu.contract_precision<fp32>} : vector<8x128xf32>, vector<128x64xf32>, vector<8x64xf32> -> vector<8x64xf32>
    %c1_64 = arith.constant 1 : index
    %c0_65 = arith.constant 0 : index
    %56 = vector.load %arg11[%c1_64, %c0_65] : memref<10x128xf32, #tpu.memory_space<vmem>>, vector<8x128xf32>
    %c1_66 = arith.constant 1 : index
    %c0_67 = arith.constant 0 : index
    %c0_68 = arith.constant 0 : index
    %57 = vector.load %arg4[%c1_66, %c0_67, %c0_68] : memref<3x128x64xf32, #tpu.memory_space<vmem>>, vector<1x128x64xf32>
    %58 = vector.shape_cast %57 : vector<1x128x64xf32> to vector<128x64xf32>
    %cst_69 = arith.constant dense<0.000000e+00> : vector<8x64xf32>
    %59 = tpu.matmul %56, %58, %cst_69 {dimension_numbers = #tpu.dot_dimension_numbers<[1], [0], [0], [1], [0, 0, 1, 1], [], []>, precision = #tpu.contract_precision<fp32>} : vector<8x128xf32>, vector<128x64xf32>, vector<8x64xf32> -> vector<8x64xf32>
    %60 = arith.addf %55, %59 : vector<8x64xf32>
    %c2_70 = arith.constant 2 : index
    %c0_71 = arith.constant 0 : index
    %61 = vector.load %arg11[%c2_70, %c0_71] : memref<10x128xf32, #tpu.memory_space<vmem>>, vector<8x128xf32>
    %c2_72 = arith.constant 2 : index
    %c0_73 = arith.constant 0 : index
    %c0_74 = arith.constant 0 : index
    %62 = vector.load %arg4[%c2_72, %c0_73, %c0_74] : memref<3x128x64xf32, #tpu.memory_space<vmem>>, vector<1x128x64xf32>
    %63 = vector.shape_cast %62 : vector<1x128x64xf32> to vector<128x64xf32>
    %cst_75 = arith.constant dense<0.000000e+00> : vector<8x64xf32>
    %64 = tpu.matmul %61, %63, %cst_75 {dimension_numbers = #tpu.dot_dimension_numbers<[1], [0], [0], [1], [0, 0, 1, 1], [], []>, precision = #tpu.contract_precision<fp32>} : vector<8x128xf32>, vector<128x64xf32>, vector<8x64xf32> -> vector<8x64xf32>
    %65 = arith.addf %60, %64 : vector<8x64xf32>
    %c0_76 = arith.constant 0 : index
    %c0_77 = arith.constant 0 : index
    %66 = vector.load %arg7[%c0_76, %c0_77] : memref<1x64xf32, #tpu.memory_space<vmem>>, vector<1x64xf32>
    %67 = vector.broadcast %66 : vector<1x64xf32> to vector<8x64xf32>
    %68 = arith.addf %65, %67 : vector<8x64xf32>
    %c0_78 = arith.constant 0 : index
    %c0_79 = arith.constant 0 : index
    %c0_80 = arith.constant 0 : index
    %69 = vector.load %arg8[%c0_78, %c0_79, %c0_80] : memref<1x8x64xf32, #tpu.memory_space<vmem>>, vector<1x8x64xf32>
    %70 = vector.shape_cast %69 : vector<1x8x64xf32> to vector<8x64xf32>
    %71 = vector.shape_cast %68 : vector<8x64xf32> to vector<1x8x64xf32>
    tpu.vector_store %arg8[%c0_78, %c0_79, %c0_80], %71 {strides = array<i32>} : memref<1x8x64xf32, #tpu.memory_space<vmem>>, vector<1x8x64xf32>,
    return
  }
  func.func @transform_0(%arg0: i32) -> (i32, i32, i32) {
    %c0_i32 = arith.constant 0 : i32
    %c0_i32_0 = arith.constant 0 : i32
    %c0_i32_1 = arith.constant 0 : i32
    return %arg0, %c0_i32, %c0_i32_0 : i32, i32, i32
  }
  func.func @transform_1(%arg0: i32) -> (i32, i32, i32) {
    %c0_i32 = arith.constant 0 : i32
    %c0_i32_0 = arith.constant 0 : i32
    %c0_i32_1 = arith.constant 0 : i32
    %c0_i32_2 = arith.constant 0 : i32
    return %c0_i32, %c0_i32_0, %c0_i32_1 : i32, i32, i32
  }
  func.func @transform_2(%arg0: i32) -> (i32, i32, i32) {
    %c0_i32 = arith.constant 0 : i32
    %c0_i32_0 = arith.constant 0 : i32
    %c0_i32_1 = arith.constant 0 : i32
    %c0_i32_2 = arith.constant 0 : i32
    return %c0_i32, %c0_i32_0, %c0_i32_1 : i32, i32, i32
  }
  func.func @transform_3(%arg0: i32) -> (i32, i32, i32) {
    %c0_i32 = arith.constant 0 : i32
    %c0_i32_0 = arith.constant 0 : i32
    %c0_i32_1 = arith.constant 0 : i32
    %c0_i32_2 = arith.constant 0 : i32
    return %c0_i32, %c0_i32_0, %c0_i32_1 : i32, i32, i32
  }
  func.func @transform_4(%arg0: i32) -> (i32, i32) {
    %c0_i32 = arith.constant 0 : i32
    %c0_i32_0 = arith.constant 0 : i32
    %c0_i32_1 = arith.constant 0 : i32
    return %c0_i32, %c0_i32_0 : i32, i32
  }
  func.func @transform_5(%arg0: i32) -> (i32, i32) {
    %c0_i32 = arith.constant 0 : i32
    %c0_i32_0 = arith.constant 0 : i32
    %c0_i32_1 = arith.constant 0 : i32
    return %c0_i32, %c0_i32_0 : i32, i32
  }
  func.func @transform_6(%arg0: i32) -> (i32, i32) {
    %c0_i32 = arith.constant 0 : i32
    %c0_i32_0 = arith.constant 0 : i32
    %c0_i32_1 = arith.constant 0 : i32
    return %c0_i32, %c0_i32_0 : i32, i32
  }
  func.func @transform_7(%arg0: i32) -> (i32, i32, i32) {
    %c0_i32 = arith.constant 0 : i32
    %c0_i32_0 = arith.constant 0 : i32
    %c0_i32_1 = arith.constant 0 : i32
    return %arg0, %c0_i32, %c0_i32_0 : i32, i32, i32
  }
}

</mosaic_0001>

<bundles_post_ra>
// kernel: tpu_custom_call.1
= control target key start
LH: loop header
LB: loop body
LE: loop exit
PB: predicated region body
PF: predicated region fallthrough
CT: control target
= control target key end

     0   :  { %12 = vsyncpa [#allocation6], 0  ;;  %s13635_s0 = inlined_call_operand.vmem [shape: f32[1,16,128], index: 0, kind: input, shape index: {}]   ;;  %s13636_s1 = inlined_call_operand.vmem [shape: f32[3,128,128], index: 1, kind: input, shape index: {}]   ;;  %s13637_s2 = inlined_call_operand.hbm [shape: f32[3,128,128], index: 2, kind: input, shape index: {}]   ;;  %s13638_s3 = inlined_call_operand.vmem [shape: f32[3,128,64], index: 3, kind: input, shape index: {}]   ;;  %s13639_s4 = inlined_call_operand.vmem [shape: f32[1,128], index: 4, kind: input, shape index: {}]   ;;  %s13640_s5 = inlined_call_operand.vmem [shape: f32[1,128], index: 5, kind: input, shape index: {}]   ;;  %s13641_s6 = inlined_call_operand.vmem [shape: f32[1,64], index: 6, kind: input, shape index: {}]   ;;  %s13642_s7 = inlined_call_operand.hbm [shape: f32[1,8,64], index: 7, kind: output, shape index: {}]  }
   0x1   :  { %13 = vsyncpa [#allocation7], 0  ;;  %s10588_s24 = smov [#allocation5]   ;;  %s10540_s28 = scalar_lea.hbm %s13637_s2, 6144 }
   0x2   :  { %s23_s25 = sshll.u32 %s10588_s24, 4  ;;  %p10541_p0 = scmp.ne.s32.totalorder %s13637_s2, %s10540_s28  ;;  %s24_s25 = int_to_ptr.vmem [resolvable:$true] %s23_s25 }
   0x3   :  { %p10544_p1 = scmp.lt.u32.totalorder %s10540_s28, %s13637_s2 }
   0x5   :  { %p10546_p2 = pnand %p10544_p1, %p10541_p0 }
   0x7   :  { %10549 = shalt.err (!%p10546_p2)
}
   0x8   :  { %s10550_s10 = scalar_lea.vmem %s24_s25, 6144  ;;  %p10555_p4 = scmp.lt.s32.totalorder %s24_s25, %s24_s25 }
   0x9   :  { %p10551_p3 = scmp.ne.s32.totalorder %s24_s25, %s10550_s10  ;;  %p10556_p5 = scmp.lt.s32.totalorder %s10550_s10, %s10550_s10 }
   0xb   :  { %p10557_p6 = por %p10556_p5, %p10555_p4 }
   0xd   :  { %p10558_p7 = pnand %p10557_p6, %p10551_p3 }
   0xf   :  { %10561 = shalt.err (!%p10558_p7)
}
  0x10   :  { %s10589_s11 = smov 128   ;;  %s10590_s12 = smov 8  }
  0x11   :  { %29 = dma.hbm_to_vmem [thread:$0]  %s13637_s2, 6144, %s24_s25, [#allocation6], %s10589_s11, %s10589_s11, %s10590_s12  }
  0x12   :  { %10584 = dma.done.wait [#allocation6], 6144  }
  0x13   :  { %10585 = vsyncadd [#allocation6], 4294961152  ;;  %v6166_v0 = vld [vmem:[%s13636_s1 + $0x80] sm:$0xff]  ;;  %v6167_v1 = vld [vmem:[%s13636_s1 + $0x88] sm:$0xff]  ;;  %vm10593_vm0 = vmmov 0   ;;  %s10594_s29 = smov [#allocation8]  }
  0x14   :  { %v6168_v2 = vld [vmem:[%s13636_s1 + $0x90] sm:$0xff]  ;;  %v87_v3 = vand.u32 4294901760, %v6166_v0  ;;  %v90_v4 = vand.u32 4294901760, %v6167_v1  ;;  %v6169_v5 = vld [vmem:[%s13636_s1 + $0x98] sm:$0xff]  ;;  %v6170_v7 = vld [vmem:[%s13636_s1 + $0xa0] sm:$0xff]  ;;  %s6157_s30 = sshll.u32 %s10594_s29, 4  ;;  %s6158_s30 = int_to_ptr.vmem [resolvable:$true] %s6157_s30 }
  0x15   :  { %v93_v6 = vand.u32 4294901760, %v6168_v2  ;;  %v6171_v8 = vld [vmem:[%s13636_s1 + $0xa8] sm:$0xff]  ;;  %v96_v9 = vand.u32 4294901760, %v6169_v5  ;;  %v99_v11 = vand.u32 4294901760, %v6170_v7  ;;  %v10672_v14 = vld [vmem:[%s13636_s1 + $0xb0] sm:$0xff]  ;;  %v10677_v15 = vld [vmem:[%s13636_s1 + $0xb8] sm:$0xff]  ;;  %p10567_p9 = scmp.lt.s32.totalorder %s6158_s30, %s6158_s30 }
  0x16   :  { %v10665_v10 = vpack.c.bf16 %v90_v4, %v87_v3  ;;  %v102_v12 = vand.u32 4294901760, %v6171_v8  ;;  %v43_v16 = vld [vmem:[%s13635_s0] sm:$0xff]  ;;  %v44_v17 = vld [vmem:[%s13635_s0 + $0x8] sm:$0xff]  ;;  %v105_v20 = vand.u32 4294901760, %v10672_v14  ;;  %v108_v21 = vand.u32 4294901760, %v10677_v15  ;;  %v6176_v31 = vld [vmem:[%s13636_s1 + $0xd0] sm:$0xff] }
  0x17   :  { %v10667_v13 = vpack.c.bf16 %v96_v9, %v93_v6  ;;  %v45_v18 = vmax.f32 %v43_v16, 0.0  ;;  %v6174_v22 = vld [vmem:[%s13636_s1 + $0xc0] sm:$0xff]  ;;  %v6175_v23 = vld [vmem:[%s13636_s1 + $0xc8] sm:$0xff]  ;;  %v46_v25 = vmax.f32 %v44_v17, 0.0  ;;  %v10704_v27 = vsub.f32 %v6166_v0, %v87_v3  ;;  %v6177_v33 = vld [vmem:[%s13636_s1 + $0xd8] sm:$0xff]  ;;  %s10562_s8 = scalar_lea.vmem %s6158_s30, 128 }
  0x18   :  { %9060 = vmatprep.subr.bf16.mxu0 %v10665_v10  ;;  %v10688_v19 = vpack.c.bf16 %v102_v12, %v99_v11  ;;  %v10707_v28 = vpack.c.bf16 %v108_v21, %v105_v20  ;;  %v111_v29 = vand.u32 4294901760, %v6174_v22  ;;  %v114_v30 = vand.u32 4294901760, %v6175_v23  ;;  %v6178_v35 = vld [vmem:[%s13636_s1 + $0xe0] sm:$0xff]  ;;  %v6179_v37 = vld [vmem:[%s13636_s1 + $0xe8] sm:$0xff]  ;;  %v6180_v38 = vld [vmem:[%s13636_s1 + $0xf0] sm:$0xff]  ;;  %p10563_p8 = scmp.ne.s32.totalorder %s6158_s30, %s10562_s8  ;;  %p10568_p10 = scmp.lt.s32.totalorder %s10562_s8, %s10562_s8 }
  0x19   :  { %9062 = vmatpush3.bf16.msra.mxu0 %v10665_v10  ;;  %47 = vst [vmem:[#allocation2 + $0x1] sm:$0xff] %v45_v18  ;;  %v10698_v24 = vand.u32 4294901760, %v45_v18  ;;  %48 = vst [vmem:[#allocation2 + $0x9] sm:$0xff] %v46_v25  ;;  %v10712_v32 = vsub.f32 %v6167_v1, %v90_v4  ;;  %v117_v36 = vand.u32 4294901760, %v6176_v31  ;;  %v6181_v39 = vld [vmem:[%s13636_s1 + $0xf8] sm:$0xff]  ;;  %v190_v41 = vand.u32 4294901760, %v10704_v27 }
  0x1a   :  { %9064 = vmatprep.subr.bf16.mxu0 %v10667_v13  ;;  %v10735_v42 = vsub.f32 %v6168_v2, %v93_v6  ;;  %v10738_v43 = vpack.c.bf16 %v114_v30, %v111_v29  ;;  %v120_v44 = vand.u32 4294901760, %v6177_v33  ;;  %v10741_v46 = vand.u32 4294901760, %v46_v25  ;;  %p10569_p11 = por %p10568_p10, %p10567_p9 }
  0x1b   :  { %v10702_v26 = vsub.f32 %v45_v18, %v10698_v24  ;;  %v197_v45 = vand.u32 4294901760, %v10712_v32  ;;  %v123_v47 = vand.u32 4294901760, %v6178_v35  ;;  %v126_v49 = vand.u32 4294901760, %v6179_v37 }
  0x1c   :  { %v129_v50 = vand.u32 4294901760, %v6180_v38  ;;  %v132_v51 = vand.u32 4294901760, %v6181_v39  ;;  %v10743_v52 = vsub.f32 %v6169_v5, %v96_v9  ;;  %v191_v53 = vsub.f32 %v10704_v27, %v190_v41  ;;  %p10570_p12 = pnand %p10569_p11, %p10563_p8 }
  0x1d   :  { %9066 = vmatpush3.bf16.msra.mxu0 %v10667_v13  ;;  %v169_v34 = vand.u32 4294901760, %v10702_v26  ;;  %v204_v54 = vand.u32 4294901760, %v10735_v42  ;;  %v10750_v55 = vsub.f32 %v6170_v7, %v99_v11  ;;  %v10752_v56 = vsub.f32 %v6171_v8, %v102_v12 }
  0x1e   :  { %9068 = vmatprep.subr.bf16.mxu0 %v10688_v19  ;;  %v10755_v57 = vpack.c.bf16 %v120_v44, %v117_v36  ;;  %v198_v58 = vsub.f32 %v10712_v32, %v197_v45  ;;  %v10759_v59 = vsub.f32 %v46_v25, %v10741_v46  ;;  %v10761_v60 = vpack.c.bf16 %v126_v49, %v123_v47 }
  0x1f   :  { %v170_v40 = vsub.f32 %v10702_v26, %v169_v34  ;;  %v10763_v61 = vpack.c.bf16 %v132_v51, %v129_v50  ;;  %v211_v62 = vand.u32 4294901760, %v10743_v52  ;;  %v192_v63 = vand.u32 4294901760, %v191_v53 }
  0x20   :  { %v205_v0 = vsub.f32 %v10735_v42, %v204_v54  ;;  %v218_v1 = vand.u32 4294901760, %v10750_v55  ;;  %v225_v2 = vand.u32 4294901760, %v10752_v56  ;;  %v199_v3 = vand.u32 4294901760, %v198_v58 }
  0x21   :  { %9070 = vmatpush3.bf16.msra.mxu0 %v10688_v19  ;;  %v171_v48 = vand.u32 4294901760, %v170_v40  ;;  %v179_v4 = vand.u32 4294901760, %v10759_v59  ;;  %v10773_v5 = vsub.f32 %v10672_v14, %v105_v20  ;;  %v10776_v6 = vsub.f32 %v10677_v15, %v108_v21 }
  0x22   :  { %9072 = vmatprep.subr.bf16.mxu0 %v10707_v28  ;;  %v10778_v7 = vsub.f32 %v6174_v22, %v111_v29  ;;  %v10780_v8 = vsub.f32 %v6175_v23, %v114_v30  ;;  %v10782_v9 = vsub.f32 %v6176_v31, %v117_v36  ;;  %v10784_v11 = vsub.f32 %v6177_v33, %v120_v44 }
  0x23   :  { %7201 = vmatprep.mubr.f32.mxu0 %v171_v48  ;;  %v10786_v12 = vsub.f32 %v6178_v35, %v123_v47  ;;  %v10788_v16 = vsub.f32 %v6179_v37, %v126_v49  ;;  %v10790_v17 = vsub.f32 %v6180_v38, %v129_v50  ;;  %v10792_v18 = vsub.f32 %v6181_v39, %v132_v51 }
  0x24   :  { %v206_v14 = vand.u32 4294901760, %v205_v0  ;;  %v212_v15 = vsub.f32 %v10743_v52, %v211_v62  ;;  %v219_v20 = vsub.f32 %v10750_v55, %v218_v1  ;;  %v226_v21 = vsub.f32 %v10752_v56, %v225_v2 }
  0x25   :  { %9074 = vmatpush3.bf16.msra.mxu0 %v10707_v28  ;;  %v9091_v22 = vpack.c.bf16 %v199_v3, %v192_v63  ;;  %v180_v23 = vsub.f32 %v10759_v59, %v179_v4  ;;  %v232_v25 = vand.u32 4294901760, %v10773_v5  ;;  %v239_v29 = vand.u32 4294901760, %v10776_v6 }
  0x26   :  { %9076 = vmatprep.subr.bf16.mxu0 %v10738_v43  ;;  %v246_v30 = vand.u32 4294901760, %v10778_v7  ;;  %v253_v31 = vand.u32 4294901760, %v10780_v8  ;;  %v260_v33 = vand.u32 4294901760, %v10782_v9  ;;  %v267_v35 = vand.u32 4294901760, %v10784_v11 }
  0x27   :  { %v274_v36 = vand.u32 4294901760, %v10786_v12  ;;  %v281_v37 = vand.u32 4294901760, %v10788_v16  ;;  %v288_v38 = vand.u32 4294901760, %v10790_v17  ;;  %v295_v39 = vand.u32 4294901760, %v10792_v18 }
  0x28   :  { %v10815_v40 = vpack.c.bf16 %v197_v45, %v190_v41  ;;  %v10817_v44 = vpack.c.bf16 %v211_v62, %v204_v54  ;;  %v10819_v47 = vpack.c.bf16 %v225_v2, %v218_v1  ;;  %v10821_v48 = vpack.c.bf16 %v239_v29, %v232_v25 }
  0x29   :  { %9078 = vmatpush3.bf16.msra.mxu0 %v10738_v43  ;;  %v213_v49 = vand.u32 4294901760, %v212_v15  ;;  %v10824_v50 = vpack.c.bf16 %v253_v31, %v246_v30  ;;  %v10826_v51 = vpack.c.bf16 %v267_v35, %v260_v33  ;;  %v10828_v53 = vpack.c.bf16 %v281_v37, %v274_v36 }
  0x2a   :  { %9080 = vmatprep.subr.bf16.mxu0 %v10755_v57  ;;  %v10830_v58 = vpack.c.bf16 %v295_v39, %v288_v38  ;;  %v181_v63 = vand.u32 4294901760, %v180_v23  ;;  %v220_v41 = vand.u32 4294901760, %v219_v20  ;;  %v227_v45 = vand.u32 4294901760, %v226_v21 }
  0x2b   :  { %v9095_v54 = vpack.c.bf16 %v213_v49, %v206_v14  ;;  %v233_v62 = vsub.f32 %v10773_v5, %v232_v25  ;;  %v240_v0 = vsub.f32 %v10776_v6, %v239_v29  ;;  %v247_v15 = vsub.f32 %v10778_v7, %v246_v30 }
  0x2c   :  { %v9099_v1 = vpack.c.bf16 %v227_v45, %v220_v41  ;;  %v254_v23 = vsub.f32 %v10780_v8, %v253_v31  ;;  %v261_v20 = vsub.f32 %v10782_v9, %v260_v33  ;;  %v268_v29 = vsub.f32 %v10784_v11, %v267_v35 }
  0x2d   :  { %9082 = vmatpush3.bf16.msra.mxu0 %v10755_v57  ;;  %v234_v2 = vand.u32 4294901760, %v233_v62  ;;  %v241_v3 = vand.u32 4294901760, %v240_v0  ;;  %v248_v21 = vand.u32 4294901760, %v247_v15  ;;  %v282_v30 = vsub.f32 %v10788_v16, %v281_v37 }
  0x2e   :  { %9084 = vmatprep.subr.bf16.mxu0 %v10761_v60  ;;  %v255_v25 = vand.u32 4294901760, %v254_v23  ;;  %v269_v41 = vand.u32 4294901760, %v268_v29  ;;  %v296_v62 = vsub.f32 %v10792_v18, %v295_v39  ;;  %v9123_v37 = vpack.c.bf16 %v10712_v32, %v10704_v27 }
  0x2f   :  { %v9103_v14 = vpack.c.bf16 %v241_v3, %v234_v2  ;;  %v283_v33 = vand.u32 4294901760, %v282_v30  ;;  %v9131_v39 = vpack.c.bf16 %v10752_v56, %v10750_v55  ;;  %v9135_v2 = vpack.c.bf16 %v10776_v6, %v10773_v5  ;;  %v53_v56 = vld [vmem:[%s13636_s1 + $0x10] sm:$0xff]  ;;  %v10995_v3 = vld [vmem:[%s13636_s1 + $0x68] sm:$0xff] }
  0x30   :  { %v9107_v49 = vpack.c.bf16 %v255_v25, %v248_v21  ;;  %v9139_v27 = vpack.c.bf16 %v10780_v8, %v10778_v7  ;;  %v9143_v32 = vpack.c.bf16 %v10784_v11, %v10782_v9  ;;  %v9151_v55 = vpack.c.bf16 %v10792_v18, %v10790_v17  ;;  %v55_v7 = vld [vmem:[%s13636_s1 + $0x20] sm:$0xff]  ;;  %v56_v8 = vld [vmem:[%s13636_s1 + $0x28] sm:$0xff] }
  0x31   :  { %9086 = vmatpush3.bf16.msra.mxu0 %v10761_v60  ;;  %v777_v5 = vand.u32 4294901760, %v53_v56  ;;  %v783_v11 = vand.u32 4294901760, %v55_v7  ;;  %vm6149_vm1 = vcmask 523264  }
  0x32   :  { %9088 = vmatprep.subr.bf16.mxu0 %v10763_v61 }
  0x35   :  { %9090 = vmatpush3.bf16.msra.mxu0 %v10763_v61 }
  0x36   :  { %9092 = vmatprep.subr.bf16.mxu0 %v9091_v22 }
  0x38   :  { %7202 = vmatmul.mubr.f32.vlgmr.msra.gmra.mrb[0].mxu0 %v181_v63  ;;  %v262_v63 = vand.u32 4294901760, %v261_v20  ;;  %v50_v20 = vld [vmem:[#allocation2 + $0x8] sm:$0xff] }
  0x39   :  { %9094 = vmatpush3.bf16.msra.mxu0 %v9091_v22  ;;  %7236 = vmatprep.mubr.f32.mxu0 %v10698_v24  ;;  %v275_v22 = vsub.f32 %v10786_v12, %v274_v36  ;;  %v297_v36 = vand.u32 4294901760, %v296_v62 }
  0x3a   :  { %9096 = vmatprep.subr.bf16.mxu0 %v9095_v54  ;;  %v9111_v45 = vpack.c.bf16 %v269_v41, %v262_v63 }
  0x3b   :  { %v276_v31 = vand.u32 4294901760, %v275_v22  ;;  %v810_v22 = vand.u32 4294901760, %v10995_v3 }
  0x3d   :  { %9098 = vmatpush3.bf16.msra.mxu0 %v9095_v54  ;;  %v289_v54 = vsub.f32 %v10790_v17, %v288_v38  ;;  %v9115_v35 = vpack.c.bf16 %v283_v33, %v276_v31  ;;  %v9127_v38 = vpack.c.bf16 %v10743_v52, %v10735_v42  ;;  %v13643_v42 = vmov 0.0   ;;  %v58_v17 = vld [vmem:[%s13636_s1 + $0x38] sm:$0xff]  ;;  %v11019_v31 = vld [vmem:[%s13636_s1 + $0x70] sm:$0xff] }
  0x3e   :  { %9100 = vmatprep.subr.bf16.mxu0 %v9099_v1  ;;  %41 = vst [vmem:[#allocation2] sm:$0x1] %v13643_v42  ;;  %42 = vst [vmem:[#allocation2 + $0x11] sm:$0x1] %v13643_v42  ;;  %v9147_v52 = vpack.c.bf16 %v10788_v16, %v10786_v12  ;;  %v786_v12 = vand.u32 4294901760, %v56_v8  ;;  %v57_v16 = vld [vmem:[%s13636_s1 + $0x30] sm:$0xff]  ;;  %v11026_v33 = vsub.f32 %v53_v56, %v777_v5 }
  0x3f   :  { %v290_v0 = vand.u32 4294901760, %v289_v54  ;;  %2170 = vst [vmem:[#allocation3] sm:$0x1] %v13643_v42  ;;  %4161 = vst [vmem:[#allocation4] sm:$0x1] %v13643_v42  ;;  %v789_v18 = vand.u32 4294901760, %v57_v16 }
  0x40   :  { %4162 = vst [vmem:[#allocation4 + $0x9] sm:$0x1] %v13643_v42 }
  0x41   :  { %9102 = vmatpush3.bf16.msra.mxu0 %v9099_v1  ;;  %v9119_v1 = vpack.c.bf16 %v297_v36, %v290_v0  ;;  %v813_v0 = vand.u32 4294901760, %v11019_v31 }
  0x42   :  { %9104 = vmatprep.subr.bf16.mxu0 %v9103_v14 }
  0x45   :  { %9106 = vmatpush3.bf16.msra.mxu0 %v9103_v14 }
  0x46   :  { %9108 = vmatprep.subr.bf16.mxu0 %v9107_v49 }
  0x49   :  { %9110 = vmatpush3.bf16.msra.mxu0 %v9107_v49  ;;  %v11008_v49 = vand.u32 4294901760, %v50_v20 }
  0x4a   :  { %9112 = vmatprep.subr.bf16.mxu0 %v9111_v45 }
  0x4d   :  { %9114 = vmatpush3.bf16.msra.mxu0 %v9111_v45  ;;  %v11024_v45 = vld [vmem:[%s13636_s1 + $0x78] sm:$0xff] }
  0x4e   :  { %9116 = vmatprep.subr.bf16.mxu0 %v9115_v35  ;;  %v816_v36 = vand.u32 4294901760, %v11024_v45 }
  0x51   :  { %9118 = vmatpush3.bf16.msra.mxu0 %v9115_v35  ;;  %v11037_v35 = vsub.f32 %v50_v20, %v11008_v49 }
  0x52   :  { %9120 = vmatprep.subr.bf16.mxu0 %v9119_v1 }
  0x55   :  { %9122 = vmatpush3.bf16.msra.mxu0 %v9119_v1 }
  0x56   :  { %9124 = vmatprep.subr.bf16.mxu0 %v9123_v37 }
  0x58   :  { %7237 = vmatmul.mubr.f32.vlgmr.msra.gmra.mrb[0].mxu0 %v10741_v46 }
  0x59   :  { %9126 = vmatpush3.bf16.msra.mxu0 %v9123_v37  ;;  %7271 = vmatprep.mubr.f32.mxu0 %v10702_v26  ;;  %v49_v26 = vld [vmem:[#allocation2] sm:$0xff] }
  0x5a   :  { %9128 = vmatprep.subr.bf16.mxu0 %v9127_v38 }
  0x5d   :  { %9130 = vmatpush3.bf16.msra.mxu0 %v9127_v38  ;;  %v888_v38 = vand.u32 4294901760, %v11026_v33 }
  0x5e   :  { %9132 = vmatprep.subr.bf16.mxu0 %v9131_v39 }
  0x61   :  { %9134 = vmatpush3.bf16.msra.mxu0 %v9131_v39 }
  0x62   :  { %9136 = vmatprep.subr.bf16.mxu0 %v9135_v2 }
  0x65   :  { %9138 = vmatpush3.bf16.msra.mxu0 %v9135_v2  ;;  %v11051_v2 = vsub.f32 %v55_v7, %v783_v11 }
  0x66   :  { %9140 = vmatprep.subr.bf16.mxu0 %v9139_v27 }
  0x67   :  { %v902_v56 = vand.u32 4294901760, %v11051_v2 }
  0x69   :  { %9142 = vmatpush3.bf16.msra.mxu0 %v9139_v27  ;;  %v11053_v27 = vsub.f32 %v56_v8, %v786_v12 }
  0x6a   :  { %9144 = vmatprep.subr.bf16.mxu0 %v9143_v32 }
  0x6d   :  { %9146 = vmatpush3.bf16.msra.mxu0 %v9143_v32  ;;  %v863_v32 = vand.u32 4294901760, %v11037_v35 }
  0x6e   :  { %9148 = vmatprep.subr.bf16.mxu0 %v9147_v52 }
  0x71   :  { %9150 = vmatpush3.bf16.msra.mxu0 %v9147_v52  ;;  %v11056_v52 = vsub.f32 %v57_v16, %v789_v18  ;;  %v903_v16 = vsub.f32 %v11051_v2, %v902_v56 }
  0x72   :  { %9152 = vmatprep.subr.bf16.mxu0 %v9151_v55 }
  0x75   :  { %9154 = vmatpush3.bf16.msra.mxu0 %v9151_v55 }
  0x76   :  { %9156 = vmatprep.subr.bf16.mxu0 %v10665_v10 }
  0x78   :  { %7272 = vmatmul.mubr.f32.vlgmr.msra.gmra.mrb[0].mxu0 %v10759_v59  ;;  %v54_v59 = vld [vmem:[%s13636_s1 + $0x18] sm:$0xff] }
  0x79   :  { %9158 = vmatpush3.bf16.msra.mxu0 %v10665_v10  ;;  %7306 = vmatprep.mubr.f32.mxu0 %v169_v34  ;;  %v10915_v34 = vand.u32 4294901760, %v49_v26  ;;  %v780_v6 = vand.u32 4294901760, %v54_v59 }
  0x7a   :  { %9160 = vmatprep.subr.bf16.mxu0 %v10667_v13 }
  0x7b   :  { %v10953_v9 = vpack.c.bf16 %v780_v6, %v777_v5  ;;  %v11028_v54 = vsub.f32 %v54_v59, %v780_v6  ;;  %v909_v59 = vand.u32 4294901760, %v11053_v27  ;;  %v916_v5 = vand.u32 4294901760, %v11056_v52 }
  0x7d   :  { %9162 = vmatpush3.bf16.msra.mxu0 %v10667_v13  ;;  %v895_v39 = vand.u32 4294901760, %v11028_v54 }
  0x7e   :  { %9164 = vmatprep.subr.bf16.mxu0 %v10688_v19 }
  0x81   :  { %9166 = vmatpush3.bf16.msra.mxu0 %v10688_v19 }
  0x82   :  { %9168 = vmatprep.subr.bf16.mxu0 %v10707_v28 }
  0x85   :  { %9170 = vmatpush3.bf16.msra.mxu0 %v10707_v28 }
  0x86   :  { %9172 = vmatprep.subr.bf16.mxu0 %v10738_v43 }
  0x89   :  { %9174 = vmatpush3.bf16.msra.mxu0 %v10738_v43 }
  0x8a   :  { %9176 = vmatprep.subr.bf16.mxu0 %v10755_v57 }
  0x8d   :  { %9178 = vmatpush3.bf16.msra.mxu0 %v10755_v57 }
  0x8e   :  { %9180 = vmatprep.subr.bf16.mxu0 %v10761_v60 }
  0x91   :  { %9182 = vmatpush3.bf16.msra.mxu0 %v10761_v60 }
  0x92   :  { %9184 = vmatprep.subr.bf16.mxu0 %v10763_v61 }
  0x95   :  { %9186 = vmatpush3.bf16.msra.mxu0 %v10763_v61 }
  0x96   :  { %9188 = vmatprep.subr.bf16.mxu0 %v10815_v40 }
  0x98   :  { %7307 = vmatmul.mubr.f32.vlgmr.msra.gmra.mrb[0].mxu0 %v179_v4 }
  0x99   :  { %9190 = vmatpush3.bf16.msra.mxu0 %v10815_v40  ;;  %7341 = vmatprep.mubr.f32.mxu0 %v10698_v24  ;;  %v792_v40 = vand.u32 4294901760, %v58_v17 }
  0x9a   :  { %9192 = vmatprep.subr.bf16.mxu0 %v10817_v44 }
  0x9b   :  { %v11058_v55 = vsub.f32 %v58_v17, %v792_v40  ;;  %v910_v17 = vsub.f32 %v11053_v27, %v909_v59 }
  0x9d   :  { %9194 = vmatpush3.bf16.msra.mxu0 %v10817_v44  ;;  %v59_v44 = vld [vmem:[%s13636_s1 + $0x40] sm:$0xff]  ;;  %v923_v6 = vand.u32 4294901760, %v11058_v55 }
  0x9e   :  { %9196 = vmatprep.subr.bf16.mxu0 %v10819_v47 }
  0xa1   :  { %9198 = vmatpush3.bf16.msra.mxu0 %v10819_v47  ;;  %v60_v47 = vld [vmem:[%s13636_s1 + $0x48] sm:$0xff] }
  0xa2   :  { %9200 = vmatprep.subr.bf16.mxu0 %v10821_v48 }
  0xa5   :  { %9202 = vmatpush3.bf16.msra.mxu0 %v10821_v48  ;;  %v795_v48 = vand.u32 4294901760, %v59_v44 }
  0xa6   :  { %9204 = vmatprep.subr.bf16.mxu0 %v10824_v50 }
  0xa7   :  { %v11082_v8 = vsub.f32 %v59_v44, %v795_v48  ;;  %v924_v44 = vsub.f32 %v11058_v55, %v923_v6 }
  0xa9   :  { %9206 = vmatpush3.bf16.msra.mxu0 %v10824_v50  ;;  %v798_v50 = vand.u32 4294901760, %v60_v47 }
  0xaa   :  { %9208 = vmatprep.subr.bf16.mxu0 %v10826_v51 }
  0xab   :  { %v11002_v14 = vpack.c.bf16 %v798_v50, %v795_v48 }
  0xad   :  { %9210 = vmatpush3.bf16.msra.mxu0 %v10826_v51  ;;  %v10979_v51 = vld [vmem:[%s13636_s1 + $0x50] sm:$0xff] }
  0xae   :  { %9212 = vmatprep.subr.bf16.mxu0 %v10828_v53  ;;  %v801_v21 = vand.u32 4294901760, %v10979_v51 }
  0xb1   :  { %9214 = vmatpush3.bf16.msra.mxu0 %v10828_v53  ;;  %v10984_v53 = vld [vmem:[%s13636_s1 + $0x58] sm:$0xff] }
  0xb2   :  { %9216 = vmatprep.subr.bf16.mxu0 %v10830_v58  ;;  %v804_v25 = vand.u32 4294901760, %v10984_v53 }
  0xb4   :  { %v11014_v30 = vpack.c.bf16 %v804_v25, %v801_v21  ;;  %v11106_v20 = vsub.f32 %v10984_v53, %v804_v25 }
  0xb5   :  { %9218 = vmatpush3.bf16.msra.mxu0 %v10830_v58  ;;  %v10990_v58 = vld [vmem:[%s13636_s1 + $0x60] sm:$0xff] }
  0xb6   :  { %9220 = vmatprep.subr.bf16.mxu0 %v10665_v10  ;;  %v807_v29 = vand.u32 4294901760, %v10990_v58  ;;  %v951_v53 = vand.u32 4294901760, %v11106_v20 }
  0xb8   :  { %7342 = vmatmul.mubr.f32.vlgmr.msra.gmra.mrb[0].mxu0 %v10741_v46  ;;  %v11034_v62 = vpack.c.bf16 %v810_v22, %v807_v29 }
  0xb9   :  { %9222 = vmatpush3.bf16.msra.mxu0 %v10665_v10  ;;  %7376 = vmatprep.mubr.f32.mxu0 %v10698_v24  ;;  %v10920_v10 = vsub.f32 %v49_v26, %v10915_v34  ;;  %v11065_v26 = vpack.c.bf16 %v816_v36, %v813_v0 }
  0xba   :  { %9224 = vmatprep.subr.bf16.mxu0 %v10667_v13 }
  0xbb   :  { %v853_v24 = vand.u32 4294901760, %v10920_v10 }
  0xbd   :  { %9226 = vmatpush3.bf16.msra.mxu0 %v10667_v13  ;;  %v51_v13 = vld [vmem:[%s13636_s1] sm:$0xff] }
  0xbe   :  { %9228 = vmatprep.subr.bf16.mxu0 %v10688_v19 }
  0xc1   :  { %9230 = vmatpush3.bf16.msra.mxu0 %v10688_v19  ;;  %v52_v19 = vld [vmem:[%s13636_s1 + $0x8] sm:$0xff] }
  0xc2   :  { %9232 = vmatprep.subr.bf16.mxu0 %v10707_v28 }
  0xc5   :  { %9234 = vmatpush3.bf16.msra.mxu0 %v10707_v28  ;;  %v771_v28 = vand.u32 4294901760, %v51_v13 }
  0xc6   :  { %9236 = vmatprep.subr.bf16.mxu0 %v10738_v43 }
  0xc7   :  { %v10997_v15 = vsub.f32 %v51_v13, %v771_v28 }
  0xc9   :  { %9238 = vmatpush3.bf16.msra.mxu0 %v10738_v43  ;;  %v774_v43 = vand.u32 4294901760, %v52_v19  ;;  %v874_v63 = vand.u32 4294901760, %v10997_v15 }
  0xca   :  { %9240 = vmatprep.subr.bf16.mxu0 %v10755_v57 }
  0xcb   :  { %v10943_v4 = vpack.c.bf16 %v774_v43, %v771_v28  ;;  %v10999_v23 = vsub.f32 %v52_v19, %v774_v43  ;;  %v875_v1 = vsub.f32 %v10997_v15, %v874_v63  ;;  %v889_v28 = vsub.f32 %v11026_v33, %v888_v38 }
  0xcc   :  { %v896_v43 = vsub.f32 %v11028_v54, %v895_v39 }
  0xcd   :  { %9242 = vmatpush3.bf16.msra.mxu0 %v10755_v57  ;;  %v854_v57 = vsub.f32 %v10920_v10, %v853_v24  ;;  %v881_v41 = vand.u32 4294901760, %v10999_v23  ;;  %v876_v13 = vand.u32 4294901760, %v875_v1 }
  0xce   :  { %9244 = vmatprep.subr.bf16.mxu0 %v10761_v60 }
  0xcf   :  { %v882_v37 = vsub.f32 %v10999_v23, %v881_v41 }
  0xd1   :  { %9246 = vmatpush3.bf16.msra.mxu0 %v10761_v60  ;;  %v855_v60 = vand.u32 4294901760, %v854_v57  ;;  %v883_v19 = vand.u32 4294901760, %v882_v37  ;;  %v864_v57 = vsub.f32 %v11037_v35, %v863_v32  ;;  %v904_v37 = vand.u32 4294901760, %v903_v16 }
  0xd2   :  { %9248 = vmatprep.subr.bf16.mxu0 %v10763_v61 }
  0xd3   :  { %v9283_v7 = vpack.c.bf16 %v883_v19, %v876_v13  ;;  %v911_v13 = vand.u32 4294901760, %v910_v17 }
  0xd5   :  { %9250 = vmatpush3.bf16.msra.mxu0 %v10763_v61  ;;  %v10964_v61 = vpack.c.bf16 %v786_v12, %v783_v11  ;;  %v890_v11 = vand.u32 4294901760, %v889_v28  ;;  %v897_v12 = vand.u32 4294901760, %v896_v43  ;;  %v925_v28 = vand.u32 4294901760, %v924_v44 }
  0xd6   :  { %9252 = vmatprep.subr.bf16.mxu0 %v10943_v4  ;;  %v9291_v25 = vpack.c.bf16 %v911_v13, %v904_v37 }
  0xd7   :  { %v9287_v1 = vpack.c.bf16 %v897_v12, %v890_v11 }
  0xd8   :  { %7377 = vmatmul.mubr.f32.vlgmr.msra.gmra.mrb[0].mxu0 %v10741_v46  ;;  %v10974_v46 = vpack.c.bf16 %v792_v40, %v789_v18  ;;  %v865_v18 = vand.u32 4294901760, %v864_v57  ;;  %v917_v40 = vsub.f32 %v11056_v52, %v916_v5  ;;  %v11120_v57 = vsub.f32 %v10990_v58, %v807_v29 }
  0xd9   :  { %9254 = vmatpush3.bf16.msra.mxu0 %v10943_v4  ;;  %7411 = vmatprep.mubr.f32.mxu0 %v855_v60  ;;  %v11084_v60 = vsub.f32 %v60_v47, %v798_v50  ;;  %v930_v47 = vand.u32 4294901760, %v11082_v8  ;;  %v11103_v50 = vsub.f32 %v10979_v51, %v801_v21 }
  0xda   :  { %9256 = vmatprep.subr.bf16.mxu0 %v10953_v9  ;;  %v918_v19 = vand.u32 4294901760, %v917_v40  ;;  %v958_v58 = vand.u32 4294901760, %v11120_v57 }
  0xdb   :  { %v937_v48 = vand.u32 4294901760, %v11084_v60  ;;  %v931_v43 = vsub.f32 %v11082_v8, %v930_v47  ;;  %v944_v21 = vand.u32 4294901760, %v11103_v50 }
  0xdc   :  { %v9295_v11 = vpack.c.bf16 %v925_v28, %v918_v19  ;;  %v959_v37 = vsub.f32 %v11120_v57, %v958_v58 }
  0xdd   :  { %9258 = vmatpush3.bf16.msra.mxu0 %v10953_v9  ;;  %v938_v51 = vsub.f32 %v11084_v60, %v937_v48  ;;  %v932_v12 = vand.u32 4294901760, %v931_v43  ;;  %v945_v17 = vsub.f32 %v11103_v50, %v944_v21 }
  0xde   :  { %9260 = vmatprep.subr.bf16.mxu0 %v10964_v61 }
  0xdf   :  { %v939_v16 = vand.u32 4294901760, %v938_v51  ;;  %v946_v44 = vand.u32 4294901760, %v945_v17  ;;  %v9319_v17 = vpack.c.bf16 %v11028_v54, %v11026_v33 }
  0xe1   :  { %9262 = vmatpush3.bf16.msra.mxu0 %v10964_v61  ;;  %v9299_v40 = vpack.c.bf16 %v939_v16, %v932_v12  ;;  %v9315_v16 = vpack.c.bf16 %v10999_v23, %v10997_v15  ;;  %v9387_v15 = vpack.c.bf16 %v909_v59, %v902_v56  ;;  %v9391_v23 = vpack.c.bf16 %v923_v6, %v916_v5  ;;  %v6187_v56 = vld [vmem:[%s13636_s1 + $0x128] sm:$0xff] }
  0xe2   :  { %9264 = vmatprep.subr.bf16.mxu0 %v10974_v46  ;;  %v1489_v6 = vand.u32 4294901760, %v6187_v56 }
  0xe5   :  { %9266 = vmatpush3.bf16.msra.mxu0 %v10974_v46 }
  0xe6   :  { %9268 = vmatprep.subr.bf16.mxu0 %v11002_v14 }
  0xe9   :  { %9270 = vmatpush3.bf16.msra.mxu0 %v11002_v14 }
  0xea   :  { %9272 = vmatprep.subr.bf16.mxu0 %v11014_v30 }
  0xed   :  { %9274 = vmatpush3.bf16.msra.mxu0 %v11014_v30 }
  0xee   :  { %9276 = vmatprep.subr.bf16.mxu0 %v11034_v62 }
  0xf1   :  { %9278 = vmatpush3.bf16.msra.mxu0 %v11034_v62 }
  0xf2   :  { %9280 = vmatprep.subr.bf16.mxu0 %v11065_v26 }
  0xf5   :  { %9282 = vmatpush3.bf16.msra.mxu0 %v11065_v26 }
  0xf6   :  { %9284 = vmatprep.subr.bf16.mxu0 %v9283_v7 }
  0xf8   :  { %7412 = vmatmul.mubr.f32.vlgmr.msra.gmra.mrb[0].mxu0 %v865_v18  ;;  %v952_v18 = vsub.f32 %v11106_v20, %v951_v53 }
  0xf9   :  { %9286 = vmatpush3.bf16.msra.mxu0 %v9283_v7  ;;  %7446 = vmatprep.mubr.f32.mxu0 %v10915_v34  ;;  %v11125_v7 = vsub.f32 %v10995_v3, %v810_v22  ;;  %v11138_v3 = vsub.f32 %v11019_v31, %v813_v0  ;;  %v11143_v22 = vsub.f32 %v11024_v45, %v816_v36  ;;  %v960_v36 = vand.u32 4294901760, %v959_v37 }
  0xfa   :  { %9288 = vmatprep.subr.bf16.mxu0 %v9287_v1 }
  0xfb   :  { %v965_v29 = vand.u32 4294901760, %v11125_v7  ;;  %v972_v31 = vand.u32 4294901760, %v11138_v3  ;;  %v979_v0 = vand.u32 4294901760, %v11143_v22  ;;  %v9339_v37 = vpack.c.bf16 %v11125_v7, %v11120_v57  ;;  %v11305_v57 = vld [vmem:[%s13636_s1 + $0x150] sm:$0xff] }
  0xfd   :  { %9290 = vmatpush3.bf16.msra.mxu0 %v9287_v1  ;;  %v953_v1 = vand.u32 4294901760, %v952_v18  ;;  %v966_v13 = vsub.f32 %v11125_v7, %v965_v29  ;;  %v973_v28 = vsub.f32 %v11138_v3, %v972_v31  ;;  %v980_v43 = vsub.f32 %v11143_v22, %v979_v0  ;;  %v11310_v7 = vld [vmem:[%s13636_s1 + $0x158] sm:$0xff] }
  0xfe   :  { %9292 = vmatprep.subr.bf16.mxu0 %v9291_v25  ;;  %v9323_v18 = vpack.c.bf16 %v11053_v27, %v11051_v2  ;;  %v9403_v33 = vpack.c.bf16 %v965_v29, %v958_v58  ;;  %v9407_v54 = vpack.c.bf16 %v979_v0, %v972_v31  ;;  %v6185_v2 = vld [vmem:[%s13636_s1 + $0x118] sm:$0xff]  ;;  %v11316_v58 = vld [vmem:[%s13636_s1 + $0x160] sm:$0xff]  ;;  %v11321_v29 = vld [vmem:[%s13636_s1 + $0x168] sm:$0xff] }
  0xff   :  { %v9303_v45 = vpack.c.bf16 %v953_v1, %v946_v44  ;;  %v967_v19 = vand.u32 4294901760, %v966_v13  ;;  %v981_v12 = vand.u32 4294901760, %v980_v43  ;;  %v9331_v44 = vpack.c.bf16 %v11084_v60, %v11082_v8  ;;  %v6188_v8 = vld [vmem:[%s13636_s1 + $0x130] sm:$0xff]  ;;  %v6189_v60 = vld [vmem:[%s13636_s1 + $0x138] sm:$0xff] }
 0x100   :  { %v9335_v1 = vpack.c.bf16 %v11106_v20, %v11103_v50  ;;  %v9343_v13 = vpack.c.bf16 %v11143_v22, %v11138_v3  ;;  %v6190_v50 = vld [vmem:[%s13636_s1 + $0x140] sm:$0xff]  ;;  %v6191_v20 = vld [vmem:[%s13636_s1 + $0x148] sm:$0xff] }
 0x101   :  { %9294 = vmatpush3.bf16.msra.mxu0 %v9291_v25  ;;  %v9307_v51 = vpack.c.bf16 %v967_v19, %v960_v36  ;;  %v974_v25 = vand.u32 4294901760, %v973_v28  ;;  %v1455_v31 = vld [vmem:[#allocation2 + $0xa] sm:$0xff]  ;;  %v1507_v36 = vand.u32 4294901760, %v11310_v7  ;;  %v1510_v19 = vand.u32 4294901760, %v11316_v58 }
 0x102   :  { %9296 = vmatprep.subr.bf16.mxu0 %v9295_v11  ;;  %v1513_v28 = vand.u32 4294901760, %v11321_v29  ;;  %v11334_v43 = vand.u32 4294901760, %v1455_v31 }
 0x105   :  { %9298 = vmatpush3.bf16.msra.mxu0 %v9295_v11  ;;  %v9311_v11 = vpack.c.bf16 %v981_v12, %v974_v25 }
 0x106   :  { %9300 = vmatprep.subr.bf16.mxu0 %v9299_v40 }
 0x109   :  { %9302 = vmatpush3.bf16.msra.mxu0 %v9299_v40  ;;  %v9327_v40 = vpack.c.bf16 %v11058_v55, %v11056_v52  ;;  %v1483_v52 = vand.u32 4294901760, %v6185_v2  ;;  %v6186_v55 = vld [vmem:[%s13636_s1 + $0x120] sm:$0xff] }
 0x10a   :  { %9304 = vmatprep.subr.bf16.mxu0 %v9303_v45  ;;  %v1486_v5 = vand.u32 4294901760, %v6186_v55 }
 0x10d   :  { %9306 = vmatpush3.bf16.msra.mxu0 %v9303_v45  ;;  %v1504_v45 = vand.u32 4294901760, %v11305_v57 }
 0x10e   :  { %9308 = vmatprep.subr.bf16.mxu0 %v9307_v51 }
 0x10f   :  { %v11340_v12 = vpack.c.bf16 %v1507_v36, %v1504_v45 }
 0x111   :  { %9310 = vmatpush3.bf16.msra.mxu0 %v9307_v51 }
 0x112   :  { %9312 = vmatprep.subr.bf16.mxu0 %v9311_v11 }
 0x115   :  { %9314 = vmatpush3.bf16.msra.mxu0 %v9311_v11  ;;  %v11345_v11 = vld [vmem:[%s13636_s1 + $0x170] sm:$0xff] }
 0x116   :  { %9316 = vmatprep.subr.bf16.mxu0 %v9315_v16 }
 0x118   :  { %7447 = vmatmul.mubr.f32.vlgmr.msra.gmra.mrb[0].mxu0 %v11008_v49 }
 0x119   :  { %9318 = vmatpush3.bf16.msra.mxu0 %v9315_v16  ;;  %7481 = vmatprep.mubr.f32.mxu0 %v10920_v10  ;;  %v9379_v10 = vpack.c.bf16 %v881_v41, %v874_v63  ;;  %v9395_v63 = vpack.c.bf16 %v937_v48, %v930_v47  ;;  %v9399_v41 = vpack.c.bf16 %v951_v53, %v944_v21  ;;  %v1492_v47 = vand.u32 4294901760, %v6188_v8  ;;  %v11350_v16 = vld [vmem:[%s13636_s1 + $0x178] sm:$0xff] }
 0x11a   :  { %9320 = vmatprep.subr.bf16.mxu0 %v9319_v17  ;;  %v1495_v48 = vand.u32 4294901760, %v6189_v60  ;;  %v1498_v21 = vand.u32 4294901760, %v6190_v50  ;;  %v1501_v53 = vand.u32 4294901760, %v6191_v20 }
 0x11c   :  { %v11328_v0 = vpack.c.bf16 %v1501_v53, %v1498_v21 }
 0x11d   :  { %9322 = vmatpush3.bf16.msra.mxu0 %v9319_v17 }
 0x11e   :  { %9324 = vmatprep.subr.bf16.mxu0 %v9323_v18 }
 0x121   :  { %9326 = vmatpush3.bf16.msra.mxu0 %v9323_v18  ;;  %v11354_v18 = vsub.f32 %v6185_v2, %v1483_v52 }
 0x122   :  { %9328 = vmatprep.subr.bf16.mxu0 %v9327_v40 }
 0x125   :  { %9330 = vmatpush3.bf16.msra.mxu0 %v9327_v40  ;;  %v11360_v40 = vpack.c.bf16 %v1513_v28, %v1510_v19 }
 0x126   :  { %9332 = vmatprep.subr.bf16.mxu0 %v9331_v44 }
 0x129   :  { %9334 = vmatpush3.bf16.msra.mxu0 %v9331_v44  ;;  %v11363_v44 = vsub.f32 %v1455_v31, %v11334_v43  ;;  %v11432_v31 = vsub.f32 %v11310_v7, %v1507_v36 }
 0x12a   :  { %9336 = vmatprep.subr.bf16.mxu0 %v9335_v1 }
 0x12b   :  { %v1654_v7 = vand.u32 4294901760, %v11432_v31 }
 0x12d   :  { %9338 = vmatpush3.bf16.msra.mxu0 %v9335_v1  ;;  %v1516_v1 = vand.u32 4294901760, %v11345_v11 }
 0x12e   :  { %9340 = vmatprep.subr.bf16.mxu0 %v9339_v37 }
 0x131   :  { %9342 = vmatpush3.bf16.msra.mxu0 %v9339_v37  ;;  %v1519_v37 = vand.u32 4294901760, %v11350_v16 }
 0x132   :  { %9344 = vmatprep.subr.bf16.mxu0 %v9343_v13 }
 0x135   :  { %9346 = vmatpush3.bf16.msra.mxu0 %v9343_v13 }
 0x136   :  { %9348 = vmatprep.subr.bf16.mxu0 %v10943_v4 }
 0x138   :  { %7482 = vmatmul.mubr.f32.vlgmr.msra.gmra.mrb[0].mxu0 %v11037_v35  ;;  %v1454_v35 = vld [vmem:[#allocation2 + $0x2] sm:$0xff] }
 0x139   :  { %9350 = vmatpush3.bf16.msra.mxu0 %v10943_v4  ;;  %7516 = vmatprep.mubr.f32.mxu0 %v853_v24  ;;  %v9383_v24 = vpack.c.bf16 %v895_v39, %v888_v38  ;;  %v11241_v38 = vand.u32 4294901760, %v1454_v35  ;;  %v6184_v39 = vld [vmem:[%s13636_s1 + $0x110] sm:$0xff] }
 0x13a   :  { %9352 = vmatprep.subr.bf16.mxu0 %v10953_v9 }
 0x13d   :  { %9354 = vmatpush3.bf16.msra.mxu0 %v10953_v9 }
 0x13e   :  { %9356 = vmatprep.subr.bf16.mxu0 %v10964_v61 }
 0x141   :  { %9358 = vmatpush3.bf16.msra.mxu0 %v10964_v61 }
 0x142   :  { %9360 = vmatprep.subr.bf16.mxu0 %v10974_v46 }
 0x145   :  { %9362 = vmatpush3.bf16.msra.mxu0 %v10974_v46 }
 0x146   :  { %9364 = vmatprep.subr.bf16.mxu0 %v11002_v14 }
 0x149   :  { %9366 = vmatpush3.bf16.msra.mxu0 %v11002_v14 }
 0x14a   :  { %9368 = vmatprep.subr.bf16.mxu0 %v11014_v30 }
 0x14d   :  { %9370 = vmatpush3.bf16.msra.mxu0 %v11014_v30 }
 0x14e   :  { %9372 = vmatprep.subr.bf16.mxu0 %v11034_v62 }
 0x151   :  { %9374 = vmatpush3.bf16.msra.mxu0 %v11034_v62 }
 0x152   :  { %9376 = vmatprep.subr.bf16.mxu0 %v11065_v26 }
 0x155   :  { %9378 = vmatpush3.bf16.msra.mxu0 %v11065_v26 }
 0x156   :  { %9380 = vmatprep.subr.bf16.mxu0 %v9379_v10 }
 0x158   :  { %7517 = vmatmul.mubr.f32.vlgmr.msra.gmra.mrb[0].mxu0 %v863_v32  ;;  %v1480_v32 = vand.u32 4294901760, %v6184_v39 }
 0x159   :  { %9382 = vmatpush3.bf16.msra.mxu0 %v9379_v10  ;;  %7551 = vmatprep.mubr.f32.mxu0 %v10915_v34 }
 0x15a   :  { %9384 = vmatprep.subr.bf16.mxu0 %v9383_v24  ;;  %v11279_v59 = vpack.c.bf16 %v1483_v52, %v1480_v32  ;;  %v11352_v17 = vsub.f32 %v6184_v39, %v1480_v32 }
 0x15d   :  { %9386 = vmatpush3.bf16.msra.mxu0 %v9383_v24  ;;  %v1591_v24 = vand.u32 4294901760, %v11352_v17 }
 0x15e   :  { %9388 = vmatprep.subr.bf16.mxu0 %v9387_v15 }
 0x161   :  { %9390 = vmatpush3.bf16.msra.mxu0 %v9387_v15  ;;  %v1598_v15 = vand.u32 4294901760, %v11354_v18 }
 0x162   :  { %9392 = vmatprep.subr.bf16.mxu0 %v9391_v23 }
 0x165   :  { %9394 = vmatpush3.bf16.msra.mxu0 %v9391_v23  ;;  %v11377_v23 = vsub.f32 %v6186_v55, %v1486_v5 }
 0x166   :  { %9396 = vmatprep.subr.bf16.mxu0 %v9395_v63 }
 0x167   :  { %v1605_v39 = vand.u32 4294901760, %v11377_v23 }
 0x169   :  { %9398 = vmatpush3.bf16.msra.mxu0 %v9395_v63  ;;  %v11379_v63 = vsub.f32 %v6187_v56, %v1489_v6  ;;  %v11408_v56 = vsub.f32 %v6190_v50, %v1498_v21 }
 0x16a   :  { %9400 = vmatprep.subr.bf16.mxu0 %v9399_v41 }
 0x16b   :  { %v1612_v2 = vand.u32 4294901760, %v11379_v63 }
 0x16d   :  { %9402 = vmatpush3.bf16.msra.mxu0 %v9399_v41  ;;  %v1566_v41 = vand.u32 4294901760, %v11363_v44 }
 0x16e   :  { %9404 = vmatprep.subr.bf16.mxu0 %v9403_v33 }
 0x171   :  { %9406 = vmatpush3.bf16.msra.mxu0 %v9403_v33  ;;  %v11382_v33 = vsub.f32 %v6188_v8, %v1492_v47  ;;  %v1606_v8 = vsub.f32 %v11377_v23, %v1605_v39 }
 0x172   :  { %9408 = vmatprep.subr.bf16.mxu0 %v9407_v54 }
 0x173   :  { %v1619_v32 = vand.u32 4294901760, %v11382_v33 }
 0x175   :  { %9410 = vmatpush3.bf16.msra.mxu0 %v9407_v54  ;;  %v11384_v54 = vsub.f32 %v6189_v60, %v1495_v48  ;;  %v1613_v60 = vsub.f32 %v11379_v63, %v1612_v2 }
 0x176   :  { %9412 = vmatprep.subr.bf16.mxu0 %v10943_v4 }
 0x177   :  { %v1626_v52 = vand.u32 4294901760, %v11384_v54  ;;  %v9519_v42 = vpack.c.bf16 %v11384_v54, %v11382_v33 }
 0x178   :  { %7552 = vmatmul.mubr.f32.vlgmr.msra.gmra.mrb[0].mxu0 %v11008_v49 }
 0x179   :  { %9414 = vmatpush3.bf16.msra.mxu0 %v10943_v4  ;;  %7586 = vmatprep.mubr.f32.mxu0 %v10915_v34  ;;  %v11246_v34 = vsub.f32 %v1454_v35, %v11241_v38  ;;  %v6182_v4 = vld [vmem:[%s13636_s1 + $0x100] sm:$0xff]  ;;  %v11391_v35 = vpack.c.bf16 %v1519_v37, %v1516_v1  ;;  %v1627_v50 = vsub.f32 %v11384_v54, %v1626_v52 }
 0x17a   :  { %9416 = vmatprep.subr.bf16.mxu0 %v10953_v9 }
 0x17d   :  { %9418 = vmatpush3.bf16.msra.mxu0 %v10953_v9  ;;  %v6183_v9 = vld [vmem:[%s13636_s1 + $0x108] sm:$0xff] }
 0x17e   :  { %9420 = vmatprep.subr.bf16.mxu0 %v10964_v61 }
 0x181   :  { %9422 = vmatpush3.bf16.msra.mxu0 %v10964_v61  ;;  %v1556_v61 = vand.u32 4294901760, %v11246_v34 }
 0x182   :  { %9424 = vmatprep.subr.bf16.mxu0 %v10974_v46 }
 0x185   :  { %9426 = vmatpush3.bf16.msra.mxu0 %v10974_v46  ;;  %v1474_v46 = vand.u32 4294901760, %v6182_v4 }
 0x186   :  { %9428 = vmatprep.subr.bf16.mxu0 %v11002_v14 }
 0x187   :  { %v11323_v3 = vsub.f32 %v6182_v4, %v1474_v46 }
 0x189   :  { %9430 = vmatpush3.bf16.msra.mxu0 %v11002_v14  ;;  %v1477_v14 = vand.u32 4294901760, %v6183_v9  ;;  %v1577_v51 = vand.u32 4294901760, %v11323_v3 }
 0x18a   :  { %9432 = vmatprep.subr.bf16.mxu0 %v11014_v30 }
 0x18b   :  { %v11269_v27 = vpack.c.bf16 %v1477_v14, %v1474_v46  ;;  %v11325_v22 = vsub.f32 %v6183_v9, %v1477_v14  ;;  %v1578_v13 = vsub.f32 %v11323_v3, %v1577_v51  ;;  %v1592_v46 = vsub.f32 %v11352_v17, %v1591_v24 }
 0x18c   :  { %v1599_v14 = vsub.f32 %v11354_v18, %v1598_v15 }
 0x18d   :  { %9434 = vmatpush3.bf16.msra.mxu0 %v11014_v30  ;;  %v1557_v30 = vsub.f32 %v11246_v34, %v1556_v61  ;;  %v1584_v25 = vand.u32 4294901760, %v11325_v22  ;;  %v1579_v4 = vand.u32 4294901760, %v1578_v13 }
 0x18e   :  { %9436 = vmatprep.subr.bf16.mxu0 %v11034_v62 }
 0x18f   :  { %v1585_v10 = vsub.f32 %v11325_v22, %v1584_v25 }
 0x191   :  { %9438 = vmatpush3.bf16.msra.mxu0 %v11034_v62  ;;  %v1558_v62 = vand.u32 4294901760, %v1557_v30  ;;  %v1586_v9 = vand.u32 4294901760, %v1585_v10  ;;  %v1567_v30 = vsub.f32 %v11363_v44, %v1566_v41  ;;  %v1607_v10 = vand.u32 4294901760, %v1606_v8 }
 0x192   :  { %9440 = vmatprep.subr.bf16.mxu0 %v11065_v26 }
 0x193   :  { %v9475_v55 = vpack.c.bf16 %v1586_v9, %v1579_v4  ;;  %v1614_v4 = vand.u32 4294901760, %v1613_v60 }
 0x195   :  { %9442 = vmatpush3.bf16.msra.mxu0 %v11065_v26  ;;  %v11290_v26 = vpack.c.bf16 %v1489_v6, %v1486_v5  ;;  %v1593_v5 = vand.u32 4294901760, %v1592_v46  ;;  %v1600_v6 = vand.u32 4294901760, %v1599_v14  ;;  %v1628_v46 = vand.u32 4294901760, %v1627_v50 }
 0x196   :  { %9444 = vmatprep.subr.bf16.mxu0 %v11269_v27  ;;  %v9483_v36 = vpack.c.bf16 %v1614_v4, %v1607_v10 }
 0x197   :  { %v9479_v13 = vpack.c.bf16 %v1600_v6, %v1593_v5 }
 0x198   :  { %7587 = vmatmul.mubr.f32.vlgmr.msra.gmra.mrb[0].mxu0 %v11008_v49  ;;  %v11300_v49 = vpack.c.bf16 %v1495_v48, %v1492_v47  ;;  %v1568_v47 = vand.u32 4294901760, %v1567_v30  ;;  %v1620_v48 = vsub.f32 %v11382_v33, %v1619_v32  ;;  %v11446_v30 = vsub.f32 %v11316_v58, %v1510_v19 }
 0x199   :  { %9446 = vmatpush3.bf16.msra.mxu0 %v11269_v27  ;;  %7621 = vmatprep.mubr.f32.mxu0 %v1558_v62  ;;  %v11410_v62 = vsub.f32 %v6191_v20, %v1501_v53  ;;  %v1633_v20 = vand.u32 4294901760, %v11408_v56  ;;  %v11429_v53 = vsub.f32 %v11305_v57, %v1504_v45 }
 0x19a   :  { %9448 = vmatprep.subr.bf16.mxu0 %v11279_v59  ;;  %v1621_v9 = vand.u32 4294901760, %v1620_v48  ;;  %v1661_v58 = vand.u32 4294901760, %v11446_v30 }
 0x19b   :  { %v1640_v21 = vand.u32 4294901760, %v11410_v62  ;;  %v1634_v14 = vsub.f32 %v11408_v56, %v1633_v20  ;;  %v1647_v45 = vand.u32 4294901760, %v11429_v53 }
 0x19c   :  { %v9487_v5 = vpack.c.bf16 %v1628_v46, %v1621_v9  ;;  %v1662_v10 = vsub.f32 %v11446_v30, %v1661_v58 }
 0x19d   :  { %9450 = vmatpush3.bf16.msra.mxu0 %v11279_v59  ;;  %v1641_v57 = vsub.f32 %v11410_v62, %v1640_v21  ;;  %v1635_v6 = vand.u32 4294901760, %v1634_v14  ;;  %v1648_v60 = vsub.f32 %v11429_v53, %v1647_v45 }
 0x19e   :  { %9452 = vmatprep.subr.bf16.mxu0 %v11290_v26 }
 0x19f   :  { %v1642_v8 = vand.u32 4294901760, %v1641_v57  ;;  %v1649_v50 = vand.u32 4294901760, %v1648_v60  ;;  %v9511_v60 = vpack.c.bf16 %v11354_v18, %v11352_v17 }
 0x1a1   :  { %9454 = vmatpush3.bf16.msra.mxu0 %v11290_v26  ;;  %v9491_v48 = vpack.c.bf16 %v1642_v8, %v1635_v6  ;;  %v9507_v8 = vpack.c.bf16 %v11325_v22, %v11323_v3  ;;  %v9583_v3 = vpack.c.bf16 %v1626_v52, %v1619_v32  ;;  %v9587_v22 = vpack.c.bf16 %v1640_v21, %v1633_v20  ;;  %v2204_v32 = vld [vmem:[#allocation5 + $0xd8] sm:$0xff]  ;;  %v2205_v52 = vld [vmem:[#allocation5 + $0xe0] sm:$0xff]  ;;  %v2206_v21 = vld [vmem:[#allocation5 + $0xe8] sm:$0xff] }
 0x1a2   :  { %9456 = vmatprep.subr.bf16.mxu0 %v11300_v49  ;;  %v2243_v20 = vand.u32 4294901760, %v2204_v32 }
 0x1a5   :  { %9458 = vmatpush3.bf16.msra.mxu0 %v11300_v49 }
 0x1a6   :  { %9460 = vmatprep.subr.bf16.mxu0 %v11328_v0 }
 0x1a9   :  { %9462 = vmatpush3.bf16.msra.mxu0 %v11328_v0 }
 0x1aa   :  { %9464 = vmatprep.subr.bf16.mxu0 %v11340_v12 }
 0x1ad   :  { %9466 = vmatpush3.bf16.msra.mxu0 %v11340_v12 }
 0x1ae   :  { %9468 = vmatprep.subr.bf16.mxu0 %v11360_v40 }
 0x1b1   :  { %9470 = vmatpush3.bf16.msra.mxu0 %v11360_v40 }
 0x1b2   :  { %9472 = vmatprep.subr.bf16.mxu0 %v11391_v35 }
 0x1b5   :  { %9474 = vmatpush3.bf16.msra.mxu0 %v11391_v35 }
 0x1b6   :  { %9476 = vmatprep.subr.bf16.mxu0 %v9475_v55 }
 0x1b8   :  { %7622 = vmatmul.mubr.f32.vlgmr.msra.gmra.mrb[0].mxu0 %v1568_v47  ;;  %v1655_v47 = vsub.f32 %v11432_v31, %v1654_v7 }
 0x1b9   :  { %9478 = vmatpush3.bf16.msra.mxu0 %v9475_v55  ;;  %7656 = vmatprep.mubr.f32.mxu0 %v11241_v38  ;;  %v11451_v55 = vsub.f32 %v11321_v29, %v1513_v28  ;;  %v11464_v29 = vsub.f32 %v11345_v11, %v1516_v1  ;;  %v11469_v28 = vsub.f32 %v11350_v16, %v1519_v37  ;;  %v1663_v37 = vand.u32 4294901760, %v1662_v10 }
 0x1ba   :  { %9480 = vmatprep.subr.bf16.mxu0 %v9479_v13 }
 0x1bb   :  { %v1668_v19 = vand.u32 4294901760, %v11451_v55  ;;  %v1675_v11 = vand.u32 4294901760, %v11464_v29  ;;  %v1682_v1 = vand.u32 4294901760, %v11469_v28 }
 0x1bd   :  { %9482 = vmatpush3.bf16.msra.mxu0 %v9479_v13  ;;  %v1656_v13 = vand.u32 4294901760, %v1655_v47  ;;  %v1669_v4 = vsub.f32 %v11451_v55, %v1668_v19  ;;  %v1676_v46 = vsub.f32 %v11464_v29, %v1675_v11  ;;  %v1683_v14 = vsub.f32 %v11469_v28, %v1682_v1  ;;  %v2193_v47 = vld [vmem:[#allocation5 + $0x80] sm:$0xff] }
 0x1be   :  { %9484 = vmatprep.subr.bf16.mxu0 %v9483_v36  ;;  %v9599_v17 = vpack.c.bf16 %v1682_v1, %v1675_v11 }
 0x1bf   :  { %v9495_v16 = vpack.c.bf16 %v1656_v13, %v1649_v50  ;;  %v1670_v9 = vand.u32 4294901760, %v1669_v4  ;;  %v1684_v6 = vand.u32 4294901760, %v1683_v14  ;;  %v2195_v50 = vld [vmem:[#allocation5 + $0x90] sm:$0xff]  ;;  %v2210_v13 = vand.u32 4294901760, %v2193_v47  ;;  %v2196_v4 = vld [vmem:[#allocation5 + $0x98] sm:$0xff] }
 0x1c1   :  { %9486 = vmatpush3.bf16.msra.mxu0 %v9483_v36  ;;  %v9499_v57 = vpack.c.bf16 %v1670_v9, %v1663_v37  ;;  %v1677_v36 = vand.u32 4294901760, %v1676_v46  ;;  %v9515_v37 = vpack.c.bf16 %v11379_v63, %v11377_v23  ;;  %v10592_v9 = vmov 0.0|0.0  }
 0x1c2   :  { %9488 = vmatprep.subr.bf16.mxu0 %v9487_v5  ;;  %9635 = vmatprep.subr.bf16.mxu1 %v10592_v9  ;;  %v2219_v46 = vand.u32 4294901760, %v2196_v4 }
 0x1c5   :  { %9490 = vmatpush3.bf16.msra.mxu0 %v9487_v5  ;;  %v9503_v5 = vpack.c.bf16 %v1684_v6, %v1677_v36 }
 0x1c6   :  { %9492 = vmatprep.subr.bf16.mxu0 %v9491_v48 }
 0x1c9   :  { %9494 = vmatpush3.bf16.msra.mxu0 %v9491_v48  ;;  %v2194_v48 = vld [vmem:[#allocation5 + $0x88] sm:$0xff] }
 0x1ca   :  { %9496 = vmatprep.subr.bf16.mxu0 %v9495_v16  ;;  %v2213_v10 = vand.u32 4294901760, %v2194_v48 }
 0x1cc   :  { %v11494_v14 = vpack.c.bf16 %v2213_v10, %v2210_v13  ;;  %v11498_v36 = vsub.f32 %v2194_v48, %v2213_v10  ;;  %v9531_v48 = vpack.c.bf16 %v11451_v55, %v11446_v30 }
 0x1cd   :  { %9498 = vmatpush3.bf16.msra.mxu0 %v9495_v16  ;;  %v2216_v16 = vand.u32 4294901760, %v2195_v50 }
 0x1ce   :  { %9500 = vmatprep.subr.bf16.mxu0 %v9499_v57  ;;  %9637 = vmatpush3.bf16.msra.mxu1 %v11494_v14 }
 0x1cf   :  { %v11500_v6 = vsub.f32 %v2195_v50, %v2216_v16  ;;  %9638 = vmatprep.subr.bf16.mxu1 %v10592_v9  ;;  %v9535_v50 = vpack.c.bf16 %v11469_v28, %v11464_v29  ;;  %v11622_v29 = vsub.f32 %v2204_v32, %v2243_v20 }
 0x1d1   :  { %9502 = vmatpush3.bf16.msra.mxu0 %v9499_v57  ;;  %v11496_v57 = vsub.f32 %v2193_v47, %v2210_v13  ;;  %v9523_v47 = vpack.c.bf16 %v11410_v62, %v11408_v56  ;;  %v13664_v13 = vmov 0.0  }
 0x1d2   :  { %9504 = vmatprep.subr.bf16.mxu0 %v9503_v5  ;;  %7831 = vmatprep.mubr.msk.f32.mxu1 %vm10593_vm0, %v13664_v13 }
 0x1d5   :  { %9506 = vmatpush3.bf16.msra.mxu0 %v9503_v5  ;;  %v11502_v5 = vsub.f32 %v2196_v4, %v2219_v46 }
 0x1d6   :  { %9508 = vmatprep.subr.bf16.mxu0 %v9507_v8 }
 0x1d8   :  { %7657 = vmatmul.mubr.f32.vlgmr.msra.gmra.mrb[0].mxu0 %v11334_v43 }
 0x1d9   :  { %9510 = vmatpush3.bf16.msra.mxu0 %v9507_v8  ;;  %7691 = vmatprep.mubr.f32.mxu0 %v11246_v34  ;;  %v11505_v8 = vpack.c.bf16 %v2219_v46, %v2216_v16  ;;  %v9575_v34 = vpack.c.bf16 %v1598_v15, %v1591_v24  ;;  %v2201_v24 = vld [vmem:[#allocation5 + $0xc0] sm:$0xff]  ;;  %v2202_v15 = vld [vmem:[#allocation5 + $0xc8] sm:$0xff]  ;;  %v2310_v46 = vand.u32 4294901760, %v11498_v36 }
 0x1da   :  { %9512 = vmatprep.subr.bf16.mxu0 %v9511_v60  ;;  %v2237_v23 = vand.u32 4294901760, %v2202_v15 }
 0x1db   :  { %9640 = vmatpush3.bf16.msra.mxu1 %v11505_v8 }
 0x1dc   :  { %9641 = vmatprep.subr.bf16.mxu1 %v10592_v9  ;;  %v11614_v56 = vsub.f32 %v2202_v15, %v2237_v23 }
 0x1dd   :  { %9514 = vmatpush3.bf16.msra.mxu0 %v9511_v60  ;;  %v9527_v60 = vpack.c.bf16 %v11432_v31, %v11429_v53  ;;  %v2246_v53 = vand.u32 4294901760, %v2205_v52  ;;  %v2207_v31 = vld [vmem:[#allocation5 + $0xf0] sm:$0xff] }
 0x1de   :  { %9516 = vmatprep.subr.bf16.mxu0 %v9515_v37  ;;  %v2252_v30 = vand.u32 4294901760, %v2207_v31 }
 0x1df   :  { %v11624_v28 = vsub.f32 %v2205_v52, %v2246_v53  ;;  %v13651_v52 = vand.u32 4294901760, %v11614_v56 }
 0x1e0   :  { %v11628_v1 = vsub.f32 %v2207_v31, %v2252_v30 }
 0x1e1   :  { %9518 = vmatpush3.bf16.msra.mxu0 %v9515_v37  ;;  %v2303_v37 = vand.u32 4294901760, %v11496_v57 }
 0x1e2   :  { %9520 = vmatprep.subr.bf16.mxu0 %v9519_v42 }
 0x1e5   :  { %9522 = vmatpush3.bf16.msra.mxu0 %v9519_v42  ;;  %v9571_v42 = vpack.c.bf16 %v1584_v25, %v1577_v51  ;;  %v9591_v51 = vpack.c.bf16 %v1654_v7, %v1647_v45  ;;  %v9595_v25 = vpack.c.bf16 %v1668_v19, %v1661_v58  ;;  %v2208_v45 = vld [vmem:[#allocation5 + $0xf8] sm:$0xff]  ;;  %v2249_v7 = vand.u32 4294901760, %v2206_v21 }
 0x1e6   :  { %9524 = vmatprep.subr.bf16.mxu0 %v9523_v47  ;;  %v2255_v55 = vand.u32 4294901760, %v2208_v45 }
 0x1e7   :  { %v11626_v11 = vsub.f32 %v2206_v21, %v2249_v7  ;;  %v11637_v4 = vpack.c.bf16 %v2249_v7, %v2246_v53  ;;  %v2367_v21 = vsub.f32 %v11614_v56, %v13651_v52  ;;  %v13649_v7 = vand.u32 4294901760, %v11622_v29 }
 0x1e8   :  { %v11632_v10 = vsub.f32 %v2208_v45, %v2255_v55  ;;  %v11641_v16 = vpack.c.bf16 %v2255_v55, %v2252_v30 }
 0x1e9   :  { %9526 = vmatpush3.bf16.msra.mxu0 %v9523_v47  ;;  %v2304_v47 = vsub.f32 %v11496_v57, %v2303_v37  ;;  %v2368_v31 = vand.u32 4294901760, %v2367_v21 }
 0x1ea   :  { %9528 = vmatprep.subr.bf16.mxu0 %v9527_v60 }
 0x1ed   :  { %9530 = vmatpush3.bf16.msra.mxu0 %v9527_v60  ;;  %v2311_v60 = vsub.f32 %v11498_v36, %v2310_v46 }
 0x1ee   :  { %9532 = vmatprep.subr.bf16.mxu0 %v9531_v48 }
 0x1f1   :  { %9534 = vmatpush3.bf16.msra.mxu0 %v9531_v48  ;;  %v2305_v48 = vand.u32 4294901760, %v2304_v47  ;;  %v2381_v47 = vsub.f32 %v11622_v29, %v13649_v7 }
 0x1f2   :  { %9536 = vmatprep.subr.bf16.mxu0 %v9535_v50 }
 0x1f5   :  { %9538 = vmatpush3.bf16.msra.mxu0 %v9535_v50  ;;  %v2312_v50 = vand.u32 4294901760, %v2311_v60 }
 0x1f6   :  { %9540 = vmatprep.subr.bf16.mxu0 %v11269_v27 }
 0x1f8   :  { %7692 = vmatmul.mubr.f32.vlgmr.msra.gmra.mrb[0].mxu0 %v11363_v44 }
 0x1f9   :  { %9542 = vmatpush3.bf16.msra.mxu0 %v11269_v27  ;;  %7726 = vmatprep.mubr.f32.mxu0 %v1556_v61  ;;  %v9579_v61 = vpack.c.bf16 %v1612_v2, %v1605_v39  ;;  %v2203_v2 = vld [vmem:[#allocation5 + $0xd0] sm:$0xff] }
 0x1fa   :  { %9544 = vmatprep.subr.bf16.mxu0 %v11279_v59  ;;  %v2240_v62 = vand.u32 4294901760, %v2203_v2 }
 0x1fc   :  { %v11618_v58 = vpack.c.bf16 %v2243_v20, %v2240_v62  ;;  %v11620_v19 = vsub.f32 %v2203_v2, %v2240_v62 }
 0x1fd   :  { %9546 = vmatpush3.bf16.msra.mxu0 %v11279_v59 }
 0x1fe   :  { %9548 = vmatprep.subr.bf16.mxu0 %v11290_v26  ;;  %v13650_v45 = vand.u32 4294901760, %v11620_v19 }
 0x200   :  { %v2374_v55 = vsub.f32 %v11620_v19, %v13650_v45 }
 0x201   :  { %9550 = vmatpush3.bf16.msra.mxu0 %v11290_v26 }
 0x202   :  { %9552 = vmatprep.subr.bf16.mxu0 %v11300_v49  ;;  %v2375_v60 = vand.u32 4294901760, %v2374_v55 }
 0x205   :  { %9554 = vmatpush3.bf16.msra.mxu0 %v11300_v49 }
 0x206   :  { %9556 = vmatprep.subr.bf16.mxu0 %v11328_v0 }
 0x209   :  { %9558 = vmatpush3.bf16.msra.mxu0 %v11328_v0 }
 0x20a   :  { %9560 = vmatprep.subr.bf16.mxu0 %v11340_v12 }
 0x20d   :  { %9562 = vmatpush3.bf16.msra.mxu0 %v11340_v12 }
 0x20e   :  { %9564 = vmatprep.subr.bf16.mxu0 %v11360_v40 }
 0x211   :  { %9566 = vmatpush3.bf16.msra.mxu0 %v11360_v40 }
 0x212   :  { %9568 = vmatprep.subr.bf16.mxu0 %v11391_v35 }
 0x215   :  { %9570 = vmatpush3.bf16.msra.mxu0 %v11391_v35 }
 0x216   :  { %9572 = vmatprep.subr.bf16.mxu0 %v9571_v42 }
 0x218   :  { %7727 = vmatmul.mubr.f32.vlgmr.msra.gmra.mrb[0].mxu0 %v1566_v41 }
 0x219   :  { %9574 = vmatpush3.bf16.msra.mxu0 %v9571_v42  ;;  %7761 = vmatprep.mubr.f32.mxu0 %v11241_v38  ;;  %v2317_v42 = vand.u32 4294901760, %v11500_v6 }
 0x21a   :  { %9576 = vmatprep.subr.bf16.mxu0 %v9575_v34 }
 0x21d   :  { %9578 = vmatpush3.bf16.msra.mxu0 %v9575_v34  ;;  %v2324_v34 = vand.u32 4294901760, %v11502_v5 }
 0x21e   :  { %9580 = vmatprep.subr.bf16.mxu0 %v9579_v61 }
 0x221   :  { %9582 = vmatpush3.bf16.msra.mxu0 %v9579_v61  ;;  %v11656_v61 = vpack.c.bf16 %v2312_v50, %v2305_v48  ;;  %v2382_v48 = vand.u32 4294901760, %v2381_v47  ;;  %v13648_v50 = vand.u32 4294901760, %v11624_v28 }
 0x222   :  { %9584 = vmatprep.subr.bf16.mxu0 %v9583_v3 }
 0x225   :  { %9586 = vmatpush3.bf16.msra.mxu0 %v9583_v3  ;;  %v2318_v3 = vsub.f32 %v11500_v6, %v2317_v42 }
 0x226   :  { %9588 = vmatprep.subr.bf16.mxu0 %v9587_v22 }
 0x229   :  { %9590 = vmatpush3.bf16.msra.mxu0 %v9587_v22  ;;  %v2325_v22 = vsub.f32 %v11502_v5, %v2324_v34 }
 0x22a   :  { %9592 = vmatprep.subr.bf16.mxu0 %v9591_v51 }
 0x22d   :  { %9594 = vmatpush3.bf16.msra.mxu0 %v9591_v51  ;;  %v2319_v51 = vand.u32 4294901760, %v2318_v3  ;;  %v13647_v3 = vand.u32 4294901760, %v11626_v11 }
 0x22e   :  { %9596 = vmatprep.subr.bf16.mxu0 %v9595_v25 }
 0x231   :  { %9598 = vmatpush3.bf16.msra.mxu0 %v9595_v25  ;;  %v2326_v25 = vand.u32 4294901760, %v2325_v22  ;;  %v9675_v22 = vpack.c.bf16 %v2382_v48, %v2375_v60  ;;  %v9699_v48 = vpack.c.bf16 %v11622_v29, %v11620_v19 }
 0x232   :  { %9600 = vmatprep.subr.bf16.mxu0 %v9599_v17 }
 0x235   :  { %9602 = vmatpush3.bf16.msra.mxu0 %v9599_v17 }
 0x236   :  { %9604 = vmatprep.subr.bf16.mxu0 %v11269_v27 }
 0x238   :  { %7762 = vmatmul.mubr.f32.vlgmr.msra.gmra.mrb[0].mxu0 %v11334_v43 }
 0x239   :  { %9606 = vmatpush3.bf16.msra.mxu0 %v11269_v27  ;;  %7796 = vmatprep.mubr.f32.mxu0 %v11241_v38  ;;  %v2197_v38 = vld [vmem:[#allocation5 + $0xa0] sm:$0xff]  ;;  %v2198_v27 = vld [vmem:[#allocation5 + $0xa8] sm:$0xff] }
 0x23a   :  { %9608 = vmatprep.subr.bf16.mxu0 %v11279_v59 }
 0x23d   :  { %9610 = vmatpush3.bf16.msra.mxu0 %v11279_v59  ;;  %v2222_v59 = vand.u32 4294901760, %v2197_v38 }
 0x23e   :  { %9612 = vmatprep.subr.bf16.mxu0 %v11290_v26 }
 0x23f   :  { %v11601_v63 = vsub.f32 %v2197_v38, %v2222_v59 }
 0x241   :  { %9614 = vmatpush3.bf16.msra.mxu0 %v11290_v26  ;;  %v2225_v26 = vand.u32 4294901760, %v2198_v27  ;;  %v2331_v17 = vand.u32 4294901760, %v11601_v63 }
 0x242   :  { %9616 = vmatprep.subr.bf16.mxu0 %v11300_v49 }
 0x243   :  { %v11603_v41 = vsub.f32 %v2198_v27, %v2225_v26  ;;  %v11666_v27 = vpack.c.bf16 %v2326_v25, %v2319_v51  ;;  %v2388_v51 = vsub.f32 %v11624_v28, %v13648_v50  ;;  %v2395_v25 = vsub.f32 %v11626_v11, %v13647_v3 }
 0x245   :  { %9618 = vmatpush3.bf16.msra.mxu0 %v11300_v49  ;;  %v11594_v49 = vpack.c.bf16 %v2225_v26, %v2222_v59  ;;  %v2338_v38 = vand.u32 4294901760, %v11603_v41  ;;  %v2332_v59 = vsub.f32 %v11601_v63, %v2331_v17  ;;  %v9690_v55 = vpack.c.bf16 %v11603_v41, %v11601_v63 }
 0x246   :  { %9620 = vmatprep.subr.bf16.mxu0 %v11328_v0  ;;  %v13666_v63 = vand.u32 4294901760, %v11620_v19 }
 0x247   :  { %9643 = vmatpush3.bf16.msra.mxu1 %v11594_v49  ;;  %v2339_v26 = vsub.f32 %v11603_v41, %v2338_v38  ;;  %v13667_v41 = vand.u32 4294901760, %v11622_v29  ;;  %v2176_v29 = vld [vmem:[#allocation5 + $0x10] sm:$0xff] }
 0x248   :  { %9644 = vmatprep.subr.bf16.mxu1 %v10592_v9 }
 0x249   :  { %9622 = vmatpush3.bf16.msra.mxu0 %v11328_v0  ;;  %v2199_v0 = vld [vmem:[#allocation5 + $0xb0] sm:$0xff] }
 0x24a   :  { %9624 = vmatprep.subr.bf16.mxu0 %v11340_v12  ;;  %v2228_v18 = vand.u32 4294901760, %v2199_v0 }
 0x24c   :  { %v11606_v33 = vsub.f32 %v2199_v0, %v2228_v18  ;;  %v2333_v0 = vand.u32 4294901760, %v2332_v59  ;;  %v2389_v59 = vand.u32 4294901760, %v2388_v51  ;;  %v9702_v51 = vpack.c.bf16 %v11626_v11, %v11624_v28 }
 0x24d   :  { %9626 = vmatpush3.bf16.msra.mxu0 %v11340_v12  ;;  %v2200_v12 = vld [vmem:[#allocation5 + $0xb8] sm:$0xff] }
 0x24e   :  { %9628 = vmatprep.subr.bf16.mxu0 %v11360_v40 }
 0x251   :  { %9630 = vmatpush3.bf16.msra.mxu0 %v11360_v40  ;;  %v2231_v40 = vand.u32 4294901760, %v2200_v12 }
 0x252   :  { %9632 = vmatprep.subr.bf16.mxu0 %v11391_v35 }
 0x253   :  { %v11598_v44 = vpack.c.bf16 %v2231_v40, %v2228_v18  ;;  %v11608_v54 = vsub.f32 %v2200_v12, %v2231_v40  ;;  %v2340_v12 = vand.u32 4294901760, %v2339_v26  ;;  %v2345_v18 = vand.u32 4294901760, %v11606_v33 }
 0x254   :  { %v2396_v26 = vand.u32 4294901760, %v2395_v25  ;;  %v9705_v25 = vpack.c.bf16 %v11632_v10, %v11628_v1 }
 0x255   :  { %9634 = vmatpush3.bf16.msra.mxu0 %v11391_v35  ;;  %9646 = vmatpush3.bf16.msra.mxu1 %v11598_v44  ;;  %v2352_v40 = vand.u32 4294901760, %v11608_v54  ;;  %v2346_v15 = vsub.f32 %v11606_v33, %v2345_v18  ;;  %v9693_v47 = vpack.c.bf16 %v11608_v54, %v11606_v33  ;;  %v13668_v33 = vand.u32 4294901760, %v11624_v28 }
 0x256   :  { %10067 = vmatprep.subr.bf16.mxu0 %v10592_v9  ;;  %9647 = vmatprep.subr.bf16.mxu1 %v10592_v9 }
 0x258   :  { %7797 = vmatmul.mubr.f32.vlgmr.msra.gmra.mrb[0].mxu0 %v11334_v43  ;;  %v2234_v43 = vand.u32 4294901760, %v2201_v24 }
 0x259   :  { %8461 = vmatprep.mubr.msk.f32.mxu0 %vm10593_vm0, %v13664_v13 }
 0x25a   :  { %v11610_v35 = vpack.c.bf16 %v2237_v23, %v2234_v43  ;;  %v11612_v39 = vsub.f32 %v2201_v24, %v2234_v43  ;;  %v9666_v24 = vpack.c.bf16 %v2340_v12, %v2333_v0  ;;  %v2353_v43 = vsub.f32 %v11608_v54, %v2352_v40 }
 0x25b   :  { %v2347_v23 = vand.u32 4294901760, %v2346_v15  ;;  %v13646_v0 = vand.u32 4294901760, %v11628_v1  ;;  %v13645_v12 = vand.u32 4294901760, %v11632_v10  ;;  %v9678_v15 = vpack.c.bf16 %v2396_v26, %v2389_v59  ;;  %v6198_v59 = vld [vmem:[%s13639_s4] ss:$0 sm:$0xff] }
 0x25c   :  { %9649 = vmatpush3.bf16.msra.mxu1 %v11610_v35  ;;  %v2354_v2 = vand.u32 4294901760, %v2353_v43  ;;  %v2359_v32 = vand.u32 4294901760, %v11612_v39  ;;  %v9696_v60 = vpack.c.bf16 %v11614_v56, %v11612_v39  ;;  %v13669_v54 = vand.u32 4294901760, %v11626_v11 }
 0x25d   :  { %9650 = vmatprep.subr.bf16.mxu1 %v10592_v9  ;;  %v2402_v43 = vsub.f32 %v11628_v1, %v13646_v0 }
 0x25e   :  { %v9669_v62 = vpack.c.bf16 %v2354_v2, %v2347_v23  ;;  %v2360_v20 = vsub.f32 %v11612_v39, %v2359_v32  ;;  %v2409_v23 = vsub.f32 %v11632_v10, %v13645_v12  ;;  %v13670_v39 = vand.u32 4294901760, %v11628_v1  ;;  %v2179_v1 = vld [vmem:[#allocation5 + $0x28] sm:$0xff] }
 0x25f   :  { %v2403_v2 = vand.u32 4294901760, %v2402_v43 }
 0x260   :  { %9652 = vmatpush3.bf16.msra.mxu1 %v11618_v58  ;;  %v2361_v53 = vand.u32 4294901760, %v2360_v20  ;;  %v2410_v20 = vand.u32 4294901760, %v2409_v23 }
 0x261   :  { %9653 = vmatprep.subr.bf16.mxu1 %v10592_v9 }
 0x262   :  { %v9672_v30 = vpack.c.bf16 %v2368_v31, %v2361_v53  ;;  %v9681_v21 = vpack.c.bf16 %v2410_v20, %v2403_v2  ;;  %v9684_v53 = vpack.c.bf16 %v11498_v36, %v11496_v57  ;;  %v9687_v31 = vpack.c.bf16 %v11502_v5, %v11500_v6 }
 0x263   :  { %v9738_v57 = vpack.c.bf16 %v2338_v38, %v2331_v17  ;;  %v9741_v36 = vpack.c.bf16 %v2352_v40, %v2345_v18  ;;  %v13665_v6 = vand.u32 4294901760, %v11614_v56  ;;  %v13671_v56 = vand.u32 4294901760, %v11632_v10  ;;  %v2181_v17 = vld [vmem:[#allocation5 + $0x38] sm:$0xff] }
 0x264   :  { %9655 = vmatpush3.bf16.msra.mxu1 %v11637_v4  ;;  %v2872_v40 = vand.u32 4294901760, %v2181_v17 }
 0x265   :  { %9656 = vmatprep.subr.bf16.mxu1 %v10592_v9  ;;  %v9744_v5 = vpack.c.bf16 %v13665_v6, %v2359_v32  ;;  %v2183_v32 = vld [vmem:[#allocation5 + $0x48] sm:$0xff] }
 0x268   :  { %9658 = vmatpush3.bf16.msra.mxu1 %v11641_v16 }
 0x269   :  { %9659 = vmatprep.subr.bf16.mxu1 %v10592_v9 }
 0x32b   :  { %v7798_v26 = vpop.f32.mrb[0].mxu0 }
 0x32c   :  { %v2167_v43 = vadd.f32 %v7798_v26, %v6198_v59  ;;  %v2147_v23 = vpop.f32.mrb[1].mxu0  ;;  %v11881_v26 = vld [vmem:[#allocation5 + $0x70] sm:$0xff] }
 0x32d   :  { %v2166_v2 = vadd.f32 %v6198_v59, %v2147_v23 }
 0x32e   :  { %v2169_v20 = vmax.f32 %v2167_v43, 0.0  ;;  %v11883_v43 = vld [vmem:[#allocation5 + $0x78] sm:$0xff] }
 0x32f   :  { %v2168_v12 = vmax.f32 %v2166_v2, 0.0 }
 0x330   :  { %2172 = vst [vmem:[#allocation3 + $0x9] sm:$0xff] %v2169_v20 }
 0x331   :  { %2171 = vst [vmem:[#allocation3 + $0x1] sm:$0xff] %v2168_v12 }
 0x338   :  { %v2191_v0 = vld [vmem:[#allocation3 + $0x1] ss:$2 sm:$0xff] }
 0x339   :  { %v11733_v3 = vand.u32 4294901760, %v2191_v0 }
 0x33b   :  { %v2291_v50 = vsub.f32 %v2191_v0, %v11733_v3 }
 0x33d   :  { %v2292_v7 = vand.u32 4294901760, %v2291_v50 }
 0x33f   :  { %v2293_v45 = vsub.f32 %v2291_v50, %v2292_v7 }
 0x341   :  { %v2294_v52 = vand.u32 4294901760, %v2293_v45  ;;  %v2878_v45 = vand.u32 4294901760, %v2183_v32 }
 0x343   :  { %7832 = vmatmul.mubr.f32.vlgmr.msra.gmra.mrb[0].mxu1 %v2294_v52 }
 0x344   :  { %9661 = vmatpush3.bf16.msra.mxu1 %v11656_v61  ;;  %7866 = vmatprep.mubr.msk.f32.mxu1 %vm10593_vm0, %v13664_v13  ;;  %v9732_v61 = vpack.c.bf16 %v2310_v46, %v2303_v37  ;;  %v9747_v37 = vpack.c.bf16 %v13667_v41, %v13666_v63  ;;  %v9750_v46 = vpack.c.bf16 %v13669_v54, %v13668_v33  ;;  %v2896_v63 = vand.u32 4294901760, %v11883_v43 }
 0x345   :  { %9662 = vmatprep.subr.bf16.mxu1 %v10592_v9 }
 0x348   :  { %9664 = vmatpush3.bf16.msra.mxu1 %v11666_v27  ;;  %v9735_v27 = vpack.c.bf16 %v2324_v34, %v2317_v42  ;;  %v9753_v42 = vpack.c.bf16 %v13671_v56, %v13670_v39  ;;  %v2866_v34 = vand.u32 4294901760, %v2179_v1  ;;  %v11915_v56 = vsub.f32 %v2181_v17, %v2872_v40 }
 0x349   :  { %9665 = vmatprep.subr.bf16.mxu1 %v10592_v9 }
 0x34c   :  { %9667 = vmatpush3.bf16.msra.mxu1 %v9666_v24  ;;  %v2182_v24 = vld [vmem:[#allocation5 + $0x40] sm:$0xff] }
 0x34d   :  { %9668 = vmatprep.subr.bf16.mxu1 %v10592_v9 }
 0x350   :  { %9670 = vmatpush3.bf16.msra.mxu1 %v9669_v62  ;;  %v2875_v62 = vand.u32 4294901760, %v2182_v24 }
 0x351   :  { %9671 = vmatprep.subr.bf16.mxu1 %v10592_v9 }
 0x352   :  { %v11860_v0 = vpack.c.bf16 %v2878_v45, %v2875_v62 }
 0x354   :  { %9673 = vmatpush3.bf16.msra.mxu1 %v9672_v30  ;;  %v2185_v30 = vld [vmem:[#allocation5 + $0x58] sm:$0xff] }
 0x355   :  { %9674 = vmatprep.subr.bf16.mxu1 %v10592_v9 }
 0x358   :  { %9676 = vmatpush3.bf16.msra.mxu1 %v9675_v22 }
 0x359   :  { %9677 = vmatprep.subr.bf16.mxu1 %v10592_v9 }
 0x35c   :  { %9679 = vmatpush3.bf16.msra.mxu1 %v9678_v15  ;;  %v2884_v15 = vand.u32 4294901760, %v2185_v30 }
 0x35d   :  { %9680 = vmatprep.subr.bf16.mxu1 %v10592_v9 }
 0x360   :  { %9682 = vmatpush3.bf16.msra.mxu1 %v9681_v21  ;;  %v11863_v21 = vld [vmem:[#allocation5 + $0x60] sm:$0xff] }
 0x361   :  { %9683 = vmatprep.subr.bf16.mxu1 %v10592_v9 }
 0x363   :  { %7867 = vmatmul.mubr.f32.vlgmr.msra.gmra.mrb[2].mxu1 %v11733_v3 }
 0x364   :  { %9685 = vmatpush3.bf16.msra.mxu1 %v9684_v53  ;;  %7901 = vmatprep.mubr.msk.f32.mxu1 %vm10593_vm0, %v13664_v13  ;;  %v11865_v53 = vld [vmem:[#allocation5 + $0x68] sm:$0xff] }
 0x365   :  { %9686 = vmatprep.subr.bf16.mxu1 %v10592_v9  ;;  %v2890_v59 = vand.u32 4294901760, %v11865_v53 }
 0x368   :  { %9688 = vmatpush3.bf16.msra.mxu1 %v9687_v31 }
 0x369   :  { %9689 = vmatprep.subr.bf16.mxu1 %v10592_v9 }
 0x36c   :  { %9691 = vmatpush3.bf16.msra.mxu1 %v9690_v55 }
 0x36d   :  { %9692 = vmatprep.subr.bf16.mxu1 %v10592_v9 }
 0x370   :  { %9694 = vmatpush3.bf16.msra.mxu1 %v9693_v47 }
 0x371   :  { %9695 = vmatprep.subr.bf16.mxu1 %v10592_v9 }
 0x374   :  { %9697 = vmatpush3.bf16.msra.mxu1 %v9696_v60 }
 0x375   :  { %9698 = vmatprep.subr.bf16.mxu1 %v10592_v9 }
 0x378   :  { %9700 = vmatpush3.bf16.msra.mxu1 %v9699_v48 }
 0x379   :  { %9701 = vmatprep.subr.bf16.mxu1 %v10592_v9 }
 0x37c   :  { %9703 = vmatpush3.bf16.msra.mxu1 %v9702_v51 }
 0x37d   :  { %9704 = vmatprep.subr.bf16.mxu1 %v10592_v9 }
 0x380   :  { %9706 = vmatpush3.bf16.msra.mxu1 %v9705_v25  ;;  %v2887_v25 = vand.u32 4294901760, %v11863_v21 }
 0x381   :  { %9707 = vmatprep.subr.bf16.mxu1 %v10592_v9 }
 0x382   :  { %v11901_v6 = vpack.c.bf16 %v2890_v59, %v2887_v25 }
 0x383   :  { %7902 = vmatmul.mubr.f32.vlgmr.msra.gmra.mrb[4].mxu1 %v2291_v50  ;;  %v2173_v50 = vld [vmem:[#allocation3] ss:$2 sm:$0xff] }
 0x384   :  { %9709 = vmatpush3.bf16.msra.mxu1 %v11494_v14  ;;  %7936 = vmatprep.mubr.msk.f32.mxu1 %vm10593_vm0, %v13664_v13  ;;  %v11867_v31 = vand.u32 4294901760, %v2173_v50 }
 0x385   :  { %9710 = vmatprep.subr.bf16.mxu1 %v10592_v9 }
 0x386   :  { %v11886_v23 = vsub.f32 %v2173_v50, %v11867_v31 }
 0x388   :  { %9712 = vmatpush3.bf16.msra.mxu1 %v11505_v8  ;;  %v2933_v41 = vand.u32 4294901760, %v11886_v23 }
 0x389   :  { %9713 = vmatprep.subr.bf16.mxu1 %v10592_v9 }
 0x38c   :  { %9715 = vmatpush3.bf16.msra.mxu1 %v11594_v49 }
 0x38d   :  { %9716 = vmatprep.subr.bf16.mxu1 %v10592_v9 }
 0x390   :  { %9718 = vmatpush3.bf16.msra.mxu1 %v11598_v44 }
 0x391   :  { %9719 = vmatprep.subr.bf16.mxu1 %v10592_v9 }
 0x394   :  { %9721 = vmatpush3.bf16.msra.mxu1 %v11610_v35 }
 0x395   :  { %9722 = vmatprep.subr.bf16.mxu1 %v10592_v9 }
 0x398   :  { %9724 = vmatpush3.bf16.msra.mxu1 %v11618_v58 }
 0x399   :  { %9725 = vmatprep.subr.bf16.mxu1 %v10592_v9 }
 0x39c   :  { %9727 = vmatpush3.bf16.msra.mxu1 %v11637_v4 }
 0x39d   :  { %9728 = vmatprep.subr.bf16.mxu1 %v10592_v9 }
 0x3a0   :  { %9730 = vmatpush3.bf16.msra.mxu1 %v11641_v16 }
 0x3a1   :  { %9731 = vmatprep.subr.bf16.mxu1 %v10592_v9 }
 0x3a3   :  { %7937 = vmatmul.mubr.f32.vlgmr.msra.gmra.mrb[6].mxu1 %v2292_v7  ;;  %v2184_v7 = vld [vmem:[#allocation5 + $0x50] sm:$0xff] }
 0x3a4   :  { %9733 = vmatpush3.bf16.msra.mxu1 %v9732_v61  ;;  %7971 = vmatprep.mubr.msk.f32.mxu1 %vm10593_vm0, %v13664_v13  ;;  %v2881_v12 = vand.u32 4294901760, %v2184_v7 }
 0x3a5   :  { %9734 = vmatprep.subr.bf16.mxu1 %v10592_v9 }
 0x3a6   :  { %v11876_v51 = vpack.c.bf16 %v2884_v15, %v2881_v12  ;;  %v11940_v17 = vsub.f32 %v2184_v7, %v2881_v12 }
 0x3a8   :  { %9736 = vmatpush3.bf16.msra.mxu1 %v9735_v27 }
 0x3a9   :  { %9737 = vmatprep.subr.bf16.mxu1 %v10592_v9 }
 0x3ac   :  { %9739 = vmatpush3.bf16.msra.mxu1 %v9738_v57 }
 0x3ad   :  { %9740 = vmatprep.subr.bf16.mxu1 %v10592_v9 }
 0x3b0   :  { %9742 = vmatpush3.bf16.msra.mxu1 %v9741_v36  ;;  %v11898_v36 = vsub.f32 %v2179_v1, %v2866_v34 }
 0x3b1   :  { %9743 = vmatprep.subr.bf16.mxu1 %v10592_v9 }
 0x3b4   :  { %9745 = vmatpush3.bf16.msra.mxu1 %v9744_v5  ;;  %v2893_v5 = vand.u32 4294901760, %v11881_v26 }
 0x3b5   :  { %9746 = vmatprep.subr.bf16.mxu1 %v10592_v9 }
 0x3b8   :  { %9748 = vmatpush3.bf16.msra.mxu1 %v9747_v37 }
 0x3b9   :  { %9749 = vmatprep.subr.bf16.mxu1 %v10592_v9 }
 0x3bc   :  { %9751 = vmatpush3.bf16.msra.mxu1 %v9750_v46 }
 0x3bd   :  { %9752 = vmatprep.subr.bf16.mxu1 %v10592_v9 }
 0x3c0   :  { %9754 = vmatpush3.bf16.msra.mxu1 %v9753_v42  ;;  %v11918_v42 = vpack.c.bf16 %v2896_v63, %v2893_v5 }
 0x3c1   :  { %9755 = vmatprep.subr.bf16.mxu1 %v10592_v9 }
 0x3c3   :  { %7972 = vmatmul.mubr.f32.vlgmr.msra.gmra.mrb[8].mxu1 %v11733_v3 }
 0x3c4   :  { %9757 = vmatpush3.bf16.msra.mxu1 %v11494_v14  ;;  %8006 = vmatprep.mubr.msk.f32.mxu1 %vm10593_vm0, %v13664_v13  ;;  %v2174_v14 = vld [vmem:[#allocation5] sm:$0xff] }
 0x3c5   :  { %9758 = vmatprep.subr.bf16.mxu1 %v10592_v9  ;;  %v2851_v19 = vand.u32 4294901760, %v2174_v14 }
 0x3c8   :  { %9760 = vmatpush3.bf16.msra.mxu1 %v11505_v8  ;;  %v2175_v8 = vld [vmem:[#allocation5 + $0x8] sm:$0xff] }
 0x3c9   :  { %9761 = vmatprep.subr.bf16.mxu1 %v10592_v9 }
 0x3cc   :  { %9763 = vmatpush3.bf16.msra.mxu1 %v11594_v49  ;;  %v2854_v49 = vand.u32 4294901760, %v2175_v8 }
 0x3cd   :  { %9764 = vmatprep.subr.bf16.mxu1 %v10592_v9 }
 0x3ce   :  { %v11837_v28 = vpack.c.bf16 %v2854_v49, %v2851_v19  ;;  %v11857_v22 = vsub.f32 %v2175_v8, %v2854_v49  ;;  %v2979_v8 = vand.u32 4294901760, %v11898_v36  ;;  %v11926_v49 = vsub.f32 %v2182_v24, %v2875_v62 }
 0x3d0   :  { %9766 = vmatpush3.bf16.msra.mxu1 %v11598_v44  ;;  %v2177_v44 = vld [vmem:[#allocation5 + $0x18] sm:$0xff]  ;;  %v2951_v48 = vand.u32 4294901760, %v11857_v22  ;;  %v2980_v1 = vsub.f32 %v11898_v36, %v2979_v8  ;;  %v3000_v24 = vand.u32 4294901760, %v11926_v49 }
 0x3d1   :  { %9767 = vmatprep.subr.bf16.mxu1 %v10592_v9  ;;  %v2860_v11 = vand.u32 4294901760, %v2177_v44 }
 0x3d2   :  { %v2952_v61 = vsub.f32 %v11857_v22, %v2951_v48  ;;  %v3001_v12 = vsub.f32 %v11926_v49, %v3000_v24 }
 0x3d3   :  { %v11871_v47 = vsub.f32 %v2177_v44, %v2860_v11 }
 0x3d4   :  { %9769 = vmatpush3.bf16.msra.mxu1 %v11610_v35  ;;  %v2857_v35 = vand.u32 4294901760, %v2176_v29  ;;  %v2953_v54 = vand.u32 4294901760, %v2952_v61 }
 0x3d5   :  { %9770 = vmatprep.subr.bf16.mxu1 %v10592_v9  ;;  %v2965_v57 = vand.u32 4294901760, %v11871_v47 }
 0x3d6   :  { %v11842_v10 = vpack.c.bf16 %v2860_v11, %v2857_v35  ;;  %v11869_v55 = vsub.f32 %v2176_v29, %v2857_v35  ;;  %v11928_v29 = vsub.f32 %v2183_v32, %v2878_v45  ;;  %v2981_v45 = vand.u32 4294901760, %v2980_v1 }
 0x3d7   :  { %v2966_v39 = vsub.f32 %v11871_v47, %v2965_v57 }
 0x3d8   :  { %9772 = vmatpush3.bf16.msra.mxu1 %v11618_v58  ;;  %v2178_v58 = vld [vmem:[#allocation5 + $0x20] sm:$0xff]  ;;  %v2958_v27 = vand.u32 4294901760, %v11869_v55  ;;  %v3007_v32 = vand.u32 4294901760, %v11928_v29 }
 0x3d9   :  { %9773 = vmatprep.subr.bf16.mxu1 %v10592_v9  ;;  %v2967_v11 = vand.u32 4294901760, %v2966_v39  ;;  %v3002_v39 = vand.u32 4294901760, %v3001_v12 }
 0x3da   :  { %v2959_v46 = vsub.f32 %v11869_v55, %v2958_v27 }
 0x3dc   :  { %9775 = vmatpush3.bf16.msra.mxu1 %v11637_v4  ;;  %v2863_v4 = vand.u32 4294901760, %v2178_v58  ;;  %v2960_v35 = vand.u32 4294901760, %v2959_v46 }
 0x3dd   :  { %9776 = vmatprep.subr.bf16.mxu1 %v10592_v9 }
 0x3de   :  { %v11848_v38 = vpack.c.bf16 %v2866_v34, %v2863_v4  ;;  %v11888_v2 = vsub.f32 %v2178_v58, %v2863_v4  ;;  %v2993_v34 = vand.u32 4294901760, %v11915_v56 }
 0x3e0   :  { %9778 = vmatpush3.bf16.msra.mxu1 %v11641_v16  ;;  %v2180_v16 = vld [vmem:[#allocation5 + $0x30] sm:$0xff]  ;;  %v2994_v7 = vsub.f32 %v11915_v56, %v2993_v34 }
 0x3e1   :  { %9779 = vmatprep.subr.bf16.mxu1 %v10592_v9  ;;  %v2869_v18 = vand.u32 4294901760, %v2180_v16 }
 0x3e3   :  { %8007 = vmatmul.mubr.f32.vlgmr.msra.gmra.mrb[10].mxu1 %v11733_v3  ;;  %v11852_v52 = vpack.c.bf16 %v2872_v40, %v2869_v18  ;;  %v11855_v3 = vsub.f32 %v2174_v14, %v2851_v19  ;;  %v11907_v37 = vsub.f32 %v2180_v16, %v2869_v18  ;;  %v2972_v14 = vand.u32 4294901760, %v11888_v2 }
 0x3e4   :  { %9781 = vmatpush3.bf16.msra.mxu1 %v11837_v28  ;;  %8041 = vmatprep.mubr.msk.f32.mxu1 %vm10593_vm0, %v13664_v13  ;;  %v2934_v19 = vsub.f32 %v11886_v23, %v2933_v41  ;;  %v11942_v18 = vsub.f32 %v2185_v30, %v2884_v15  ;;  %v9807_v40 = vpack.c.bf16 %v2967_v11, %v2960_v35 }
 0x3e5   :  { %9782 = vmatprep.subr.bf16.mxu1 %v10592_v9  ;;  %v2944_v60 = vand.u32 4294901760, %v11855_v3  ;;  %v2973_v58 = vsub.f32 %v11888_v2, %v2972_v14  ;;  %v2986_v4 = vand.u32 4294901760, %v11907_v37  ;;  %v11956_v30 = vsub.f32 %v11863_v21, %v2887_v25 }
 0x3e6   :  { %v2935_v16 = vand.u32 4294901760, %v2934_v19  ;;  %v3008_v15 = vsub.f32 %v11928_v29, %v3007_v32  ;;  %v3021_v61 = vand.u32 4294901760, %v11942_v18  ;;  %v2995_v21 = vand.u32 4294901760, %v2994_v7 }
 0x3e7   :  { %v2945_v20 = vsub.f32 %v11855_v3, %v2944_v60  ;;  %v2974_v62 = vand.u32 4294901760, %v2973_v58  ;;  %v2987_v50 = vsub.f32 %v11907_v37, %v2986_v4  ;;  %v11971_v25 = vsub.f32 %v11881_v26, %v2893_v5 }
 0x3e8   :  { %9784 = vmatpush3.bf16.msra.mxu1 %v11842_v10  ;;  %v3009_v19 = vand.u32 4294901760, %v3008_v15  ;;  %v3028_v11 = vand.u32 4294901760, %v11956_v30 }
 0x3e9   :  { %9785 = vmatprep.subr.bf16.mxu1 %v10592_v9  ;;  %v2946_v33 = vand.u32 4294901760, %v2945_v20  ;;  %v3014_v20 = vand.u32 4294901760, %v11940_v17  ;;  %v2988_v46 = vand.u32 4294901760, %v2987_v50 }
 0x3ea   :  { %v9816_v5 = vpack.c.bf16 %v3009_v19, %v3002_v39 }
 0x3eb   :  { %v9804_v44 = vpack.c.bf16 %v2953_v54, %v2946_v33  ;;  %v11967_v33 = vsub.f32 %v11865_v53, %v2890_v59  ;;  %v9810_v54 = vpack.c.bf16 %v2981_v45, %v2974_v62  ;;  %v3022_v53 = vsub.f32 %v11942_v18, %v3021_v61 }
 0x3ec   :  { %9787 = vmatpush3.bf16.msra.mxu1 %v11848_v38  ;;  %v11980_v59 = vsub.f32 %v11883_v43, %v2896_v63  ;;  %v9813_v35 = vpack.c.bf16 %v2995_v21, %v2988_v46  ;;  %v3042_v63 = vand.u32 4294901760, %v11971_v25 }
 0x3ed   :  { %9788 = vmatprep.subr.bf16.mxu1 %v10592_v9  ;;  %v3035_v26 = vand.u32 4294901760, %v11967_v33  ;;  %v3023_v1 = vand.u32 4294901760, %v3022_v53  ;;  %v9831_v53 = vpack.c.bf16 %v11871_v47, %v11869_v55  ;;  %v9888_v55 = vpack.c.bf16 %v3007_v32, %v3000_v24  ;;  %v3503_v32 = vld [vmem:[#allocation5 + $0x148] sm:$0xff] }
 0x3ee   :  { %v3043_v7 = vsub.f32 %v11971_v25, %v3042_v63  ;;  %v9891_v47 = vpack.c.bf16 %v3021_v61, %v3014_v20  ;;  %v3538_v61 = vand.u32 4294901760, %v3503_v32 }
 0x3ef   :  { %v3036_v43 = vsub.f32 %v11967_v33, %v3035_v26 }
 0x3f0   :  { %9790 = vmatpush3.bf16.msra.mxu1 %v11852_v52  ;;  %v3044_v21 = vand.u32 4294901760, %v3043_v7 }
 0x3f1   :  { %9791 = vmatprep.subr.bf16.mxu1 %v10592_v9  ;;  %v3037_v50 = vand.u32 4294901760, %v3036_v43 }
 0x3f4   :  { %9793 = vmatpush3.bf16.msra.mxu1 %v11860_v0 }
 0x3f5   :  { %9794 = vmatprep.subr.bf16.mxu1 %v10592_v9 }
 0x3f8   :  { %9796 = vmatpush3.bf16.msra.mxu1 %v11876_v51 }
 0x3f9   :  { %9797 = vmatprep.subr.bf16.mxu1 %v10592_v9 }
 0x3fc   :  { %9799 = vmatpush3.bf16.msra.mxu1 %v11901_v6 }
 0x3fd   :  { %9800 = vmatprep.subr.bf16.mxu1 %v10592_v9 }
 0x400   :  { %9802 = vmatpush3.bf16.msra.mxu1 %v11918_v42 }
 0x401   :  { %9803 = vmatprep.subr.bf16.mxu1 %v10592_v9 }
 0x403   :  { %8042 = vmatmul.mubr.f32.vlgmr.msra.gmra.mrb[12].mxu1 %v2935_v16  ;;  %v3029_v16 = vsub.f32 %v11956_v30, %v3028_v11 }
 0x404   :  { %9805 = vmatpush3.bf16.msra.mxu1 %v9804_v44  ;;  %8076 = vmatprep.mubr.msk.f32.mxu1 %vm10593_vm0, %v13664_v13  ;;  %v3015_v44 = vsub.f32 %v11940_v17, %v3014_v20 }
 0x405   :  { %9806 = vmatprep.subr.bf16.mxu1 %v10592_v9  ;;  %v3030_v45 = vand.u32 4294901760, %v3029_v16 }
 0x406   :  { %v3016_v58 = vand.u32 4294901760, %v3015_v44  ;;  %v9828_v44 = vpack.c.bf16 %v11857_v22, %v11855_v3  ;;  %v9882_v3 = vpack.c.bf16 %v2979_v8, %v2972_v14  ;;  %v9885_v22 = vpack.c.bf16 %v2993_v34, %v2986_v4  ;;  %v3501_v34 = vld [vmem:[#allocation5 + $0x138] sm:$0xff] }
 0x407   :  { %v9822_v46 = vpack.c.bf16 %v3037_v50, %v3030_v45  ;;  %v9846_v45 = vpack.c.bf16 %v11967_v33, %v11956_v30  ;;  %v9849_v50 = vpack.c.bf16 %v11980_v59, %v11971_v25  ;;  %v3532_v24 = vand.u32 4294901760, %v3501_v34  ;;  %v12132_v33 = vld [vmem:[#allocation5 + $0x150] sm:$0xff]  ;;  %v12134_v25 = vld [vmem:[#allocation5 + $0x158] sm:$0xff] }
 0x408   :  { %9808 = vmatpush3.bf16.msra.mxu1 %v9807_v40  ;;  %v3049_v40 = vand.u32 4294901760, %v11980_v59  ;;  %v9819_v62 = vpack.c.bf16 %v3023_v1, %v3016_v58  ;;  %v9840_v58 = vpack.c.bf16 %v11928_v29, %v11926_v49  ;;  %v9843_v1 = vpack.c.bf16 %v11942_v18, %v11940_v17  ;;  %v3499_v49 = vld [vmem:[#allocation5 + $0x128] sm:$0xff] }
 0x409   :  { %9809 = vmatprep.subr.bf16.mxu1 %v10592_v9  ;;  %v3526_v4 = vand.u32 4294901760, %v3499_v49 }
 0x40a   :  { %v3050_v12 = vsub.f32 %v11980_v59, %v3049_v40 }
 0x40c   :  { %9811 = vmatpush3.bf16.msra.mxu1 %v9810_v54  ;;  %v3051_v39 = vand.u32 4294901760, %v3050_v12 }
 0x40d   :  { %9812 = vmatprep.subr.bf16.mxu1 %v10592_v9 }
 0x40e   :  { %v9825_v19 = vpack.c.bf16 %v3051_v39, %v3044_v21  ;;  %v3544_v21 = vand.u32 4294901760, %v12134_v25  ;;  %v12146_v39 = vld [vmem:[#allocation5 + $0x160] sm:$0xff] }
 0x410   :  { %9814 = vmatpush3.bf16.msra.mxu1 %v9813_v35  ;;  %v9834_v35 = vpack.c.bf16 %v11898_v36, %v11888_v2  ;;  %v9894_v2 = vpack.c.bf16 %v3035_v26, %v3028_v11  ;;  %v3492_v11 = vld [vmem:[#allocation3 + $0x2] ss:$2 sm:$0xff] }
 0x411   :  { %9815 = vmatprep.subr.bf16.mxu1 %v10592_v9 }
 0x414   :  { %9817 = vmatpush3.bf16.msra.mxu1 %v9816_v5  ;;  %v9837_v5 = vpack.c.bf16 %v11915_v56, %v11907_v37  ;;  %v3496_v37 = vld [vmem:[#allocation5 + $0x110] sm:$0xff] }
 0x415   :  { %9818 = vmatprep.subr.bf16.mxu1 %v10592_v9  ;;  %v3517_v14 = vand.u32 4294901760, %v3496_v37 }
 0x416   :  { %v2296_v15 = vpop.f32.mrb[0].mxu1 }
 0x417   :  { %v7833_v54 = vpop.f32.mrb[1].mxu1 }
 0x418   :  { %9820 = vmatpush3.bf16.msra.mxu1 %v9819_v62  ;;  %v9876_v54 = vpack.c.bf16 %v2951_v48, %v2944_v60 }
 0x419   :  { %9821 = vmatprep.subr.bf16.mxu1 %v10592_v9 }
 0x41c   :  { %9823 = vmatpush3.bf16.msra.mxu1 %v9822_v46  ;;  %v9879_v46 = vpack.c.bf16 %v2965_v57, %v2958_v27  ;;  %v9897_v27 = vpack.c.bf16 %v3049_v40, %v3042_v63  ;;  %v3541_v40 = vand.u32 4294901760, %v12132_v33 }
 0x41d   :  { %9824 = vmatprep.subr.bf16.mxu1 %v10592_v9 }
 0x420   :  { %9826 = vmatpush3.bf16.msra.mxu1 %v9825_v19  ;;  %v12148_v19 = vld [vmem:[#allocation5 + $0x168] sm:$0xff] }
 0x421   :  { %9827 = vmatprep.subr.bf16.mxu1 %v10592_v9 }
 0x423   :  { %8077 = vmatmul.mubr.f32.vlgmr.msra.gmra.mrb[14].mxu1 %v11867_v31 }
 0x424   :  { %9829 = vmatpush3.bf16.msra.mxu1 %v9828_v44  ;;  %8111 = vmatprep.mubr.msk.f32.mxu1 %vm10593_vm0, %v13664_v13  ;;  %v12150_v44 = vand.u32 4294901760, %v3492_v11 }
 0x425   :  { %9830 = vmatprep.subr.bf16.mxu1 %v10592_v9 }
 0x428   :  { %9832 = vmatpush3.bf16.msra.mxu1 %v9831_v53 }
 0x429   :  { %9833 = vmatprep.subr.bf16.mxu1 %v10592_v9 }
 0x42c   :  { %9835 = vmatpush3.bf16.msra.mxu1 %v9834_v35  ;;  %v12153_v35 = vsub.f32 %v3496_v37, %v3517_v14 }
 0x42d   :  { %9836 = vmatprep.subr.bf16.mxu1 %v10592_v9 }
 0x430   :  { %9838 = vmatpush3.bf16.msra.mxu1 %v9837_v5 }
 0x431   :  { %9839 = vmatprep.subr.bf16.mxu1 %v10592_v9 }
 0x434   :  { %9841 = vmatpush3.bf16.msra.mxu1 %v9840_v58 }
 0x435   :  { %9842 = vmatprep.subr.bf16.mxu1 %v10592_v9 }
 0x436   :  { %v2447_v16 = vpop.f32.mrb[2].mxu1 }
 0x437   :  { %v2448_v43 = vadd.f32 %v2447_v16, %v2296_v15  ;;  %v7868_v62 = vpop.f32.mrb[3].mxu1  ;;  %v3547_v16 = vand.u32 4294901760, %v12146_v39 }
 0x438   :  { %9844 = vmatpush3.bf16.msra.mxu1 %v9843_v1  ;;  %v12159_v1 = vpack.c.bf16 %v3544_v21, %v3541_v40  ;;  %v12164_v62 = vld [vmem:[#allocation5 + $0x170] sm:$0xff] }
 0x439   :  { %9845 = vmatprep.subr.bf16.mxu1 %v10592_v9 }
 0x43c   :  { %9847 = vmatpush3.bf16.msra.mxu1 %v9846_v45  ;;  %v12166_v45 = vld [vmem:[#allocation5 + $0x178] sm:$0xff] }
 0x43d   :  { %9848 = vmatprep.subr.bf16.mxu1 %v10592_v9 }
 0x440   :  { %9850 = vmatpush3.bf16.msra.mxu1 %v9849_v50  ;;  %v12169_v50 = vsub.f32 %v3492_v11, %v12150_v44 }
 0x441   :  { %9851 = vmatprep.subr.bf16.mxu1 %v10592_v9 }
 0x443   :  { %8112 = vmatmul.mubr.f32.vlgmr.msra.gmra.mrb[16].mxu1 %v11886_v23 }
 0x444   :  { %9853 = vmatpush3.bf16.msra.mxu1 %v11837_v28  ;;  %8146 = vmatprep.mubr.msk.f32.mxu1 %vm10593_vm0, %v13664_v13 }
 0x445   :  { %9854 = vmatprep.subr.bf16.mxu1 %v10592_v9 }
 0x448   :  { %9856 = vmatpush3.bf16.msra.mxu1 %v11842_v10 }
 0x449   :  { %9857 = vmatprep.subr.bf16.mxu1 %v10592_v9 }
 0x44c   :  { %9859 = vmatpush3.bf16.msra.mxu1 %v11848_v38 }
 0x44d   :  { %9860 = vmatprep.subr.bf16.mxu1 %v10592_v9 }
 0x450   :  { %9862 = vmatpush3.bf16.msra.mxu1 %v11852_v52 }
 0x451   :  { %9863 = vmatprep.subr.bf16.mxu1 %v10592_v9 }
 0x454   :  { %9865 = vmatpush3.bf16.msra.mxu1 %v11860_v0 }
 0x455   :  { %9866 = vmatprep.subr.bf16.mxu1 %v10592_v9 }
 0x456   :  { %v2551_v7 = vpop.f32.mrb[4].mxu1 }
 0x457   :  { %v2552_v12 = vadd.f32 %v2551_v7, %v2448_v43  ;;  %v7903_v15 = vpop.f32.mrb[5].mxu1  ;;  %v3550_v43 = vand.u32 4294901760, %v12148_v19 }
 0x458   :  { %9868 = vmatpush3.bf16.msra.mxu1 %v11876_v51 }
 0x459   :  { %9869 = vmatprep.subr.bf16.mxu1 %v10592_v9 }
 0x45c   :  { %9871 = vmatpush3.bf16.msra.mxu1 %v11901_v6 }
 0x45d   :  { %9872 = vmatprep.subr.bf16.mxu1 %v10592_v9 }
 0x460   :  { %9874 = vmatpush3.bf16.msra.mxu1 %v11918_v42 }
 0x461   :  { %9875 = vmatprep.subr.bf16.mxu1 %v10592_v9 }
 0x463   :  { %8147 = vmatmul.mubr.f32.vlgmr.msra.gmra.mrb[18].mxu1 %v2933_v41 }
 0x464   :  { %9877 = vmatpush3.bf16.msra.mxu1 %v9876_v54  ;;  %8181 = vmatprep.mubr.msk.f32.mxu1 %vm10593_vm0, %v13664_v13 }
 0x465   :  { %9878 = vmatprep.subr.bf16.mxu1 %v10592_v9 }
 0x468   :  { %9880 = vmatpush3.bf16.msra.mxu1 %v9879_v46 }
 0x469   :  { %9881 = vmatprep.subr.bf16.mxu1 %v10592_v9 }
 0x46c   :  { %9883 = vmatpush3.bf16.msra.mxu1 %v9882_v3 }
 0x46d   :  { %9884 = vmatprep.subr.bf16.mxu1 %v10592_v9 }
 0x470   :  { %9886 = vmatpush3.bf16.msra.mxu1 %v9885_v22  ;;  %v3618_v22 = vand.u32 4294901760, %v12153_v35 }
 0x471   :  { %9887 = vmatprep.subr.bf16.mxu1 %v10592_v9 }
 0x474   :  { %9889 = vmatpush3.bf16.msra.mxu1 %v9888_v55 }
 0x475   :  { %9890 = vmatprep.subr.bf16.mxu1 %v10592_v9 }
 0x476   :  { %v2640_v60 = vpop.f32.mrb[6].mxu1 }
 0x477   :  { %v2641_v48 = vadd.f32 %v2640_v60, %v2552_v12  ;;  %v7938_v23 = vpop.f32.mrb[7].mxu1  ;;  %v12187_v60 = vpack.c.bf16 %v3550_v43, %v3547_v16 }
 0x478   :  { %9892 = vmatpush3.bf16.msra.mxu1 %v9891_v47  ;;  %v12184_v47 = vsub.f32 %v3499_v49, %v3526_v4  ;;  %v3556_v23 = vand.u32 4294901760, %v12166_v45 }
 0x479   :  { %9893 = vmatprep.subr.bf16.mxu1 %v10592_v9 }
 0x47a   :  { %v3639_v37 = vand.u32 4294901760, %v12184_v47 }
 0x47c   :  { %9895 = vmatpush3.bf16.msra.mxu1 %v9894_v2  ;;  %v3593_v2 = vand.u32 4294901760, %v12169_v50 }
 0x47d   :  { %9896 = vmatprep.subr.bf16.mxu1 %v10592_v9 }
 0x480   :  { %9898 = vmatpush3.bf16.msra.mxu1 %v9897_v27 }
 0x481   :  { %9899 = vmatprep.subr.bf16.mxu1 %v10592_v9 }
 0x483   :  { %8182 = vmatmul.mubr.f32.vlgmr.msra.gmra.mrb[20].mxu1 %v11867_v31 }
 0x484   :  { %9901 = vmatpush3.bf16.msra.mxu1 %v11837_v28  ;;  %8216 = vmatprep.mubr.msk.f32.mxu1 %vm10593_vm0, %v13664_v13 }
 0x485   :  { %9902 = vmatprep.subr.bf16.mxu1 %v10592_v9 }
 0x488   :  { %9904 = vmatpush3.bf16.msra.mxu1 %v11842_v10  ;;  %v3494_v10 = vld [vmem:[#allocation5 + $0x100] sm:$0xff] }
 0x489   :  { %9905 = vmatprep.subr.bf16.mxu1 %v10592_v9  ;;  %v3511_v41 = vand.u32 4294901760, %v3494_v10 }
 0x48b   :  { %v12136_v59 = vsub.f32 %v3494_v10, %v3511_v41 }
 0x48c   :  { %9907 = vmatpush3.bf16.msra.mxu1 %v11848_v38  ;;  %v3495_v38 = vld [vmem:[#allocation5 + $0x108] sm:$0xff] }
 0x48d   :  { %9908 = vmatprep.subr.bf16.mxu1 %v10592_v9  ;;  %v3604_v53 = vand.u32 4294901760, %v12136_v59 }
 0x48f   :  { %v3605_v15 = vsub.f32 %v12136_v59, %v3604_v53 }
 0x490   :  { %9910 = vmatpush3.bf16.msra.mxu1 %v11852_v52  ;;  %v3514_v52 = vand.u32 4294901760, %v3495_v38 }
 0x491   :  { %9911 = vmatprep.subr.bf16.mxu1 %v10592_v9 }
 0x492   :  { %v12114_v56 = vpack.c.bf16 %v3514_v52, %v3511_v41  ;;  %v12138_v26 = vsub.f32 %v3495_v38, %v3514_v52  ;;  %v12201_v38 = vsub.f32 %v3501_v34, %v3532_v24 }
 0x494   :  { %9913 = vmatpush3.bf16.msra.mxu1 %v11860_v0  ;;  %v3497_v0 = vld [vmem:[#allocation5 + $0x118] sm:$0xff]  ;;  %v3611_v58 = vand.u32 4294901760, %v12138_v26 }
 0x495   :  { %9914 = vmatprep.subr.bf16.mxu1 %v10592_v9  ;;  %v3520_v8 = vand.u32 4294901760, %v3497_v0 }
 0x496   :  { %v2759_v28 = vpop.f32.mrb[8].mxu1  ;;  %v3612_v3 = vsub.f32 %v12138_v26, %v3611_v58 }
 0x497   :  { %v12107_v57 = vadd.f32 %v2759_v28, %v2641_v48  ;;  %v7973_v36 = vpop.f32.mrb[9].mxu1  ;;  %v12155_v5 = vsub.f32 %v3497_v0, %v3520_v8  ;;  %v3553_v48 = vand.u32 4294901760, %v12164_v62  ;;  %v3606_v28 = vand.u32 4294901760, %v3605_v15 }
 0x498   :  { %9916 = vmatpush3.bf16.msra.mxu1 %v11876_v51  ;;  %v3498_v51 = vld [vmem:[#allocation5 + $0x120] sm:$0xff]  ;;  %v3619_v36 = vsub.f32 %v12153_v35, %v3618_v22  ;;  %v3594_v0 = vsub.f32 %v12169_v50, %v3593_v2 }
 0x499   :  { %9917 = vmatprep.subr.bf16.mxu1 %v10592_v9  ;;  %v3523_v29 = vand.u32 4294901760, %v3498_v51  ;;  %v3625_v55 = vand.u32 4294901760, %v12155_v5  ;;  %v12204_v41 = vpack.c.bf16 %v3556_v23, %v3553_v48 }
 0x49a   :  { %v3620_v49 = vand.u32 4294901760, %v3619_v36 }
 0x49b   :  { %v12125_v17 = vpack.c.bf16 %v3526_v4, %v3523_v29  ;;  %v12171_v7 = vsub.f32 %v3498_v51, %v3523_v29  ;;  %v3626_v10 = vsub.f32 %v12155_v5, %v3625_v55 }
 0x49c   :  { %9919 = vmatpush3.bf16.msra.mxu1 %v11901_v6  ;;  %v12119_v6 = vpack.c.bf16 %v3520_v8, %v3517_v14  ;;  %v12214_v8 = vsub.f32 %v3503_v32, %v3538_v61  ;;  %v12230_v32 = vsub.f32 %v12134_v25, %v3544_v21  ;;  %v12244_v25 = vsub.f32 %v12146_v39, %v3547_v16 }
 0x49d   :  { %9920 = vmatprep.subr.bf16.mxu1 %v10592_v9  ;;  %v3632_v52 = vand.u32 4294901760, %v12171_v7  ;;  %v3627_v29 = vand.u32 4294901760, %v3626_v10  ;;  %v12259_v16 = vsub.f32 %v12164_v62, %v3553_v48 }
 0x49e   :  { %v3667_v11 = vand.u32 4294901760, %v12214_v8 }
 0x49f   :  { %v3633_v4 = vsub.f32 %v12171_v7, %v3632_v52 }
 0x4a0   :  { %9922 = vmatpush3.bf16.msra.mxu1 %v11918_v42  ;;  %v3500_v42 = vld [vmem:[#allocation5 + $0x130] sm:$0xff]  ;;  %v3668_v21 = vsub.f32 %v12214_v8, %v3667_v11 }
 0x4a1   :  { %9923 = vmatprep.subr.bf16.mxu1 %v10592_v9  ;;  %v3529_v18 = vand.u32 4294901760, %v3500_v42 }
 0x4a3   :  { %8217 = vmatmul.mubr.f32.vlgmr.msra.gmra.mrb[22].mxu1 %v11867_v31  ;;  %v3502_v31 = vld [vmem:[#allocation5 + $0x140] sm:$0xff]  ;;  %v12129_v30 = vpack.c.bf16 %v3532_v24, %v3529_v18  ;;  %v12193_v27 = vsub.f32 %v3500_v42, %v3529_v18  ;;  %v3640_v42 = vsub.f32 %v12184_v47, %v3639_v37  ;;  %v3653_v18 = vand.u32 4294901760, %v12201_v38 }
 0x4a4   :  { %9925 = vmatpush3.bf16.msra.mxu1 %v12114_v56  ;;  %8251 = vmatprep.mubr.msk.f32.mxu1 %vm10593_vm0, %v13664_v13  ;;  %v3535_v20 = vand.u32 4294901760, %v3502_v31  ;;  %v3595_v24 = vand.u32 4294901760, %v3594_v0 }
 0x4a5   :  { %9926 = vmatprep.subr.bf16.mxu1 %v10592_v9  ;;  %v3646_v34 = vand.u32 4294901760, %v12193_v27  ;;  %v3641_v15 = vand.u32 4294901760, %v3640_v42 }
 0x4a6   :  { %v12141_v63 = vpack.c.bf16 %v3538_v61, %v3535_v20  ;;  %v12212_v14 = vsub.f32 %v3502_v31, %v3535_v20  ;;  %v12227_v31 = vsub.f32 %v12132_v33, %v3541_v40  ;;  %v9951_v20 = vpack.c.bf16 %v3627_v29, %v3620_v49 }
 0x4a7   :  { %v3654_v33 = vsub.f32 %v12201_v38, %v3653_v18 }
 0x4a8   :  { %9928 = vmatpush3.bf16.msra.mxu1 %v12119_v6  ;;  %v3660_v61 = vand.u32 4294901760, %v12212_v14 }
 0x4a9   :  { %9929 = vmatprep.subr.bf16.mxu1 %v10592_v9  ;;  %v3655_v39 = vand.u32 4294901760, %v3654_v33 }
 0x4aa   :  { %v3661_v40 = vsub.f32 %v12212_v14, %v3660_v61 }
 0x4ac   :  { %9931 = vmatpush3.bf16.msra.mxu1 %v12125_v17  ;;  %v3662_v0 = vand.u32 4294901760, %v3661_v40 }
 0x4ad   :  { %9932 = vmatprep.subr.bf16.mxu1 %v10592_v9 }
 0x4b0   :  { %9934 = vmatpush3.bf16.msra.mxu1 %v12129_v30 }
 0x4b1   :  { %9935 = vmatprep.subr.bf16.mxu1 %v10592_v9 }
 0x4b4   :  { %9937 = vmatpush3.bf16.msra.mxu1 %v12141_v63 }
 0x4b5   :  { %9938 = vmatprep.subr.bf16.mxu1 %v10592_v9 }
 0x4b6   :  { %v2846_v12 = vpop.f32.mrb[10].mxu1 }
 0x4b7   :  { %v12177_v54 = vadd.f32 %v2846_v12, %v12107_v57  ;;  %v8008_v46 = vpop.f32.mrb[11].mxu1  ;;  %v3613_v57 = vand.u32 4294901760, %v3612_v3  ;;  %v3634_v12 = vand.u32 4294901760, %v3633_v4  ;;  %v3674_v3 = vand.u32 4294901760, %v12227_v31 }
 0x4b8   :  { %9940 = vmatpush3.bf16.msra.mxu1 %v12159_v1  ;;  %v3647_v46 = vsub.f32 %v12193_v27, %v3646_v34  ;;  %v3688_v4 = vand.u32 4294901760, %v12244_v25 }
 0x4b9   :  { %9941 = vmatprep.subr.bf16.mxu1 %v10592_v9  ;;  %v9948_v51 = vpack.c.bf16 %v3613_v57, %v3606_v28  ;;  %v3681_v28 = vand.u32 4294901760, %v12230_v32  ;;  %v12255_v57 = vsub.f32 %v12148_v19, %v3550_v43  ;;  %v9954_v36 = vpack.c.bf16 %v3641_v15, %v3634_v12 }
 0x4ba   :  { %v3648_v10 = vand.u32 4294901760, %v3647_v46  ;;  %v3675_v49 = vsub.f32 %v12227_v31, %v3674_v3  ;;  %v12268_v43 = vsub.f32 %v12166_v45, %v3556_v23  ;;  %v3702_v23 = vand.u32 4294901760, %v12259_v16 }
 0x4bb   :  { %v3682_v19 = vsub.f32 %v12230_v32, %v3681_v28  ;;  %v3695_v62 = vand.u32 4294901760, %v12255_v57 }
 0x4bc   :  { %9943 = vmatpush3.bf16.msra.mxu1 %v12187_v60  ;;  %v9957_v29 = vpack.c.bf16 %v3655_v39, %v3648_v10  ;;  %v3676_v42 = vand.u32 4294901760, %v3675_v49  ;;  %v3709_v12 = vand.u32 4294901760, %v12268_v43  ;;  %v3703_v40 = vsub.f32 %v12259_v16, %v3702_v23 }
 0x4bd   :  { %9944 = vmatprep.subr.bf16.mxu1 %v10592_v9  ;;  %v3696_v45 = vsub.f32 %v12255_v57, %v3695_v62 }
 0x4bf   :  { %v3697_v33 = vand.u32 4294901760, %v3696_v45 }
 0x4c0   :  { %9946 = vmatpush3.bf16.msra.mxu1 %v12204_v41 }
 0x4c1   :  { %9947 = vmatprep.subr.bf16.mxu1 %v10592_v9 }
 0x4c3   :  { %8252 = vmatmul.mubr.f32.vlgmr.msra.gmra.mrb[24].mxu1 %v3595_v24  ;;  %v3683_v24 = vand.u32 4294901760, %v3682_v19 }
 0x4c4   :  { %9949 = vmatpush3.bf16.msra.mxu1 %v9948_v51  ;;  %8286 = vmatprep.mubr.msk.f32.mxu1 %vm10593_vm0, %v13664_v13  ;;  %v3669_v51 = vand.u32 4294901760, %v3668_v21  ;;  %v3710_v21 = vsub.f32 %v12268_v43, %v3709_v12 }
 0x4c5   :  { %9950 = vmatprep.subr.bf16.mxu1 %v10592_v9  ;;  %v9963_v15 = vpack.c.bf16 %v3683_v24, %v3676_v42  ;;  %v9981_v42 = vpack.c.bf16 %v12201_v38, %v12193_v27  ;;  %v9984_v24 = vpack.c.bf16 %v12214_v8, %v12212_v14  ;;  %v12430_v8 = vld [vmem:[%s13638_s3 + $0xa0] sm:$0xff] }
 0x4c6   :  { %v9960_v48 = vpack.c.bf16 %v3669_v51, %v3662_v0  ;;  %v3704_v51 = vand.u32 4294901760, %v3703_v40  ;;  %v3711_v49 = vand.u32 4294901760, %v3710_v21  ;;  %v9993_v40 = vpack.c.bf16 %v12268_v43, %v12259_v16 }
 0x4c8   :  { %9952 = vmatpush3.bf16.msra.mxu1 %v9951_v20  ;;  %v3689_v20 = vsub.f32 %v12244_v25, %v3688_v4  ;;  %v9969_v19 = vpack.c.bf16 %v3711_v49, %v3704_v51 }
 0x4c9   :  { %9953 = vmatprep.subr.bf16.mxu1 %v10592_v9 }
 0x4ca   :  { %v3690_v46 = vand.u32 4294901760, %v3689_v20  ;;  %v9987_v20 = vpack.c.bf16 %v12230_v32, %v12227_v31  ;;  %v12435_v31 = vld [vmem:[%s13638_s3 + $0xa8] sm:$0xff]  ;;  %v4212_v32 = vand.u32 4294901760, %v12430_v8 }
 0x4cc   :  { %9955 = vmatpush3.bf16.msra.mxu1 %v9954_v36  ;;  %v9966_v0 = vpack.c.bf16 %v3697_v33, %v3690_v46  ;;  %v9990_v33 = vpack.c.bf16 %v12255_v57, %v12244_v25 }
 0x4cd   :  { %9956 = vmatprep.subr.bf16.mxu1 %v10592_v9 }
 0x4d0   :  { %9958 = vmatpush3.bf16.msra.mxu1 %v9957_v29  ;;  %v9972_v29 = vpack.c.bf16 %v12138_v26, %v12136_v59  ;;  %v10026_v59 = vpack.c.bf16 %v3639_v37, %v3632_v52  ;;  %v10029_v26 = vpack.c.bf16 %v3653_v18, %v3646_v34  ;;  %v6202_v52 = vld [vmem:[%s13638_s3 + $0x90] sm:$0xff]  ;;  %v6203_v37 = vld [vmem:[%s13638_s3 + $0x98] sm:$0xff] }
 0x4d1   :  { %9959 = vmatprep.subr.bf16.mxu1 %v10592_v9  ;;  %v4206_v34 = vand.u32 4294901760, %v6202_v52  ;;  %v4209_v18 = vand.u32 4294901760, %v6203_v37 }
 0x4d3   :  { %v12453_v16 = vsub.f32 %v6202_v52, %v4206_v34  ;;  %v12455_v43 = vsub.f32 %v6203_v37, %v4209_v18 }
 0x4d4   :  { %9961 = vmatpush3.bf16.msra.mxu1 %v9960_v48  ;;  %v9978_v48 = vpack.c.bf16 %v12184_v47, %v12171_v7  ;;  %v10038_v7 = vpack.c.bf16 %v3695_v62, %v3688_v4  ;;  %v12460_v4 = vsub.f32 %v12430_v8, %v4212_v32  ;;  %v12463_v62 = vpack.c.bf16 %v4209_v18, %v4206_v34  ;;  %v6214_v8 = vld [vmem:[%s13638_s3 + $0xf0] sm:$0xff] }
 0x4d5   :  { %9962 = vmatprep.subr.bf16.mxu1 %v10592_v9 }
 0x4d6   :  { %v2937_v36 = vpop.f32.mrb[12].mxu1 }
 0x4d7   :  { %v2938_v10 = vadd.f32 %v2937_v36, %v12177_v54  ;;  %v8043_v39 = vpop.f32.mrb[13].mxu1  ;;  %v9975_v54 = vpack.c.bf16 %v12155_v5, %v12153_v35  ;;  %v10035_v35 = vpack.c.bf16 %v3681_v28, %v3674_v3  ;;  %v4215_v28 = vand.u32 4294901760, %v12435_v31 }
 0x4d8   :  { %9964 = vmatpush3.bf16.msra.mxu1 %v9963_v15  ;;  %v10020_v39 = vpack.c.bf16 %v3611_v58, %v3604_v53  ;;  %v10032_v53 = vpack.c.bf16 %v3667_v11, %v3660_v61  ;;  %v12441_v61 = vld [vmem:[%s13638_s3 + $0xb0] sm:$0xff]  ;;  %v12446_v11 = vld [vmem:[%s13638_s3 + $0xb8] sm:$0xff] }
 0x4d9   :  { %9965 = vmatprep.subr.bf16.mxu1 %v10592_v9  ;;  %v4218_v57 = vand.u32 4294901760, %v12441_v61  ;;  %v12474_v51 = vsub.f32 %v12435_v31, %v4215_v28  ;;  %v4221_v49 = vand.u32 4294901760, %v12446_v11  ;;  %v6215_v31 = vld [vmem:[%s13638_s3 + $0xf8] sm:$0xff] }
 0x4dc   :  { %9967 = vmatpush3.bf16.msra.mxu1 %v9966_v0  ;;  %v10023_v0 = vpack.c.bf16 %v3625_v55, %v3618_v22  ;;  %v10041_v22 = vpack.c.bf16 %v3709_v12, %v3702_v23 }
 0x4dd   :  { %9968 = vmatprep.subr.bf16.mxu1 %v10592_v9 }
 0x4e0   :  { %9970 = vmatpush3.bf16.msra.mxu1 %v9969_v19  ;;  %v4307_v19 = vand.u32 4294901760, %v12453_v16 }
 0x4e1   :  { %9971 = vmatprep.subr.bf16.mxu1 %v10592_v9 }
 0x4e3   :  { %8287 = vmatmul.mubr.f32.vlgmr.msra.gmra.mrb[26].mxu1 %v12150_v44 }
 0x4e4   :  { %9973 = vmatpush3.bf16.msra.mxu1 %v9972_v29  ;;  %8321 = vmatprep.mubr.msk.f32.mxu1 %vm10593_vm0, %v13664_v13  ;;  %v4314_v29 = vand.u32 4294901760, %v12455_v43 }
 0x4e5   :  { %9974 = vmatprep.subr.bf16.mxu1 %v10592_v9 }
 0x4e8   :  { %9976 = vmatpush3.bf16.msra.mxu1 %v9975_v54  ;;  %v4321_v54 = vand.u32 4294901760, %v12460_v4 }
 0x4e9   :  { %9977 = vmatprep.subr.bf16.mxu1 %v10592_v9 }
 0x4ec   :  { %9979 = vmatpush3.bf16.msra.mxu1 %v9978_v48  ;;  %v12483_v48 = vsub.f32 %v12441_v61, %v4218_v57 }
 0x4ed   :  { %9980 = vmatprep.subr.bf16.mxu1 %v10592_v9 }
 0x4f0   :  { %9982 = vmatpush3.bf16.msra.mxu1 %v9981_v42 }
 0x4f1   :  { %9983 = vmatprep.subr.bf16.mxu1 %v10592_v9 }
 0x4f4   :  { %9985 = vmatpush3.bf16.msra.mxu1 %v9984_v24 }
 0x4f5   :  { %9986 = vmatprep.subr.bf16.mxu1 %v10592_v9 }
 0x4f6   :  { %v3088_v45 = vpop.f32.mrb[14].mxu1 }
 0x4f7   :  { %v3089_v15 = vadd.f32 %v3088_v45, %v2938_v10  ;;  %v8078_v46 = vpop.f32.mrb[15].mxu1  ;;  %v12490_v45 = vsub.f32 %v12446_v11, %v4221_v49 }
 0x4f8   :  { %9988 = vmatpush3.bf16.msra.mxu1 %v9987_v20  ;;  %v4328_v20 = vand.u32 4294901760, %v12474_v51  ;;  %v4315_v46 = vsub.f32 %v12455_v43, %v4314_v29 }
 0x4f9   :  { %9989 = vmatprep.subr.bf16.mxu1 %v10592_v9 }
 0x4fc   :  { %9991 = vmatpush3.bf16.msra.mxu1 %v9990_v33  ;;  %v4322_v33 = vsub.f32 %v12460_v4, %v4321_v54 }
 0x4fd   :  { %9992 = vmatprep.subr.bf16.mxu1 %v10592_v9 }
 0x500   :  { %9994 = vmatpush3.bf16.msra.mxu1 %v9993_v40  ;;  %v4335_v40 = vand.u32 4294901760, %v12483_v48 }
 0x501   :  { %9995 = vmatprep.subr.bf16.mxu1 %v10592_v9 }
 0x503   :  { %8322 = vmatmul.mubr.f32.vlgmr.msra.gmra.mrb[28].mxu1 %v12169_v50 }
 0x504   :  { %9997 = vmatpush3.bf16.msra.mxu1 %v12114_v56  ;;  %8356 = vmatprep.mubr.msk.f32.mxu1 %vm10593_vm0, %v13664_v13 }
 0x505   :  { %9998 = vmatprep.subr.bf16.mxu1 %v10592_v9 }
 0x508   :  { %10000 = vmatpush3.bf16.msra.mxu1 %v12119_v6 }
 0x509   :  { %10001 = vmatprep.subr.bf16.mxu1 %v10592_v9 }
 0x50c   :  { %10003 = vmatpush3.bf16.msra.mxu1 %v12125_v17 }
 0x50d   :  { %10004 = vmatprep.subr.bf16.mxu1 %v10592_v9 }
 0x510   :  { %10006 = vmatpush3.bf16.msra.mxu1 %v12129_v30 }
 0x511   :  { %10007 = vmatprep.subr.bf16.mxu1 %v10592_v9 }
 0x514   :  { %10009 = vmatpush3.bf16.msra.mxu1 %v12141_v63 }
 0x515   :  { %10010 = vmatprep.subr.bf16.mxu1 %v10592_v9 }
 0x516   :  { %v3192_v21 = vpop.f32.mrb[16].mxu1 }
 0x517   :  { %v3193_v36 = vadd.f32 %v3192_v21, %v3089_v15  ;;  %v8113_v10 = vpop.f32.mrb[17].mxu1  ;;  %v4308_v15 = vsub.f32 %v12453_v16, %v4307_v19 }
 0x518   :  { %10012 = vmatpush3.bf16.msra.mxu1 %v12159_v1  ;;  %v4342_v10 = vand.u32 4294901760, %v12490_v45 }
 0x519   :  { %10013 = vmatprep.subr.bf16.mxu1 %v10592_v9 }
 0x51c   :  { %10015 = vmatpush3.bf16.msra.mxu1 %v12187_v60 }
 0x51d   :  { %10016 = vmatprep.subr.bf16.mxu1 %v10592_v9 }
 0x520   :  { %10018 = vmatpush3.bf16.msra.mxu1 %v12204_v41 }
 0x521   :  { %10019 = vmatprep.subr.bf16.mxu1 %v10592_v9 }
 0x523   :  { %8357 = vmatmul.mubr.f32.vlgmr.msra.gmra.mrb[30].mxu1 %v3593_v2 }
 0x524   :  { %10021 = vmatpush3.bf16.msra.mxu1 %v10020_v39  ;;  %8391 = vmatprep.mubr.msk.f32.mxu1 %vm10593_vm0, %v13664_v13  ;;  %v4309_v39 = vand.u32 4294901760, %v4308_v15 }
 0x525   :  { %10022 = vmatprep.subr.bf16.mxu1 %v10592_v9 }
 0x528   :  { %10024 = vmatpush3.bf16.msra.mxu1 %v10023_v0  ;;  %v4316_v0 = vand.u32 4294901760, %v4315_v46 }
 0x529   :  { %10025 = vmatprep.subr.bf16.mxu1 %v10592_v9 }
 0x52c   :  { %10027 = vmatpush3.bf16.msra.mxu1 %v10026_v59  ;;  %v4336_v59 = vsub.f32 %v12483_v48, %v4335_v40 }
 0x52d   :  { %10028 = vmatprep.subr.bf16.mxu1 %v10592_v9 }
 0x530   :  { %10030 = vmatpush3.bf16.msra.mxu1 %v10029_v26  ;;  %v4323_v26 = vand.u32 4294901760, %v4322_v33 }
 0x531   :  { %10031 = vmatprep.subr.bf16.mxu1 %v10592_v9 }
 0x534   :  { %10033 = vmatpush3.bf16.msra.mxu1 %v10032_v53 }
 0x535   :  { %10034 = vmatprep.subr.bf16.mxu1 %v10592_v9 }
 0x536   :  { %v3281_v5 = vpop.f32.mrb[18].mxu1 }
 0x537   :  { %v3282_v58 = vadd.f32 %v3281_v5, %v3193_v36  ;;  %v8148_v50 = vpop.f32.mrb[19].mxu1  ;;  %v4329_v36 = vsub.f32 %v12474_v51, %v4328_v20  ;;  %v10095_v5 = vpack.c.bf16 %v4316_v0, %v4309_v39  ;;  %v12575_v0 = vpack.c.bf16 %v4215_v28, %v4212_v32 }
 0x538   :  { %10036 = vmatpush3.bf16.msra.mxu1 %v10035_v35  ;;  %v4343_v35 = vsub.f32 %v12490_v45, %v4342_v10 }
 0x539   :  { %10037 = vmatprep.subr.bf16.mxu1 %v10592_v9  ;;  %v4330_v53 = vand.u32 4294901760, %v4329_v36 }
 0x53a   :  { %v4344_v50 = vand.u32 4294901760, %v4343_v35 }
 0x53c   :  { %10039 = vmatpush3.bf16.msra.mxu1 %v10038_v7  ;;  %v12517_v7 = vld [vmem:[%s13638_s3 + $0xc0] sm:$0xff] }
 0x53d   :  { %10040 = vmatprep.subr.bf16.mxu1 %v10592_v9 }
 0x540   :  { %10042 = vmatpush3.bf16.msra.mxu1 %v10041_v22  ;;  %v12522_v22 = vld [vmem:[%s13638_s3 + $0xc8] sm:$0xff] }
 0x541   :  { %10043 = vmatprep.subr.bf16.mxu1 %v10592_v9 }
 0x543   :  { %8392 = vmatmul.mubr.f32.vlgmr.msra.gmra.mrb[32].mxu1 %v12150_v44 }
 0x544   :  { %10045 = vmatpush3.bf16.msra.mxu1 %v12114_v56  ;;  %8426 = vmatprep.mubr.msk.f32.mxu1 %vm10593_vm0, %v13664_v13 }
 0x545   :  { %10046 = vmatprep.subr.bf16.mxu1 %v10592_v9 }
 0x548   :  { %10048 = vmatpush3.bf16.msra.mxu1 %v12119_v6 }
 0x549   :  { %10049 = vmatprep.subr.bf16.mxu1 %v10592_v9 }
 0x54c   :  { %10051 = vmatpush3.bf16.msra.mxu1 %v12125_v17 }
 0x54d   :  { %10052 = vmatprep.subr.bf16.mxu1 %v10592_v9 }
 0x550   :  { %10054 = vmatpush3.bf16.msra.mxu1 %v12129_v30 }
 0x551   :  { %10055 = vmatprep.subr.bf16.mxu1 %v10592_v9 }
 0x554   :  { %10057 = vmatpush3.bf16.msra.mxu1 %v12141_v63  ;;  %v6200_v63 = vld [vmem:[%s13638_s3 + $0x80] sm:$0xff] }
 0x555   :  { %10058 = vmatprep.subr.bf16.mxu1 %v10592_v9 }
 0x556   :  { %v3400_v56 = vpop.f32.mrb[20].mxu1 }
 0x557   :  { %v3401_v55 = vadd.f32 %v3400_v56, %v3282_v58  ;;  %v8183_v47 = vpop.f32.mrb[21].mxu1  ;;  %v4337_v58 = vand.u32 4294901760, %v4336_v59  ;;  %v10098_v56 = vpack.c.bf16 %v4330_v53, %v4323_v26 }
 0x558   :  { %10060 = vmatpush3.bf16.msra.mxu1 %v12159_v1  ;;  %v6201_v1 = vld [vmem:[%s13638_s3 + $0x88] sm:$0xff]  ;;  %v4227_v47 = vand.u32 4294901760, %v12522_v22 }
 0x559   :  { %10061 = vmatprep.subr.bf16.mxu1 %v10592_v9  ;;  %v4203_v2 = vand.u32 4294901760, %v6201_v1 }
 0x55c   :  { %10063 = vmatpush3.bf16.msra.mxu1 %v12187_v60  ;;  %v4200_v60 = vand.u32 4294901760, %v6200_v63 }
 0x55d   :  { %10064 = vmatprep.subr.bf16.mxu1 %v10592_v9 }
 0x55e   :  { %v12415_v38 = vsub.f32 %v6200_v63, %v4200_v60  ;;  %v12425_v14 = vpack.c.bf16 %v4203_v2, %v4200_v60  ;;  %v10101_v63 = vpack.c.bf16 %v4344_v50, %v4337_v58  ;;  %v12543_v60 = vld [vmem:[%s13638_s3 + $0xd8] sm:$0xff]  ;;  %v4242_v58 = vand.u32 4294901760, %v6214_v8 }
 0x55f   :  { %v4233_v37 = vand.u32 4294901760, %v12543_v60  ;;  %v4245_v50 = vand.u32 4294901760, %v6215_v31 }
 0x560   :  { %10066 = vmatpush3.bf16.msra.mxu1 %v12204_v41  ;;  %v12417_v41 = vsub.f32 %v6201_v1, %v4203_v2  ;;  %v4293_v25 = vand.u32 4294901760, %v12415_v38  ;;  %10069 = vmatpush3.bf16.msra.mxu0 %v12425_v14  ;;  %v12538_v1 = vld [vmem:[%s13638_s3 + $0xd0] sm:$0xff] }
 0x561   :  { %10091 = vmatprep.subr.bf16.mxu1 %v10592_v9  ;;  %10070 = vmatprep.subr.bf16.mxu0 %v10592_v9  ;;  %v4230_v52 = vand.u32 4294901760, %v12538_v1 }
 0x562   :  { %v4300_v3 = vand.u32 4294901760, %v12417_v41  ;;  %v4294_v23 = vsub.f32 %v12415_v38, %v4293_v25 }
 0x563   :  { %8427 = vmatmul.mubr.f32.vlgmr.msra.gmra.mrb[34].mxu1 %v12150_v44 }
 0x564   :  { %8496 = vmatprep.mubr.msk.f32.mxu1 %vm10593_vm0, %v13664_v13  ;;  %v4301_v12 = vsub.f32 %v12417_v41, %v4300_v3  ;;  %v4295_v42 = vand.u32 4294901760, %v4294_v23  ;;  %10072 = vmatpush3.bf16.msra.mxu0 %v12463_v62  ;;  %v12557_v23 = vsub.f32 %v12538_v1, %v4230_v52 }
 0x565   :  { %10073 = vmatprep.subr.bf16.mxu0 %v10592_v9 }
 0x566   :  { %v4302_v24 = vand.u32 4294901760, %v4301_v12  ;;  %v12560_v12 = vsub.f32 %v12543_v60, %v4233_v37  ;;  %v4363_v33 = vand.u32 4294901760, %v12557_v23  ;;  %v12604_v60 = vsub.f32 %v6214_v8, %v4242_v58 }
 0x568   :  { %v10092_v21 = vpack.c.bf16 %v4302_v24, %v4295_v42  ;;  %v6212_v42 = vld [vmem:[%s13638_s3 + $0xe0] sm:$0xff]  ;;  %v6213_v24 = vld [vmem:[%s13638_s3 + $0xe8] sm:$0xff]  ;;  %v4364_v26 = vsub.f32 %v12557_v23, %v4363_v33  ;;  %10075 = vmatpush3.bf16.msra.mxu0 %v12575_v0  ;;  %v13653_v61 = vand.u32 4294901760, %v12604_v60 }
 0x569   :  { %v4236_v36 = vand.u32 4294901760, %v6212_v42  ;;  %v4239_v39 = vand.u32 4294901760, %v6213_v24  ;;  %10076 = vmatprep.subr.bf16.mxu0 %v10592_v9 }
 0x56a   :  { %10093 = vmatpush3.bf16.msra.mxu1 %v10092_v21  ;;  %v4370_v21 = vand.u32 4294901760, %v12560_v12  ;;  %v4365_v32 = vand.u32 4294901760, %v4364_v26  ;;  %v4392_v26 = vsub.f32 %v12604_v60, %v13653_v61 }
 0x56b   :  { %10094 = vmatprep.subr.bf16.mxu1 %v10592_v9  ;;  %v12583_v35 = vsub.f32 %v6212_v42, %v4236_v36 }
 0x56c   :  { %v4371_v53 = vsub.f32 %v12560_v12, %v4370_v21 }
 0x56e   :  { %10096 = vmatpush3.bf16.msra.mxu1 %v10095_v5  ;;  %v12585_v5 = vsub.f32 %v6213_v24, %v4239_v39  ;;  %v4372_v28 = vand.u32 4294901760, %v4371_v53 }
 0x56f   :  { %10097 = vmatprep.subr.bf16.mxu1 %v10592_v9 }
 0x570   :  { %v10107_v1 = vpack.c.bf16 %v4372_v28, %v4365_v32 }
 0x572   :  { %10099 = vmatpush3.bf16.msra.mxu1 %v10098_v56  ;;  %v4384_v56 = vand.u32 4294901760, %v12585_v5 }
 0x573   :  { %10100 = vmatprep.subr.bf16.mxu1 %v10592_v9 }
 0x574   :  { %v4385_v42 = vsub.f32 %v12585_v5, %v4384_v56 }
 0x576   :  { %v3487_v6 = vpop.f32.mrb[22].mxu1  ;;  %10102 = vmatpush3.bf16.msra.mxu1 %v10101_v63  ;;  %v12602_v63 = vpack.c.bf16 %v4221_v49, %v4218_v57  ;;  %v4386_v24 = vand.u32 4294901760, %v4385_v42  ;;  %v10134_v42 = vpack.c.bf16 %v12585_v5, %v12583_v35 }
 0x577   :  { %v12405_v17 = vadd.f32 %v3487_v6, %v3401_v55  ;;  %v8218_v30 = vpop.f32.mrb[23].mxu1  ;;  %v4224_v55 = vand.u32 4294901760, %v12517_v7  ;;  %10103 = vmatprep.subr.bf16.mxu1 %v10592_v9 }
 0x578   :  { %v12533_v30 = vsub.f32 %v12522_v22, %v4227_v47  ;;  %v4377_v22 = vand.u32 4294901760, %v12583_v35  ;;  %10078 = vmatpush3.bf16.msra.mxu0 %v12602_v63 }
 0x579   :  { %v12530_v6 = vsub.f32 %v12517_v7, %v4224_v55  ;;  %10079 = vmatprep.subr.bf16.mxu0 %v10592_v9 }
 0x57b   :  { %v4349_v2 = vand.u32 4294901760, %v12530_v6 }
 0x57d   :  { %v4350_v34 = vsub.f32 %v12530_v6, %v4349_v2 }
 0x57f   :  { %v4351_v15 = vand.u32 4294901760, %v4350_v34  ;;  %v12606_v34 = vsub.f32 %v6215_v31, %v4245_v50  ;;  %v4393_v31 = vand.u32 4294901760, %v4392_v26 }
 0x581   :  { %v13652_v11 = vand.u32 4294901760, %v12606_v34 }
 0x583   :  { %v4399_v53 = vsub.f32 %v12606_v34, %v13652_v11 }
 0x585   :  { %v4400_v32 = vand.u32 4294901760, %v4399_v53 }
 0x587   :  { %v10113_v7 = vpack.c.bf16 %v4400_v32, %v4393_v31 }
 0x596   :  { %v12413_v27 = vpop.f32.mrb[24].mxu1 }
 0x597   :  { %v8253_v44 = vpop.f32.mrb[25].mxu1 }
 0x598   :  { %v4356_v44 = vand.u32 4294901760, %v12533_v30 }
 0x59a   :  { %v4357_v18 = vsub.f32 %v12533_v30, %v4356_v44 }
 0x59c   :  { %v4358_v46 = vand.u32 4294901760, %v4357_v18  ;;  %v4378_v18 = vsub.f32 %v12583_v35, %v4377_v22 }
 0x59e   :  { %v10104_v59 = vpack.c.bf16 %v4358_v46, %v4351_v15  ;;  %v4379_v49 = vand.u32 4294901760, %v4378_v18  ;;  %v10131_v18 = vpack.c.bf16 %v12560_v12, %v12557_v23  ;;  %v12864_v12 = vld [vmem:[%s13638_s3 + $0x50] sm:$0xff] }
 0x5a0   :  { %10105 = vmatpush3.bf16.msra.mxu1 %v10104_v59  ;;  %v12622_v59 = vpack.c.bf16 %v4227_v47, %v4224_v55  ;;  %v10110_v8 = vpack.c.bf16 %v4386_v24, %v4379_v49  ;;  %v12638_v55 = vpack.c.bf16 %v4239_v39, %v4236_v36  ;;  %v12642_v47 = vpack.c.bf16 %v4245_v50, %v4242_v58 }
 0x5a1   :  { %10106 = vmatprep.subr.bf16.mxu1 %v10592_v9  ;;  %v10122_v36 = vpack.c.bf16 %v12474_v51, %v12460_v4  ;;  %v10125_v39 = vpack.c.bf16 %v12490_v45, %v12483_v48  ;;  %v10128_v50 = vpack.c.bf16 %v12533_v30, %v12530_v6  ;;  %v12827_v6 = vld [vmem:[%s13638_s3 + $0x40] sm:$0xff]  ;;  %v12832_v30 = vld [vmem:[%s13638_s3 + $0x48] sm:$0xff] }
 0x5a2   :  { %10081 = vmatpush3.bf16.msra.mxu0 %v12622_v59 }
 0x5a3   :  { %10082 = vmatprep.subr.bf16.mxu0 %v10592_v9 }
 0x5a4   :  { %10108 = vmatpush3.bf16.msra.mxu1 %v10107_v1 }
 0x5a5   :  { %10109 = vmatprep.subr.bf16.mxu1 %v10592_v9 }
 0x5a8   :  { %10111 = vmatpush3.bf16.msra.mxu1 %v10110_v8 }
 0x5a9   :  { %10112 = vmatprep.subr.bf16.mxu1 %v10592_v9 }
 0x5ac   :  { %10114 = vmatpush3.bf16.msra.mxu1 %v10113_v7  ;;  %v6199_v7 = vld [vmem:[%s13640_s5] ss:$0 sm:$0xff] }
 0x5ad   :  { %10139 = vmatprep.subr.bf16.mxu1 %v10592_v9 }
 0x5b6   :  { %v3748_v57 = vpop.f32.mrb[26].mxu1 }
 0x5b7   :  { %v3749_v15 = vadd.f32 %v3748_v57, %v12413_v27  ;;  %v8288_v46 = vpop.f32.mrb[27].mxu1  ;;  %v12633_v27 = vpack.c.bf16 %v4233_v37, %v4230_v52  ;;  %v10116_v52 = vpack.c.bf16 %v12417_v41, %v12415_v38  ;;  %v10119_v37 = vpack.c.bf16 %v12455_v43, %v12453_v16  ;;  %v12735_v16 = vld [vmem:[%s13638_s3 + $0x18] sm:$0xff] }
 0x5b8   :  { %v10137_v57 = vpack.c.bf16 %v12606_v34, %v12604_v60  ;;  %v10167_v38 = vpack.c.bf16 %v4314_v29, %v4307_v19  ;;  %v10170_v43 = vpack.c.bf16 %v4328_v20, %v4321_v54  ;;  %v12751_v19 = vld [vmem:[%s13638_s3 + $0x28] sm:$0xff]  ;;  %v4850_v54 = vand.u32 4294901760, %v12735_v16 }
 0x5b9   :  { %10084 = vmatpush3.bf16.msra.mxu0 %v12633_v27 }
 0x5ba   :  { %10085 = vmatprep.subr.bf16.mxu0 %v10592_v9 }
 0x5bd   :  { %10087 = vmatpush3.bf16.msra.mxu0 %v12638_v55 }
 0x5be   :  { %10088 = vmatprep.subr.bf16.mxu0 %v10592_v9 }
 0x5c1   :  { %10090 = vmatpush3.bf16.msra.mxu0 %v12642_v47 }
 0x5c2   :  { %10115 = vmatprep.subr.bf16.mxu0 %v10592_v9 }
 0x5d6   :  { %v3852_v28 = vpop.f32.mrb[28].mxu1 }
 0x5d7   :  { %v3853_v1 = vadd.f32 %v3852_v28, %v3749_v15  ;;  %v8323_v58 = vpop.f32.mrb[29].mxu1 }
 0x5f6   :  { %v3941_v49 = vpop.f32.mrb[30].mxu1 }
 0x5f7   :  { %v3942_v24 = vadd.f32 %v3941_v49, %v3853_v1  ;;  %v8358_v46 = vpop.f32.mrb[31].mxu1 }
 0x616   :  { %v4060_v26 = vpop.f32.mrb[32].mxu1 }
 0x617   :  { %v4061_v53 = vadd.f32 %v4060_v26, %v3942_v24  ;;  %v8393_v8 = vpop.f32.mrb[33].mxu1 }
 0x636   :  { %v4147_v15 = vpop.f32.mrb[34].mxu1 }
 0x637   :  { %v4148_v31 = vadd.f32 %v4147_v15, %v4061_v53  ;;  %v8428_v32 = vpop.f32.mrb[35].mxu1  ;;  %v10179_v15 = vpack.c.bf16 %v4370_v21, %v4363_v33  ;;  %v12869_v33 = vld [vmem:[%s13638_s3 + $0x58] sm:$0xff] }
 0x638   :  { %v4868_v32 = vand.u32 4294901760, %v12832_v30 }
 0x639   :  { %v4151_v28 = vadd.f32 %v4148_v31, %v12405_v17  ;;  %v4865_v31 = vand.u32 4294901760, %v12827_v6 }
 0x63b   :  { %v4159_v58 = vadd.f32 %v6199_v7, %v4151_v28 }
 0x63d   :  { %v4160_v11 = vmax.f32 %v4159_v58, 0.0 }
 0x63f   :  { %4163 = vst [vmem:[#allocation4 + $0x1] sm:$0xff] %v4160_v11  ;;  %v12666_v61 = vand.u32 4294901760, %v4160_v11 }
 0x641   :  { %v4281_v1 = vsub.f32 %v4160_v11, %v12666_v61  ;;  %8497 = vmatmul.mubr.f32.vlgmr.msra.gmra.mrb[36].mxu1 %v12666_v61  ;;  %v10164_v11 = vpack.c.bf16 %v4300_v3, %v4293_v25  ;;  %v12730_v3 = vld [vmem:[%s13638_s3 + $0x10] sm:$0xff] }
 0x642   :  { %10141 = vmatpush3.bf16.msra.mxu1 %v12425_v14  ;;  %8566 = vmatprep.mubr.msk.f32.mxu1 %vm10593_vm0, %v13664_v13  ;;  %v4847_v29 = vand.u32 4294901760, %v12730_v3 }
 0x643   :  { %10142 = vmatprep.subr.bf16.mxu1 %v10592_v9  ;;  %v4282_v49 = vand.u32 4294901760, %v4281_v1 }
 0x644   :  { %v12790_v45 = vsub.f32 %v12730_v3, %v4847_v29 }
 0x645   :  { %v4283_v24 = vsub.f32 %v4281_v1, %v4282_v49 }
 0x646   :  { %10144 = vmatpush3.bf16.msra.mxu1 %v12463_v62  ;;  %v4948_v26 = vand.u32 4294901760, %v12790_v45 }
 0x647   :  { %10145 = vmatprep.subr.bf16.mxu1 %v10592_v9  ;;  %v4284_v17 = vand.u32 4294901760, %v4283_v24  ;;  %v12884_v24 = vsub.f32 %v12827_v6, %v4865_v31 }
 0x648   :  { %v4949_v58 = vsub.f32 %v12790_v45, %v4948_v26 }
 0x649   :  { %8462 = vmatmul.mubr.f32.vlgmr.msra.gmra.mrb[2].mxu0 %v4284_v17  ;;  %v12889_v17 = vsub.f32 %v12832_v30, %v4868_v32 }
 0x64a   :  { %10117 = vmatpush3.bf16.msra.mxu0 %v10116_v52  ;;  %10147 = vmatpush3.bf16.msra.mxu1 %v12575_v0  ;;  %v12716_v52 = vld [vmem:[%s13638_s3 + $0x8] sm:$0xff] }
 0x64b   :  { %10118 = vmatprep.subr.bf16.mxu0 %v10592_v9  ;;  %10148 = vmatprep.subr.bf16.mxu1 %v10592_v9  ;;  %v4844_v25 = vand.u32 4294901760, %v12716_v52 }
 0x64c   :  { %8531 = vmatprep.mubr.msk.f32.mxu0 %vm10593_vm0, %v13664_v13 }
 0x64d   :  { %v12762_v51 = vsub.f32 %v12716_v52, %v4844_v25 }
 0x64e   :  { %10120 = vmatpush3.bf16.msra.mxu0 %v10119_v37  ;;  %10150 = vmatpush3.bf16.msra.mxu1 %v12602_v63  ;;  %v12777_v37 = vld [vmem:[%s13638_s3 + $0x30] sm:$0xff] }
 0x64f   :  { %10121 = vmatprep.subr.bf16.mxu0 %v10592_v9  ;;  %10151 = vmatprep.subr.bf16.mxu1 %v10592_v9  ;;  %v4941_v48 = vand.u32 4294901760, %v12762_v51 }
 0x651   :  { %v4942_v46 = vsub.f32 %v12762_v51, %v4941_v48 }
 0x652   :  { %10123 = vmatpush3.bf16.msra.mxu0 %v10122_v36  ;;  %10153 = vmatpush3.bf16.msra.mxu1 %v12622_v59  ;;  %v12782_v36 = vld [vmem:[%s13638_s3 + $0x38] sm:$0xff] }
 0x653   :  { %10124 = vmatprep.subr.bf16.mxu0 %v10592_v9  ;;  %10154 = vmatprep.subr.bf16.mxu1 %v10592_v9  ;;  %v4943_v28 = vand.u32 4294901760, %v4942_v46  ;;  %v12903_v46 = vld [vmem:[%s13638_s3 + $0x60] sm:$0xff] }
 0x656   :  { %10126 = vmatpush3.bf16.msra.mxu0 %v10125_v39  ;;  %10156 = vmatpush3.bf16.msra.mxu1 %v12633_v27 }
 0x657   :  { %10127 = vmatprep.subr.bf16.mxu0 %v10592_v9  ;;  %10157 = vmatprep.subr.bf16.mxu1 %v10592_v9 }
 0x65a   :  { %10129 = vmatpush3.bf16.msra.mxu0 %v10128_v50  ;;  %10159 = vmatpush3.bf16.msra.mxu1 %v12638_v55  ;;  %v4859_v50 = vand.u32 4294901760, %v12777_v37 }
 0x65b   :  { %10130 = vmatprep.subr.bf16.mxu0 %v10592_v9  ;;  %10160 = vmatprep.subr.bf16.mxu1 %v10592_v9 }
 0x65e   :  { %10132 = vmatpush3.bf16.msra.mxu0 %v10131_v18  ;;  %10162 = vmatpush3.bf16.msra.mxu1 %v12642_v47  ;;  %v4862_v18 = vand.u32 4294901760, %v12782_v36 }
 0x65f   :  { %10133 = vmatprep.subr.bf16.mxu0 %v10592_v9  ;;  %10187 = vmatprep.subr.bf16.mxu1 %v10592_v9 }
 0x660   :  { %v12846_v8 = vsub.f32 %v12782_v36, %v4862_v18  ;;  %v13044_v36 = vpack.c.bf16 %v4868_v32, %v4865_v31 }
 0x661   :  { %8567 = vmatmul.mubr.f32.vlgmr.msra.gmra.mrb[38].mxu1 %v4282_v49 }
 0x662   :  { %10135 = vmatpush3.bf16.msra.mxu0 %v10134_v42  ;;  %10189 = vmatpush3.bf16.msra.mxu1 %v12425_v14  ;;  %v12711_v14 = vld [vmem:[%s13638_s3] sm:$0xff]  ;;  %v10176_v42 = vpack.c.bf16 %v4356_v44, %v4349_v2  ;;  %v13654_v49 = vand.u32 4294901760, %v12846_v8 }
 0x663   :  { %10136 = vmatprep.subr.bf16.mxu0 %v10592_v9  ;;  %10190 = vmatprep.subr.bf16.mxu1 %v10592_v9  ;;  %v4841_v41 = vand.u32 4294901760, %v12711_v14 }
 0x664   :  { %8636 = vmatprep.mubr.msk.f32.mxu1 %vm10593_vm0, %v13664_v13 }
 0x665   :  { %v12757_v4 = vsub.f32 %v12711_v14, %v4841_v41 }
 0x666   :  { %10138 = vmatpush3.bf16.msra.mxu0 %v10137_v57  ;;  %10192 = vmatpush3.bf16.msra.mxu1 %v12463_v62  ;;  %v12746_v62 = vld [vmem:[%s13638_s3 + $0x20] sm:$0xff] }
 0x667   :  { %10163 = vmatprep.subr.bf16.mxu0 %v10592_v9  ;;  %10193 = vmatprep.subr.bf16.mxu1 %v10592_v9  ;;  %v4853_v20 = vand.u32 4294901760, %v12746_v62  ;;  %v4934_v39 = vand.u32 4294901760, %v12757_v4 }
 0x669   :  { %8532 = vmatmul.mubr.f32.vlgmr.msra.gmra.mrb[4].mxu0 %v4281_v1  ;;  %v4935_v57 = vsub.f32 %v12757_v4, %v4934_v39 }
 0x66a   :  { %10165 = vmatpush3.bf16.msra.mxu0 %v10164_v11  ;;  %10195 = vmatpush3.bf16.msra.mxu1 %v12575_v0  ;;  %v4856_v0 = vand.u32 4294901760, %v12751_v19  ;;  %v4871_v11 = vand.u32 4294901760, %v12864_v12 }
 0x66b   :  { %10166 = vmatprep.subr.bf16.mxu0 %v10592_v9  ;;  %10196 = vmatprep.subr.bf16.mxu1 %v10592_v9  ;;  %v4936_v7 = vand.u32 4294901760, %v4935_v57 }
 0x66c   :  { %8601 = vmatprep.mubr.msk.f32.mxu0 %vm10593_vm0, %v13664_v13 }
 0x66e   :  { %10168 = vmatpush3.bf16.msra.mxu0 %v10167_v38  ;;  %10198 = vmatpush3.bf16.msra.mxu1 %v12602_v63  ;;  %v10173_v63 = vpack.c.bf16 %v4342_v10, %v4335_v40  ;;  %v12795_v40 = vsub.f32 %v12735_v16, %v4850_v54  ;;  %v12802_v10 = vsub.f32 %v12746_v62, %v4853_v20  ;;  %v4874_v38 = vand.u32 4294901760, %v12869_v33 }
 0x66f   :  { %10169 = vmatprep.subr.bf16.mxu0 %v10592_v9  ;;  %10199 = vmatprep.subr.bf16.mxu1 %v10592_v9 }
 0x670   :  { %v4955_v53 = vand.u32 4294901760, %v12795_v40  ;;  %v13657_v2 = vand.u32 4294901760, %v12802_v10  ;;  %v13055_v6 = vpack.c.bf16 %v4874_v38, %v4871_v11 }
 0x672   :  { %10171 = vmatpush3.bf16.msra.mxu0 %v10170_v43  ;;  %10201 = vmatpush3.bf16.msra.mxu1 %v12622_v59  ;;  %v12807_v59 = vsub.f32 %v12751_v19, %v4856_v0  ;;  %v4956_v23 = vsub.f32 %v12795_v40, %v4955_v53  ;;  %v4963_v21 = vsub.f32 %v12802_v10, %v13657_v2  ;;  %v12940_v2 = vld [vmem:[%s13638_s3 + $0x70] sm:$0xff] }
 0x673   :  { %10172 = vmatprep.subr.bf16.mxu0 %v10592_v9  ;;  %10202 = vmatprep.subr.bf16.mxu1 %v10592_v9  ;;  %v10182_v43 = vpack.c.bf16 %v4384_v56, %v4377_v22  ;;  %v4984_v56 = vsub.f32 %v12846_v8, %v13654_v49 }
 0x674   :  { %v13656_v44 = vand.u32 4294901760, %v12807_v59  ;;  %v4957_v57 = vand.u32 4294901760, %v4956_v23  ;;  %v4964_v35 = vand.u32 4294901760, %v4963_v21  ;;  %v13672_v23 = vand.u32 4294901760, %v12604_v60  ;;  %v12945_v60 = vld [vmem:[%s13638_s3 + $0x78] sm:$0xff] }
 0x675   :  { %v13673_v21 = vand.u32 4294901760, %v12606_v34  ;;  %v12951_v34 = vpack.c.bf16 %v4844_v25, %v4841_v41 }
 0x676   :  { %10174 = vmatpush3.bf16.msra.mxu0 %v10173_v63  ;;  %10204 = vmatpush3.bf16.msra.mxu1 %v12633_v27  ;;  %v12841_v27 = vsub.f32 %v12777_v37, %v4859_v50  ;;  %v10236_v63 = vpack.c.bf16 %v4943_v28, %v4936_v7  ;;  %v13658_v7 = vand.u32 4294901760, %v12889_v17  ;;  %v12922_v28 = vsub.f32 %v12864_v12, %v4871_v11  ;;  %v4164_v37 = vld [vmem:[#allocation4] sm:$0xff] }
 0x677   :  { %10175 = vmatprep.subr.bf16.mxu0 %v10592_v9  ;;  %10205 = vmatprep.subr.bf16.mxu1 %v10592_v9  ;;  %v10263_v11 = vpack.c.bf16 %v12795_v40, %v12790_v45  ;;  %v13166_v45 = vld [vmem:[%s13638_s3 + $0x118] sm:$0xff]  ;;  %v13674_v40 = vand.u32 4294901760, %v12802_v10 }
 0x678   :  { %v13655_v1 = vand.u32 4294901760, %v12841_v27  ;;  %v5004_v14 = vand.u32 4294901760, %v12922_v28 }
 0x67a   :  { %10177 = vmatpush3.bf16.msra.mxu0 %v10176_v42  ;;  %10207 = vmatpush3.bf16.msra.mxu1 %v12638_v55  ;;  %v4970_v55 = vsub.f32 %v12807_v59, %v13656_v44  ;;  %v4950_v42 = vand.u32 4294901760, %v4949_v58  ;;  %v4977_v22 = vsub.f32 %v12841_v27, %v13655_v1  ;;  %v12927_v58 = vsub.f32 %v12869_v33, %v4874_v38 }
 0x67b   :  { %10178 = vmatprep.subr.bf16.mxu0 %v10592_v9  ;;  %10208 = vmatprep.subr.bf16.mxu1 %v10592_v9  ;;  %v4877_v1 = vand.u32 4294901760, %v12903_v46  ;;  %v10266_v38 = vpack.c.bf16 %v12807_v59, %v12802_v10 }
 0x67c   :  { %v4971_v5 = vand.u32 4294901760, %v4970_v55  ;;  %v10185_v55 = vpack.c.bf16 %v13673_v21, %v13672_v23  ;;  %v10239_v49 = vpack.c.bf16 %v4957_v57, %v4950_v42  ;;  %v4985_v42 = vand.u32 4294901760, %v4984_v56 }
 0x67d   :  { %v4998_v23 = vsub.f32 %v12889_v17, %v13658_v7  ;;  %v5011_v52 = vand.u32 4294901760, %v12927_v58  ;;  %v12966_v41 = vsub.f32 %v12903_v46, %v4877_v1  ;;  %v10269_v46 = vpack.c.bf16 %v12846_v8, %v12841_v27 }
 0x67e   :  { %10180 = vmatpush3.bf16.msra.mxu0 %v10179_v15  ;;  %10210 = vmatpush3.bf16.msra.mxu1 %v12642_v47  ;;  %v12908_v47 = vld [vmem:[%s13638_s3 + $0x68] sm:$0xff]  ;;  %v4990_v15 = vand.u32 4294901760, %v12884_v24 }
 0x67f   :  { %10181 = vmatprep.subr.bf16.mxu0 %v10592_v9  ;;  %10235 = vmatprep.subr.bf16.mxu1 %v10592_v9  ;;  %v4880_v44 = vand.u32 4294901760, %v12908_v47  ;;  %v4999_v21 = vand.u32 4294901760, %v4998_v23  ;;  %v5012_v7 = vsub.f32 %v12927_v58, %v5011_v52  ;;  %v5018_v3 = vand.u32 4294901760, %v12966_v41 }
 0x680   :  { %v4991_v57 = vsub.f32 %v12884_v24, %v4990_v15 }
 0x681   :  { %8637 = vmatmul.mubr.f32.vlgmr.msra.gmra.mrb[40].mxu1 %v12666_v61  ;;  %v12971_v25 = vsub.f32 %v12908_v47, %v4880_v44  ;;  %v13067_v32 = vpack.c.bf16 %v4880_v44, %v4877_v1  ;;  %v10272_v47 = vpack.c.bf16 %v12889_v17, %v12884_v24  ;;  %v13258_v24 = vld [vmem:[%s13638_s3 + $0x140] sm:$0xff] }
 0x682   :  { %10183 = vmatpush3.bf16.msra.mxu0 %v10182_v43  ;;  %10237 = vmatpush3.bf16.msra.mxu1 %v10236_v63  ;;  %v10242_v43 = vpack.c.bf16 %v4971_v5, %v4964_v35  ;;  %v4978_v63 = vand.u32 4294901760, %v4977_v22  ;;  %v4883_v35 = vand.u32 4294901760, %v12940_v2  ;;  %v4886_v5 = vand.u32 4294901760, %v12945_v60 }
 0x683   :  { %10184 = vmatprep.subr.bf16.mxu0 %v10592_v9  ;;  %10238 = vmatprep.subr.bf16.mxu1 %v10592_v9  ;;  %v4992_v56 = vand.u32 4294901760, %v4991_v57  ;;  %v5025_v16 = vand.u32 4294901760, %v12971_v25  ;;  %v5019_v57 = vsub.f32 %v12966_v41, %v5018_v3 }
 0x684   :  { %8706 = vmatprep.mubr.msk.f32.mxu1 %vm10593_vm0, %v13664_v13  ;;  %v10245_v22 = vpack.c.bf16 %v4985_v42, %v4978_v63  ;;  %v5013_v42 = vand.u32 4294901760, %v5012_v7  ;;  %v13079_v33 = vpack.c.bf16 %v4886_v5, %v4883_v35 }
 0x685   :  { %v5026_v23 = vsub.f32 %v12971_v25, %v5025_v16  ;;  %v5020_v7 = vand.u32 4294901760, %v5019_v57 }
 0x686   :  { %10186 = vmatpush3.bf16.msra.mxu0 %v10185_v55  ;;  %10240 = vmatpush3.bf16.msra.mxu1 %v10239_v49  ;;  %v12981_v49 = vpack.c.bf16 %v4850_v54, %v4847_v29  ;;  %v5005_v55 = vsub.f32 %v12922_v28, %v5004_v14  ;;  %v13001_v29 = vsub.f32 %v12945_v60, %v4886_v5 }
 0x687   :  { %10211 = vmatprep.subr.bf16.mxu0 %v10592_v9  ;;  %10241 = vmatprep.subr.bf16.mxu1 %v10592_v9  ;;  %v13011_v54 = vpack.c.bf16 %v4856_v0, %v4853_v20  ;;  %v13028_v20 = vpack.c.bf16 %v4862_v18, %v4859_v50  ;;  %v10275_v60 = vpack.c.bf16 %v12927_v58, %v12922_v28  ;;  %v13295_v58 = vld [vmem:[%s13638_s3 + $0x150] sm:$0xff] }
 0x688   :  { %v5006_v63 = vand.u32 4294901760, %v5005_v55  ;;  %v5039_v19 = vand.u32 4294901760, %v13001_v29 }
 0x689   :  { %8602 = vmatmul.mubr.f32.vlgmr.msra.gmra.mrb[6].mxu0 %v12666_v61  ;;  %v12996_v61 = vsub.f32 %v12940_v2, %v4883_v35  ;;  %v10260_v2 = vpack.c.bf16 %v12762_v51, %v12757_v4  ;;  %v10278_v35 = vpack.c.bf16 %v12971_v25, %v12966_v41  ;;  %v10311_v4 = vpack.c.bf16 %v4955_v53, %v4948_v26 }
 0x68a   :  { %10213 = vmatpush3.bf16.msra.mxu0 %v12951_v34  ;;  %10243 = vmatpush3.bf16.msra.mxu1 %v10242_v43  ;;  %v10248_v43 = vpack.c.bf16 %v4999_v21, %v4992_v56  ;;  %v10251_v0 = vpack.c.bf16 %v5013_v42, %v5006_v63  ;;  %v5040_v21 = vsub.f32 %v13001_v29, %v5039_v19  ;;  %v13146_v42 = vld [vmem:[%s13638_s3 + $0x108] sm:$0xff]  ;;  %v13675_v26 = vand.u32 4294901760, %v12807_v59 }
 0x68b   :  { %10214 = vmatprep.subr.bf16.mxu0 %v10592_v9  ;;  %10244 = vmatprep.subr.bf16.mxu1 %v10592_v9  ;;  %v5032_v62 = vand.u32 4294901760, %v12996_v61  ;;  %v10281_v5 = vpack.c.bf16 %v13001_v29, %v12996_v61  ;;  %v10308_v63 = vpack.c.bf16 %v4941_v48, %v4934_v39  ;;  %v5503_v39 = vand.u32 4294901760, %v13146_v42  ;;  %v13161_v48 = vld [vmem:[%s13638_s3 + $0x110] sm:$0xff] }
 0x68c   :  { %8671 = vmatprep.mubr.msk.f32.mxu0 %vm10593_vm0, %v13664_v13  ;;  %v5041_v55 = vand.u32 4294901760, %v5040_v21  ;;  %v10314_v53 = vpack.c.bf16 %v13675_v26, %v13674_v40  ;;  %v5506_v57 = vand.u32 4294901760, %v13161_v48  ;;  %v13208_v21 = vld [vmem:[%s13638_s3 + $0x130] sm:$0xff] }
 0x68d   :  { %v5033_v56 = vsub.f32 %v12996_v61, %v5032_v62  ;;  %v13193_v59 = vsub.f32 %v13146_v42, %v5503_v39  ;;  %v13376_v61 = vld [vmem:[%s13638_s3 + $0x178] sm:$0xff] }
 0x68e   :  { %10216 = vmatpush3.bf16.msra.mxu0 %v12981_v49  ;;  %10246 = vmatpush3.bf16.msra.mxu1 %v10245_v22  ;;  %v5027_v22 = vand.u32 4294901760, %v5026_v23  ;;  %v5509_v23 = vand.u32 4294901760, %v13166_v45 }
 0x68f   :  { %10217 = vmatprep.subr.bf16.mxu0 %v10592_v9  ;;  %10247 = vmatprep.subr.bf16.mxu1 %v10592_v9  ;;  %v5034_v18 = vand.u32 4294901760, %v5033_v56 }
 0x690   :  { %v10254_v50 = vpack.c.bf16 %v5027_v22, %v5020_v7  ;;  %v13676_v7 = vand.u32 4294901760, %v12841_v27  ;;  %v13677_v22 = vand.u32 4294901760, %v12846_v8  ;;  %v5600_v27 = vand.u32 4294901760, %v13193_v59 }
 0x691   :  { %v10257_v30 = vpack.c.bf16 %v5041_v55, %v5034_v18  ;;  %v13221_v8 = vsub.f32 %v13161_v48, %v5506_v57  ;;  %v13226_v18 = vsub.f32 %v13166_v45, %v5509_v23 }
 0x692   :  { %10219 = vmatpush3.bf16.msra.mxu0 %v13011_v54  ;;  %10249 = vmatpush3.bf16.msra.mxu1 %v10248_v43  ;;  %v13048_v43 = vand.u32 4294901760, %v4164_v37  ;;  %v10317_v56 = vpack.c.bf16 %v13677_v22, %v13676_v7 }
 0x693   :  { %10220 = vmatprep.subr.bf16.mxu0 %v10592_v9  ;;  %10250 = vmatprep.subr.bf16.mxu1 %v10592_v9 }
 0x694   :  { %v13060_v31 = vsub.f32 %v4164_v37, %v13048_v43  ;;  %v13213_v37 = vld [vmem:[%s13638_s3 + $0x138] sm:$0xff] }
 0x696   :  { %10222 = vmatpush3.bf16.msra.mxu0 %v13028_v20  ;;  %10252 = vmatpush3.bf16.msra.mxu1 %v10251_v0  ;;  %v4923_v12 = vand.u32 4294901760, %v13060_v31 }
 0x697   :  { %10223 = vmatprep.subr.bf16.mxu0 %v10592_v9  ;;  %10253 = vmatprep.subr.bf16.mxu1 %v10592_v9 }
 0x698   :  { %v4924_v44 = vsub.f32 %v13060_v31, %v4923_v12 }
 0x69a   :  { %10225 = vmatpush3.bf16.msra.mxu0 %v13044_v36  ;;  %10255 = vmatpush3.bf16.msra.mxu1 %v10254_v50  ;;  %v4925_v1 = vand.u32 4294901760, %v4924_v44 }
 0x69b   :  { %10226 = vmatprep.subr.bf16.mxu0 %v10592_v9  ;;  %10256 = vmatprep.subr.bf16.mxu1 %v10592_v9 }
 0x69e   :  { %10228 = vmatpush3.bf16.msra.mxu0 %v13055_v6  ;;  %10258 = vmatpush3.bf16.msra.mxu1 %v10257_v30  ;;  %v5518_v30 = vand.u32 4294901760, %v13208_v21 }
 0x69f   :  { %10229 = vmatprep.subr.bf16.mxu0 %v10592_v9  ;;  %10283 = vmatprep.subr.bf16.mxu1 %v10592_v9 }
 0x6a1   :  { %8707 = vmatmul.mubr.f32.vlgmr.msra.gmra.mrb[42].mxu1 %v13048_v43 }
 0x6a2   :  { %10231 = vmatpush3.bf16.msra.mxu0 %v13067_v32  ;;  %10285 = vmatpush3.bf16.msra.mxu1 %v12951_v34 }
 0x6a3   :  { %10232 = vmatprep.subr.bf16.mxu0 %v10592_v9  ;;  %10286 = vmatprep.subr.bf16.mxu1 %v10592_v9 }
 0x6a4   :  { %8776 = vmatprep.mubr.msk.f32.mxu1 %vm10593_vm0, %v13664_v13 }
 0x6a6   :  { %10234 = vmatpush3.bf16.msra.mxu0 %v13079_v33  ;;  %10288 = vmatpush3.bf16.msra.mxu1 %v12981_v49 }
 0x6a7   :  { %10259 = vmatprep.subr.bf16.mxu0 %v10592_v9  ;;  %10289 = vmatprep.subr.bf16.mxu1 %v10592_v9 }
 0x6a9   :  { %8672 = vmatmul.mubr.f32.vlgmr.msra.gmra.mrb[8].mxu0 %v4925_v1  ;;  %v5601_v1 = vsub.f32 %v13193_v59, %v5600_v27 }
 0x6aa   :  { %10261 = vmatpush3.bf16.msra.mxu0 %v10260_v2  ;;  %10291 = vmatpush3.bf16.msra.mxu1 %v13011_v54 }
 0x6ab   :  { %10262 = vmatprep.subr.bf16.mxu0 %v10592_v9  ;;  %10292 = vmatprep.subr.bf16.mxu1 %v10592_v9 }
 0x6ac   :  { %8741 = vmatprep.mubr.msk.f32.mxu0 %vm10593_vm0, %v13664_v13 }
 0x6ae   :  { %10264 = vmatpush3.bf16.msra.mxu0 %v10263_v11  ;;  %10294 = vmatpush3.bf16.msra.mxu1 %v13028_v20  ;;  %v5607_v11 = vand.u32 4294901760, %v13221_v8 }
 0x6af   :  { %10265 = vmatprep.subr.bf16.mxu0 %v10592_v9  ;;  %10295 = vmatprep.subr.bf16.mxu1 %v10592_v9 }
 0x6b0   :  { %v5608_v40 = vsub.f32 %v13221_v8, %v5607_v11 }
 0x6b2   :  { %10267 = vmatpush3.bf16.msra.mxu0 %v10266_v38  ;;  %10297 = vmatpush3.bf16.msra.mxu1 %v13044_v36  ;;  %v5614_v38 = vand.u32 4294901760, %v13226_v18 }
 0x6b3   :  { %10268 = vmatprep.subr.bf16.mxu0 %v10592_v9  ;;  %10298 = vmatprep.subr.bf16.mxu1 %v10592_v9 }
 0x6b4   :  { %v5615_v28 = vsub.f32 %v13226_v18, %v5614_v38 }
 0x6b6   :  { %10270 = vmatpush3.bf16.msra.mxu0 %v10269_v46  ;;  %10300 = vmatpush3.bf16.msra.mxu1 %v13055_v6  ;;  %v13272_v46 = vsub.f32 %v13208_v21, %v5518_v30  ;;  %v5481_v21 = vld [vmem:[#allocation4 + $0x2] sm:$0xff] }
 0x6b7   :  { %10271 = vmatprep.subr.bf16.mxu0 %v10592_v9  ;;  %10301 = vmatprep.subr.bf16.mxu1 %v10592_v9 }
 0x6b8   :  { %v13662_v26 = vand.u32 4294901760, %v13272_v46 }
 0x6ba   :  { %10273 = vmatpush3.bf16.msra.mxu0 %v10272_v47  ;;  %10303 = vmatpush3.bf16.msra.mxu1 %v13067_v32 }
 0x6bb   :  { %10274 = vmatprep.subr.bf16.mxu0 %v10592_v9  ;;  %10304 = vmatprep.subr.bf16.mxu1 %v10592_v9 }
 0x6be   :  { %10276 = vmatpush3.bf16.msra.mxu0 %v10275_v60  ;;  %10306 = vmatpush3.bf16.msra.mxu1 %v13079_v33  ;;  %v10323_v60 = vpack.c.bf16 %v5011_v52, %v5004_v14  ;;  %v13300_v14 = vld [vmem:[%s13638_s3 + $0x158] sm:$0xff] }
 0x6bf   :  { %10277 = vmatprep.subr.bf16.mxu0 %v10592_v9  ;;  %10331 = vmatprep.subr.bf16.mxu1 %v10592_v9 }
 0x6c1   :  { %8777 = vmatmul.mubr.f32.vlgmr.msra.gmra.mrb[44].mxu1 %v4923_v12  ;;  %v13678_v12 = vand.u32 4294901760, %v12889_v17  ;;  %v13263_v17 = vld [vmem:[%s13638_s3 + $0x148] sm:$0xff] }
 0x6c2   :  { %10279 = vmatpush3.bf16.msra.mxu0 %v10278_v35  ;;  %10333 = vmatpush3.bf16.msra.mxu1 %v12951_v34  ;;  %v13141_v34 = vld [vmem:[%s13638_s3 + $0x100] sm:$0xff]  ;;  %v5524_v35 = vand.u32 4294901760, %v13258_v24 }
 0x6c3   :  { %10280 = vmatprep.subr.bf16.mxu0 %v10592_v9  ;;  %10334 = vmatprep.subr.bf16.mxu1 %v10592_v9  ;;  %v5500_v51 = vand.u32 4294901760, %v13141_v34  ;;  %v10320_v44 = vpack.c.bf16 %v13678_v12, %v4990_v15  ;;  %v5533_v12 = vand.u32 4294901760, %v13300_v14 }
 0x6c4   :  { %8846 = vmatprep.mubr.msk.f32.mxu1 %vm10593_vm0, %v13664_v13  ;;  %v13315_v7 = vsub.f32 %v13258_v24, %v5524_v35 }
 0x6c5   :  { %v13188_v10 = vsub.f32 %v13141_v34, %v5500_v51  ;;  %v13382_v29 = vpack.c.bf16 %v5503_v39, %v5500_v51 }
 0x6c6   :  { %10282 = vmatpush3.bf16.msra.mxu0 %v10281_v5  ;;  %10336 = vmatpush3.bf16.msra.mxu1 %v12981_v49  ;;  %v13177_v49 = vld [vmem:[%s13638_s3 + $0x120] sm:$0xff]  ;;  %v5527_v5 = vand.u32 4294901760, %v13263_v17 }
 0x6c7   :  { %10307 = vmatprep.subr.bf16.mxu0 %v10592_v9  ;;  %10337 = vmatprep.subr.bf16.mxu1 %v10592_v9  ;;  %v5593_v50 = vand.u32 4294901760, %v13188_v10 }
 0x6c8   :  { %v13320_v22 = vsub.f32 %v13263_v17, %v5527_v5 }
 0x6c9   :  { %8742 = vmatmul.mubr.f32.vlgmr.msra.gmra.mrb[10].mxu0 %v13060_v31  ;;  %v5521_v31 = vand.u32 4294901760, %v13213_v37  ;;  %v5594_v2 = vsub.f32 %v13188_v10, %v5593_v50 }
 0x6ca   :  { %10309 = vmatpush3.bf16.msra.mxu0 %v10308_v63  ;;  %10339 = vmatpush3.bf16.msra.mxu1 %v13011_v54  ;;  %v13182_v54 = vld [vmem:[%s13638_s3 + $0x128] sm:$0xff] }
 0x6cb   :  { %10310 = vmatprep.subr.bf16.mxu0 %v10592_v9  ;;  %10340 = vmatprep.subr.bf16.mxu1 %v10592_v9  ;;  %v5515_v0 = vand.u32 4294901760, %v13182_v54  ;;  %v13277_v47 = vsub.f32 %v13213_v37, %v5521_v31  ;;  %v5595_v63 = vand.u32 4294901760, %v5594_v2  ;;  %v13475_v37 = vpack.c.bf16 %v5527_v5, %v5524_v35 }
 0x6cc   :  { %8811 = vmatprep.mubr.msk.f32.mxu0 %vm10593_vm0, %v13664_v13 }
 0x6cd   :  { %v13238_v55 = vsub.f32 %v13182_v54, %v5515_v0 }
 0x6ce   :  { %10312 = vmatpush3.bf16.msra.mxu0 %v10311_v4  ;;  %10342 = vmatpush3.bf16.msra.mxu1 %v13028_v20  ;;  %v5512_v20 = vand.u32 4294901760, %v13177_v49  ;;  %v5602_v4 = vand.u32 4294901760, %v5601_v1  ;;  %v5609_v1 = vand.u32 4294901760, %v5608_v40  ;;  %v13358_v40 = vsub.f32 %v13300_v14, %v5533_v12 }
 0x6cf   :  { %10313 = vmatprep.subr.bf16.mxu0 %v10592_v9  ;;  %10343 = vmatprep.subr.bf16.mxu1 %v10592_v9 }
 0x6d0   :  { %v10380_v2 = vpack.c.bf16 %v5602_v4, %v5595_v63  ;;  %v13663_v63 = vand.u32 4294901760, %v13320_v22  ;;  %v5670_v42 = vand.u32 4294901760, %v13358_v40 }
 0x6d2   :  { %10315 = vmatpush3.bf16.msra.mxu0 %v10314_v53  ;;  %10345 = vmatpush3.bf16.msra.mxu1 %v13044_v36  ;;  %v13233_v36 = vsub.f32 %v13177_v49, %v5512_v20  ;;  %v13661_v53 = vand.u32 4294901760, %v13277_v47 }
 0x6d3   :  { %10316 = vmatprep.subr.bf16.mxu0 %v10592_v9  ;;  %10346 = vmatprep.subr.bf16.mxu1 %v10592_v9 }
 0x6d4   :  { %v13660_v15 = vand.u32 4294901760, %v13233_v36 }
 0x6d6   :  { %10318 = vmatpush3.bf16.msra.mxu0 %v10317_v56  ;;  %10348 = vmatpush3.bf16.msra.mxu1 %v13055_v6  ;;  %v13659_v6 = vand.u32 4294901760, %v13238_v55  ;;  %v5622_v52 = vsub.f32 %v13233_v36, %v13660_v15  ;;  %v5530_v56 = vand.u32 4294901760, %v13295_v58  ;;  %v13334_v15 = vld [vmem:[%s13638_s3 + $0x160] sm:$0xff] }
 0x6d7   :  { %10319 = vmatprep.subr.bf16.mxu0 %v10592_v9  ;;  %10349 = vmatprep.subr.bf16.mxu1 %v10592_v9 }
 0x6d8   :  { %v5623_v41 = vand.u32 4294901760, %v5622_v52  ;;  %v13353_v4 = vsub.f32 %v13295_v58, %v5530_v56  ;;  %v13486_v24 = vpack.c.bf16 %v5533_v12, %v5530_v56  ;;  %v10407_v56 = vpack.c.bf16 %v13226_v18, %v13221_v8 }
 0x6d9   :  { %v10410_v12 = vpack.c.bf16 %v13238_v55, %v13233_v36  ;;  %v13682_v8 = vand.u32 4294901760, %v13277_v47 }
 0x6da   :  { %10321 = vmatpush3.bf16.msra.mxu0 %v10320_v44  ;;  %10351 = vmatpush3.bf16.msra.mxu1 %v13067_v32  ;;  %v5629_v32 = vsub.f32 %v13238_v55, %v13659_v6  ;;  %v10326_v44 = vpack.c.bf16 %v5025_v16, %v5018_v3  ;;  %v5616_v6 = vand.u32 4294901760, %v5615_v28  ;;  %v5636_v3 = vsub.f32 %v13272_v46, %v13662_v26  ;;  %v13371_v26 = vld [vmem:[%s13638_s3 + $0x170] sm:$0xff] }
 0x6db   :  { %10322 = vmatprep.subr.bf16.mxu0 %v10592_v9  ;;  %10352 = vmatprep.subr.bf16.mxu1 %v10592_v9  ;;  %v5643_v16 = vsub.f32 %v13277_v47, %v13661_v53  ;;  %v10329_v28 = vpack.c.bf16 %v5039_v19, %v5032_v62  ;;  %v5663_v34 = vand.u32 4294901760, %v13353_v4 }
 0x6dc   :  { %v5630_v25 = vand.u32 4294901760, %v5629_v32  ;;  %v10383_v52 = vpack.c.bf16 %v5616_v6, %v5609_v1  ;;  %v5536_v32 = vand.u32 4294901760, %v13334_v15  ;;  %v5637_v19 = vand.u32 4294901760, %v5636_v3 }
 0x6dd   :  { %v5644_v6 = vand.u32 4294901760, %v5643_v16  ;;  %v5542_v1 = vand.u32 4294901760, %v13371_v26 }
 0x6de   :  { %10324 = vmatpush3.bf16.msra.mxu0 %v10323_v60  ;;  %10354 = vmatpush3.bf16.msra.mxu1 %v13079_v33  ;;  %v13339_v33 = vld [vmem:[%s13638_s3 + $0x168] sm:$0xff]  ;;  %v5649_v60 = vand.u32 4294901760, %v13315_v7  ;;  %v10386_v62 = vpack.c.bf16 %v5630_v25, %v5623_v41  ;;  %v13397_v51 = vsub.f32 %v13334_v15, %v5536_v32  ;;  %v5545_v41 = vand.u32 4294901760, %v13376_v61 }
 0x6df   :  { %10325 = vmatprep.subr.bf16.mxu0 %v10592_v9  ;;  %10379 = vmatprep.subr.bf16.mxu1 %v10592_v9  ;;  %v5539_v53 = vand.u32 4294901760, %v13339_v33  ;;  %v13412_v25 = vpack.c.bf16 %v5509_v23, %v5506_v57  ;;  %v10389_v3 = vpack.c.bf16 %v5644_v6, %v5637_v19  ;;  %v13442_v23 = vpack.c.bf16 %v5515_v0, %v5512_v20 }
 0x6e0   :  { %v5677_v48 = vand.u32 4294901760, %v13397_v51  ;;  %v13432_v57 = vsub.f32 %v13376_v61, %v5545_v41  ;;  %v13459_v20 = vpack.c.bf16 %v5521_v31, %v5518_v30  ;;  %v13510_v15 = vpack.c.bf16 %v5545_v41, %v5542_v1 }
 0x6e1   :  { %8847 = vmatmul.mubr.f32.vlgmr.msra.gmra.mrb[46].mxu1 %v13048_v43  ;;  %v13402_v39 = vsub.f32 %v13339_v33, %v5539_v53  ;;  %v13498_v5 = vpack.c.bf16 %v5539_v53, %v5536_v32  ;;  %v10413_v33 = vpack.c.bf16 %v13277_v47, %v13272_v46  ;;  %v10419_v41 = vpack.c.bf16 %v13358_v40, %v13353_v4 }
 0x6e2   :  { %10327 = vmatpush3.bf16.msra.mxu0 %v10326_v44  ;;  %10381 = vmatpush3.bf16.msra.mxu1 %v10380_v2  ;;  %v5650_v44 = vsub.f32 %v13315_v7, %v5649_v60  ;;  %v5657_v2 = vsub.f32 %v13320_v22, %v13663_v63  ;;  %v5671_v63 = vsub.f32 %v13358_v40, %v5670_v42  ;;  %v5698_v54 = vand.u32 4294901760, %v13432_v57 }
 0x6e3   :  { %10328 = vmatprep.subr.bf16.mxu0 %v10592_v9  ;;  %10382 = vmatprep.subr.bf16.mxu1 %v10592_v9  ;;  %v5684_v45 = vand.u32 4294901760, %v13402_v39 }
 0x6e4   :  { %8916 = vmatprep.mubr.msk.f32.mxu1 %vm10593_vm0, %v13664_v13  ;;  %v5651_v16 = vand.u32 4294901760, %v5650_v44  ;;  %v5672_v6 = vand.u32 4294901760, %v5671_v63  ;;  %v5678_v44 = vsub.f32 %v13397_v51, %v5677_v48 }
 0x6e6   :  { %10330 = vmatpush3.bf16.msra.mxu0 %v10329_v28  ;;  %10384 = vmatpush3.bf16.msra.mxu1 %v10383_v52  ;;  %v5658_v28 = vand.u32 4294901760, %v5657_v2  ;;  %v5664_v52 = vsub.f32 %v13353_v4, %v5663_v34  ;;  %v5685_v2 = vsub.f32 %v13402_v39, %v5684_v45  ;;  %v5679_v63 = vand.u32 4294901760, %v5678_v44 }
 0x6e7   :  { %10355 = vmatprep.subr.bf16.mxu0 %v10592_v9  ;;  %10385 = vmatprep.subr.bf16.mxu1 %v10592_v9 }
 0x6e8   :  { %v5665_v19 = vand.u32 4294901760, %v5664_v52 }
 0x6e9   :  { %8812 = vmatmul.mubr.f32.vlgmr.msra.gmra.mrb[12].mxu0 %v13048_v43  ;;  %v13427_v43 = vsub.f32 %v13371_v26, %v5542_v1  ;;  %v10404_v26 = vpack.c.bf16 %v13193_v59, %v13188_v10  ;;  %v10416_v1 = vpack.c.bf16 %v13320_v22, %v13315_v7  ;;  %v13679_v10 = vand.u32 4294901760, %v13233_v36 }
 0x6ea   :  { %10357 = vmatpush3.bf16.msra.mxu0 %v13382_v29  ;;  %10387 = vmatpush3.bf16.msra.mxu1 %v10386_v62  ;;  %v10392_v62 = vpack.c.bf16 %v5658_v28, %v5651_v16  ;;  %v10395_v0 = vpack.c.bf16 %v5672_v6, %v5665_v19  ;;  %v5699_v28 = vsub.f32 %v13432_v57, %v5698_v54  ;;  %v13680_v59 = vand.u32 4294901760, %v13238_v55 }
 0x6eb   :  { %10358 = vmatprep.subr.bf16.mxu0 %v10592_v9  ;;  %10388 = vmatprep.subr.bf16.mxu1 %v10592_v9  ;;  %v5691_v49 = vand.u32 4294901760, %v13427_v43  ;;  %v13683_v55 = vand.u32 4294901760, %v13320_v22  ;;  %v10470_v22 = vpack.c.bf16 %v5684_v45, %v5677_v48 }
 0x6ec   :  { %8881 = vmatprep.mubr.msk.f32.mxu0 %vm10593_vm0, %v13664_v13  ;;  %v5700_v52 = vand.u32 4294901760, %v5699_v28 }
 0x6ed   :  { %v5692_v16 = vsub.f32 %v13427_v43, %v5691_v49  ;;  %v10473_v4 = vpack.c.bf16 %v5698_v54, %v5691_v49 }
 0x6ee   :  { %10360 = vmatpush3.bf16.msra.mxu0 %v13412_v25  ;;  %10390 = vmatpush3.bf16.msra.mxu1 %v10389_v3  ;;  %v5686_v3 = vand.u32 4294901760, %v5685_v2  ;;  %v10422_v2 = vpack.c.bf16 %v13402_v39, %v13397_v51 }
 0x6ef   :  { %10361 = vmatprep.subr.bf16.mxu0 %v10592_v9  ;;  %10391 = vmatprep.subr.bf16.mxu1 %v10592_v9  ;;  %v5693_v31 = vand.u32 4294901760, %v5692_v16 }
 0x6f0   :  { %v10398_v30 = vpack.c.bf16 %v5686_v3, %v5679_v63  ;;  %v10452_v63 = vpack.c.bf16 %v5600_v27, %v5593_v50  ;;  %v10458_v50 = vpack.c.bf16 %v13680_v59, %v13679_v10  ;;  %v13681_v27 = vand.u32 4294901760, %v13272_v46 }
 0x6f1   :  { %v10401_v17 = vpack.c.bf16 %v5700_v52, %v5693_v31 }
 0x6f2   :  { %10363 = vmatpush3.bf16.msra.mxu0 %v13442_v23  ;;  %10393 = vmatpush3.bf16.msra.mxu1 %v10392_v62  ;;  %v13479_v62 = vand.u32 4294901760, %v5481_v21 }
 0x6f3   :  { %10364 = vmatprep.subr.bf16.mxu0 %v10592_v9  ;;  %10394 = vmatprep.subr.bf16.mxu1 %v10592_v9 }
 0x6f4   :  { %v13491_v35 = vsub.f32 %v5481_v21, %v13479_v62 }
 0x6f6   :  { %10366 = vmatpush3.bf16.msra.mxu0 %v13459_v20  ;;  %10396 = vmatpush3.bf16.msra.mxu1 %v10395_v0  ;;  %v5582_v58 = vand.u32 4294901760, %v13491_v35  ;;  %v10425_v0 = vpack.c.bf16 %v13432_v57, %v13427_v43 }
 0x6f7   :  { %10367 = vmatprep.subr.bf16.mxu0 %v10592_v9  ;;  %10397 = vmatprep.subr.bf16.mxu1 %v10592_v9 }
 0x6f8   :  { %v5583_v14 = vsub.f32 %v13491_v35, %v5582_v58 }
 0x6fa   :  { %10369 = vmatpush3.bf16.msra.mxu0 %v13475_v37  ;;  %10399 = vmatpush3.bf16.msra.mxu1 %v10398_v30  ;;  %v5584_v53 = vand.u32 4294901760, %v5583_v14 }
 0x6fb   :  { %10370 = vmatprep.subr.bf16.mxu0 %v10592_v9  ;;  %10400 = vmatprep.subr.bf16.mxu1 %v10592_v9 }
 0x6fe   :  { %10372 = vmatpush3.bf16.msra.mxu0 %v13486_v24  ;;  %10402 = vmatpush3.bf16.msra.mxu1 %v10401_v17 }
 0x6ff   :  { %10373 = vmatprep.subr.bf16.mxu0 %v10592_v9  ;;  %10427 = vmatprep.subr.bf16.mxu1 %v10592_v9 }
 0x701   :  { %8917 = vmatmul.mubr.f32.vlgmr.msra.gmra.mrb[48].mxu1 %v13479_v62 }
 0x702   :  { %10375 = vmatpush3.bf16.msra.mxu0 %v13498_v5  ;;  %10429 = vmatpush3.bf16.msra.mxu1 %v13382_v29 }
 0x703   :  { %10376 = vmatprep.subr.bf16.mxu0 %v10592_v9  ;;  %10430 = vmatprep.subr.bf16.mxu1 %v10592_v9 }
 0x704   :  { %8986 = vmatprep.mubr.msk.f32.mxu1 %vm10593_vm0, %v13664_v13 }
 0x706   :  { %10378 = vmatpush3.bf16.msra.mxu0 %v13510_v15  ;;  %10432 = vmatpush3.bf16.msra.mxu1 %v13412_v25 }
 0x707   :  { %10403 = vmatprep.subr.bf16.mxu0 %v10592_v9  ;;  %10433 = vmatprep.subr.bf16.mxu1 %v10592_v9 }
 0x709   :  { %8882 = vmatmul.mubr.f32.vlgmr.msra.gmra.mrb[14].mxu0 %v5584_v53 }
 0x70a   :  { %10405 = vmatpush3.bf16.msra.mxu0 %v10404_v26  ;;  %10435 = vmatpush3.bf16.msra.mxu1 %v13442_v23 }
 0x70b   :  { %10406 = vmatprep.subr.bf16.mxu0 %v10592_v9  ;;  %10436 = vmatprep.subr.bf16.mxu1 %v10592_v9 }
 0x70c   :  { %8951 = vmatprep.mubr.msk.f32.mxu0 %vm10593_vm0, %v13664_v13 }
 0x70e   :  { %10408 = vmatpush3.bf16.msra.mxu0 %v10407_v56  ;;  %10438 = vmatpush3.bf16.msra.mxu1 %v13459_v20 }
 0x70f   :  { %10409 = vmatprep.subr.bf16.mxu0 %v10592_v9  ;;  %10439 = vmatprep.subr.bf16.mxu1 %v10592_v9 }
 0x712   :  { %10411 = vmatpush3.bf16.msra.mxu0 %v10410_v12  ;;  %10441 = vmatpush3.bf16.msra.mxu1 %v13475_v37 }
 0x713   :  { %10412 = vmatprep.subr.bf16.mxu0 %v10592_v9  ;;  %10442 = vmatprep.subr.bf16.mxu1 %v10592_v9 }
 0x714   :  { %v4437_v32 = vpop.f32.mrb[36].mxu1 }
 0x715   :  { %v8498_v61 = vpop.f32.mrb[37].mxu1 }
 0x716   :  { %10414 = vmatpush3.bf16.msra.mxu0 %v10413_v33  ;;  %10444 = vmatpush3.bf16.msra.mxu1 %v13486_v24 }
 0x717   :  { %10415 = vmatprep.subr.bf16.mxu0 %v10592_v9  ;;  %10445 = vmatprep.subr.bf16.mxu1 %v10592_v9 }
 0x71a   :  { %10417 = vmatpush3.bf16.msra.mxu0 %v10416_v1  ;;  %10447 = vmatpush3.bf16.msra.mxu1 %v13498_v5 }
 0x71b   :  { %10418 = vmatprep.subr.bf16.mxu0 %v10592_v9  ;;  %10448 = vmatprep.subr.bf16.mxu1 %v10592_v9 }
 0x71c   :  { %v4286_v19 = vpop.f32.mrb[2].mxu0 }
 0x71d   :  { %v4438_v6 = vadd.f32 %v4437_v32, %v4286_v19  ;;  %v8463_v44 = vpop.f32.mrb[3].mxu0 }
 0x71e   :  { %10420 = vmatpush3.bf16.msra.mxu0 %v10419_v41  ;;  %10450 = vmatpush3.bf16.msra.mxu1 %v13510_v15 }
 0x71f   :  { %10421 = vmatprep.subr.bf16.mxu0 %v10592_v9  ;;  %10475 = vmatprep.subr.bf16.mxu1 %v10592_v9 }
 0x721   :  { %8987 = vmatmul.mubr.f32.vlgmr.msra.gmra.mrb[50].mxu1 %v5582_v58 }
 0x722   :  { %10423 = vmatpush3.bf16.msra.mxu0 %v10422_v2  ;;  %10477 = vmatpush3.bf16.msra.mxu1 %v13382_v29  ;;  %v10455_v29 = vpack.c.bf16 %v5614_v38, %v5607_v11  ;;  %v10464_v11 = vpack.c.bf16 %v13683_v55, %v5649_v60  ;;  %v10467_v38 = vpack.c.bf16 %v5670_v42, %v5663_v34 }
 0x723   :  { %10424 = vmatprep.subr.bf16.mxu0 %v10592_v9  ;;  %10478 = vmatprep.subr.bf16.mxu1 %v10592_v9 }
 0x724   :  { %9056 = vmatprep.mubr.msk.f32.mxu1 %vm10593_vm0, %v13664_v13 }
 0x726   :  { %10426 = vmatpush3.bf16.msra.mxu0 %v10425_v0  ;;  %10480 = vmatpush3.bf16.msra.mxu1 %v13412_v25 }
 0x727   :  { %10451 = vmatprep.subr.bf16.mxu0 %v10592_v9  ;;  %10481 = vmatprep.subr.bf16.mxu1 %v10592_v9 }
 0x729   :  { %8952 = vmatmul.mubr.f32.vlgmr.msra.gmra.mrb[16].mxu0 %v13491_v35 }
 0x72a   :  { %10453 = vmatpush3.bf16.msra.mxu0 %v10452_v63  ;;  %10483 = vmatpush3.bf16.msra.mxu1 %v13442_v23 }
 0x72b   :  { %10454 = vmatprep.subr.bf16.mxu0 %v10592_v9  ;;  %10484 = vmatprep.subr.bf16.mxu1 %v10592_v9 }
 0x72c   :  { %9021 = vmatprep.mubr.msk.f32.mxu0 %vm10593_vm0, %v13664_v13  ;;  %v10461_v13 = vpack.c.bf16 %v13682_v8, %v13681_v27 }
 0x72e   :  { %10456 = vmatpush3.bf16.msra.mxu0 %v10455_v29  ;;  %10486 = vmatpush3.bf16.msra.mxu1 %v13459_v20 }
 0x72f   :  { %10457 = vmatprep.subr.bf16.mxu0 %v10592_v9  ;;  %10487 = vmatprep.subr.bf16.mxu1 %v10592_v9 }
 0x732   :  { %10459 = vmatpush3.bf16.msra.mxu0 %v10458_v50  ;;  %10489 = vmatpush3.bf16.msra.mxu1 %v13475_v37 }
 0x733   :  { %10460 = vmatprep.subr.bf16.mxu0 %v10592_v9  ;;  %10490 = vmatprep.subr.bf16.mxu1 %v10592_v9 }
 0x734   :  { %v4630_v18 = vpop.f32.mrb[38].mxu1 }
 0x735   :  { %v8568_v36 = vpop.f32.mrb[39].mxu1 }
 0x736   :  { %10462 = vmatpush3.bf16.msra.mxu0 %v10461_v13  ;;  %10492 = vmatpush3.bf16.msra.mxu1 %v13486_v24 }
 0x737   :  { %10463 = vmatprep.subr.bf16.mxu0 %v10592_v9  ;;  %10493 = vmatprep.subr.bf16.mxu1 %v10592_v9 }
 0x73a   :  { %10465 = vmatpush3.bf16.msra.mxu0 %v10464_v11  ;;  %10495 = vmatpush3.bf16.msra.mxu1 %v13498_v5 }
 0x73b   :  { %10466 = vmatprep.subr.bf16.mxu0 %v10592_v9  ;;  %10496 = vmatprep.subr.bf16.mxu1 %v10592_v9 }
 0x73c   :  { %v4541_v46 = vpop.f32.mrb[4].mxu0 }
 0x73d   :  { %v4542_v47 = vadd.f32 %v4541_v46, %v4438_v6  ;;  %v8533_v7 = vpop.f32.mrb[5].mxu0  ;;  %v6232_v6 = vld [vmem:[%s13641_s6] ss:$0 sm:$0xff] }
 0x73e   :  { %10468 = vmatpush3.bf16.msra.mxu0 %v10467_v38  ;;  %10498 = vmatpush3.bf16.msra.mxu1 %v13510_v15 }
 0x73f   :  { %10469 = vmatprep.subr.bf16.mxu0 %v10592_v9  ;;  %v4631_v60 = vadd.f32 %v4630_v18, %v4542_v47 }
 0x741   :  { %9057 = vmatmul.mubr.f32.vlgmr.msra.gmra.mrb[52].mxu1 %v13479_v62 }
 0x742   :  { %10471 = vmatpush3.bf16.msra.mxu0 %v10470_v22 }
 0x743   :  { %10472 = vmatprep.subr.bf16.mxu0 %v10592_v9 }
 0x746   :  { %10474 = vmatpush3.bf16.msra.mxu0 %v10473_v4 }
 0x749   :  { %9022 = vmatmul.mubr.f32.vlgmr.msra.gmra.mrb[18].mxu0 %v13479_v62 }
 0x754   :  { %v4836_v40 = vpop.f32.mrb[40].mxu1 }
 0x755   :  { %v8638_v34 = vpop.f32.mrb[41].mxu1 }
 0x75c   :  { %v4749_v42 = vpop.f32.mrb[6].mxu0 }
 0x75d   :  { %v4750_v51 = vadd.f32 %v4749_v42, %v4631_v60  ;;  %v8603_v39 = vpop.f32.mrb[7].mxu0 }
 0x75f   :  { %v4837_v25 = vadd.f32 %v4836_v40, %v4750_v51 }
 0x774   :  { %v5078_v48 = vpop.f32.mrb[42].mxu1 }
 0x775   :  { %v8708_v45 = vpop.f32.mrb[43].mxu1 }
 0x77c   :  { %v4927_v23 = vpop.f32.mrb[8].mxu0 }
 0x77d   :  { %v4928_v20 = vadd.f32 %v4927_v23, %v4837_v25  ;;  %v8673_v3 = vpop.f32.mrb[9].mxu0 }
 0x77f   :  { %v5079_v43 = vadd.f32 %v5078_v48, %v4928_v20 }
 0x794   :  { %v5271_v16 = vpop.f32.mrb[44].mxu1 }
 0x795   :  { %v8778_v57 = vpop.f32.mrb[45].mxu1 }
 0x79c   :  { %v5182_v49 = vpop.f32.mrb[10].mxu0 }
 0x79d   :  { %v5183_v54 = vadd.f32 %v5182_v49, %v5079_v43  ;;  %v8743_v9 = vpop.f32.mrb[11].mxu0 }
 0x79f   :  { %v5272_v28 = vadd.f32 %v5271_v16, %v5183_v54 }
 0x7b4   :  { %v5477_v21 = vpop.f32.mrb[46].mxu1 }
 0x7b5   :  { %v8848_v37 = vpop.f32.mrb[47].mxu1 }
 0x7bc   :  { %v5390_v30 = vpop.f32.mrb[12].mxu0 }
 0x7bd   :  { %v5391_v31 = vadd.f32 %v5390_v30, %v5272_v28  ;;  %v8813_v52 = vpop.f32.mrb[13].mxu0 }
 0x7bf   :  { %v5478_v62 = vadd.f32 %v5477_v21, %v5391_v31 }
 0x7d4   :  { %v5737_v24 = vpop.f32.mrb[48].mxu1 }
 0x7d5   :  { %v8918_v17 = vpop.f32.mrb[49].mxu1 }
 0x7dc   :  { %v5586_v35 = vpop.f32.mrb[14].mxu0 }
 0x7dd   :  { %v5738_v5 = vadd.f32 %v5737_v24, %v5586_v35  ;;  %v8883_v58 = vpop.f32.mrb[15].mxu0 }
 0x7f4   :  { %v5930_v15 = vpop.f32.mrb[50].mxu1 }
 0x7f5   :  { %v8988_v14 = vpop.f32.mrb[51].mxu1 }
 0x7fc   :  { %v5841_v26 = vpop.f32.mrb[16].mxu0 }
 0x7fd   :  { %v5842_v53 = vadd.f32 %v5841_v26, %v5738_v5  ;;  %v8953_v56 = vpop.f32.mrb[17].mxu0 }
 0x7ff   :  { %v5931_v12 = vadd.f32 %v5930_v15, %v5842_v53 }
 0x814   :  { %v6136_v33 = vpop.f32.mrb[52].mxu1 }
 0x815   :  { %v9058_v32 = vpop.f32.mrb[53].mxu1 }
 0x81c   :  { %v6049_v61 = vpop.f32.mrb[18].mxu0 }
 0x81d   :  { %v6050_v1 = vadd.f32 %v6049_v61, %v5931_v12  ;;  %v9023_v41 = vpop.f32.mrb[19].mxu0 }
 0x81f   :  { %v6137_v19 = vadd.f32 %v6136_v33, %v6050_v1 }
 0x821   :  { %v6140_v44 = vadd.f32 %v6137_v19, %v5478_v62 }
 0x823   :  { %v6148_v2 = vadd.f32 %v6232_v6, %v6140_v44 }
 0x825   :  { %6150 = vst.msk [vmem:[#allocation8] sm:$0xff] %vm6149_vm1, %v6148_v2 }
 0x826   :  { %10573 = shalt.err (!%p10570_p12)
}
 0x827   :  { %s10574_s11 = scalar_lea.hbm %s13642_s7, 128 }
 0x828   :  { %p10575_p13 = scmp.ne.s32.totalorder %s13642_s7, %s10574_s11  ;;  %p10578_p0 = scmp.lt.u32.totalorder %s10574_s11, %s13642_s7 }
 0x82a   :  { %p10580_p1 = pnand %p10578_p0, %p10575_p13 }
 0x82c   :  { %10583 = shalt.err (!%p10580_p1)
}
 0x82d   :  { %6160 = dma.vmem_to_hbm [thread:$0]  %s6158_s30, 128, %s13642_s7, [#allocation7]  }
 0x82e   :  { %10586 = dma.done.wait [#allocation7], 128  }
 0x82f   :  { %10587 = vsyncadd [#allocation7], 4294967168 }
 0x830   :  { %6164 = vsyncpa [#allocation6], 1 }
 0x831   :  { %6165 = vsyncpa [#allocation7], 1 }

</bundles_post_ra>
